<compile_context>
chip_gen: v7x
topology: tpu7x:2x2x1
jax: 0.10.0
libtpu: 0.0.40
codegen_flags: <defaults>
</compile_context>

<pallas_src>
import functools

import jax
import jax.numpy as jnp
from jax.experimental import pallas as pl
from jax.experimental.pallas import tpu as pltpu

VMEM_SPEC = pl.BlockSpec(memory_space=pltpu.MemorySpace.VMEM)


# ------------------------------ fused kernel -------------------------------

def _dqn_fused_kernel(B, S, P, H,
                      pt_ref, w1_ref, b1_ref, w2_ref, b2_ref, w3_ref, b3_ref,
                      w4_ref, b4_ref, wih_ref, whh_ref, bl_ref,
                      wa_ref, ba_ref, cw_ref, w5_ref, b5_ref,
                      o_ref,
                      z_scr, feat_scr, y4_scr):
    f32 = jnp.float32

    # --- conv1 (3x3 / stride 3 as a patch matmul) + conv2/conv3 (1x1) ---------
    # channels-as-rows layout: (C_out, B*P)
    z = jnp.maximum(jnp.dot(w1_ref[...], pt_ref[...], preferred_element_type=f32)
                    + b1_ref[...], 0.0)                                   # (84, B*P)
    z = jnp.maximum(jnp.dot(w2_ref[...], z, preferred_element_type=f32)
                    + b2_ref[...], 0.0)                                   # (42, B*P)
    z = jnp.maximum(jnp.dot(w3_ref[...], z, preferred_element_type=f32)
                    + b3_ref[...], 0.0)                                   # (21, B*P)
    z_scr[...] = z

    # --- PyTorch's x3.view(batch, seq, -1) -----------------------------------
    # per batch, the (21, P) block flattened row-major is split into S rows of F.
    # Realized as static VMEM slice copies (rows ordered time-major: r = s*B + b).
    F = feat_scr.shape[1]                                                 # 84
    for s in range(S):
        m0, m1 = s * F, (s + 1) * F
        for b in range(B):
            r = s * B + b
            for c in range(m0 // P, (m1 - 1) // P + 1):
                p_lo = max(0, m0 - c * P)
                p_hi = min(P, m1 - c * P)
                d_lo = c * P + p_lo - m0
                d_hi = c * P + p_hi - m0
                feat_scr[r:r + 1, d_lo:d_hi] = z_scr[c:c + 1,
                                                     b * P + p_lo:b * P + p_hi]
    feat = feat_scr[...]                                                  # (S*B, F)

    # --- fc4 + relu -----------------------------------------------------------
    y4_scr[...] = jnp.maximum(
        jnp.dot(feat, w4_ref[...], preferred_element_type=f32) + b4_ref[...], 0.0)

    # --- LSTM, fully unrolled; gate order i, f, g, o; bias = b_ih + b_hh -------
    wih = wih_ref[...]
    whh = whh_ref[...]
    bl = bl_ref[...]
    h = jnp.zeros((B, H), f32)
    c_st = jnp.zeros((B, H), f32)
    hs = []
    for t in range(S):
        x_t = y4_scr[t * B:(t + 1) * B, :]                                # (B, 168)
        g = (jnp.dot(x_t, wih, preferred_element_type=f32)
             + jnp.dot(h, whh, preferred_element_type=f32) + bl)          # (B, 4H)
        i_g = jax.nn.sigmoid(g[:, 0:H])
        f_g = jax.nn.sigmoid(g[:, H:2 * H])
        g_g = jnp.tanh(g[:, 2 * H:3 * H])
        o_g = jax.nn.sigmoid(g[:, 3 * H:4 * H])
        c_st = f_g * c_st + i_g * g_g
        h = o_g * jnp.tanh(c_st)
        hs.append(h)

    # --- attention: softmax over time, streamed (no (B,S) tensor needed) ------
    wa = wa_ref[...]
    ba = ba_ref[...]
    cw = cw_ref[...]                                                      # (1, H)
    logits = []
    for t in range(S):
        sc = jnp.tanh(jnp.dot(hs[t], wa, preferred_element_type=f32) + ba)
        logits.append(jnp.sum(sc * cw, axis=-1, keepdims=True))           # (B, 1)
    m = logits[0]
    for t in range(1, S):
        m = jnp.maximum(m, logits[t])
    num = jnp.zeros((B, H), f32)
    den = jnp.zeros((B, 1), f32)
    for t in range(S):
        e_t = jnp.exp(logits[t] - m)
        den = den + e_t
        num = num + e_t * hs[t]
    ctx = num / den                                                       # (B, H)

    # --- fc5 -------------------------------------------------------------------
    o_ref[...] = jnp.dot(ctx, w5_ref[...], preferred_element_type=f32) + b5_ref[...]


# ------------------------------- parameters --------------------------------

def init_params(key, in_channels, num_actions, hidden_dim):
    ks = jax.random.split(key, 17)

    def u(k, shape, fan_in):
        bound = 1.0 / jnp.sqrt(jnp.float32(fan_in))
        return jax.random.uniform(k, shape, jnp.float32, -bound, bound)

    H = hidden_dim
    return {
        "conv1_w": u(ks[0], (84, in_channels, 3, 3), in_channels * 9),
        "conv1_b": u(ks[1], (84,), in_channels * 9),
        "conv2_w": u(ks[2], (42, 84, 1, 1), 84),
        "conv2_b": u(ks[3], (42,), 84),
        "conv3_w": u(ks[4], (21, 42, 1, 1), 42),
        "conv3_b": u(ks[5], (21,), 42),
        "fc4_w": u(ks[6], (168, 84), 84),
        "fc4_b": u(ks[7], (168,), 84),
        "lstm_wih": u(ks[8], (4 * H, 168), H),
        "lstm_whh": u(ks[9], (4 * H, H), H),
        "lstm_bih": u(ks[10], (4 * H,), H),
        "lstm_bhh": u(ks[11], (4 * H,), H),
        "attn_w": u(ks[12], (H, H), H),
        "attn_b": u(ks[13], (H,), H),
        "ctx_w": u(ks[14], (1, H), H),
        "fc5_w": u(ks[15], (num_actions, H), H),
        "fc5_b": u(ks[16], (num_actions,), H),
    }


def prepare_params(p):
    """Hoisted (one-time) weight reshapes/transposes -> kernel-ready layouts."""
    cin = p["conv1_w"].shape[1]
    return {
        "w1": p["conv1_w"].reshape(84, cin * 9),        # channels-as-rows conv weights
        "b1": p["conv1_b"][:, None],
        "w2": p["conv2_w"].reshape(42, 84),
        "b2": p["conv2_b"][:, None],
        "w3": p["conv3_w"].reshape(21, 42),
        "b3": p["conv3_b"][:, None],
        "w4t": p["fc4_w"].T,                            # (84, 168)
        "b4": p["fc4_b"][None, :],
        "wih_t": p["lstm_wih"].T,                       # (168, 4H)
        "whh_t": p["lstm_whh"].T,                       # (H, 4H)
        "b_lstm": (p["lstm_bih"] + p["lstm_bhh"])[None, :],
        "wa_t": p["attn_w"].T,                          # (H, H)
        "ba": p["attn_b"][None, :],
        "cw": p["ctx_w"],                               # (1, H)
        "w5t": p["fc5_w"].T,                            # (H, A)
        "b5": p["fc5_b"][None, :],
    }


# --------------------------------- forward ---------------------------------

def dqn_forward(kp, x):
    B, Cin, Hin, Win = x.shape
    S = Cin                          # the PyTorch model reuses seq_len as in_channels
    Hp, Wp = Hin // 3, Win // 3
    P = Hp * Wp
    H = kp["whh_t"].shape[0]
    A = kp["w5t"].shape[1]
    C3 = kp["w3"].shape[0]
    F = (C3 * P) // S
    G = kp["w4t"].shape[1]

    # 3x3 / stride-3 patch extraction, channels-as-rows: (Cin*9, B*P)
    patches_t = (x.reshape(B, Cin, Hp, 3, Wp, 3)
                   .transpose(1, 3, 5, 0, 2, 4)
                   .reshape(Cin * 9, B * P))

    kernel = functools.partial(_dqn_fused_kernel, B, S, P, H)
    return pl.pallas_call(
        kernel,
        out_shape=jax.ShapeDtypeStruct((B, A), jnp.float32),
        in_specs=[VMEM_SPEC] * 17,
        out_specs=VMEM_SPEC,
        scratch_shapes=[
            pltpu.VMEM((C3, B * P), jnp.float32),   # conv3 output (channels-rows)
            pltpu.VMEM((S * B, F), jnp.float32),    # feat after the PyTorch "view"
            pltpu.VMEM((S * B, G), jnp.float32),    # fc4 output
        ],
    )(patches_t,
      kp["w1"], kp["b1"], kp["w2"], kp["b2"], kp["w3"], kp["b3"],
      kp["w4t"], kp["b4"], kp["wih_t"], kp["whh_t"], kp["b_lstm"],
      kp["wa_t"], kp["ba"], kp["cw"], kp["w5t"], kp["b5"])


# ----------------------------- pure-JAX reference ---------------------------

def dqn_reference(params, x, hidden_dim):
    B, S, _, _ = x.shape
    dn = ("NCHW", "OIHW", "NCHW")
    y = jax.lax.conv_general_dilated(x, params["conv1_w"], (3, 3), "VALID",
                                     dimension_numbers=dn)
    y = jax.nn.relu(y + params["conv1_b"][None, :, None, None])
    y = jax.lax.conv_general_dilated(y, params["conv2_w"], (1, 1), "VALID",
                                     dimension_numbers=dn)
    y = jax.nn.relu(y + params["conv2_b"][None, :, None, None])
    y = jax.lax.conv_general_dilated(y, params["conv3_w"], (1, 1), "VALID",
                                     dimension_numbers=dn)
    y = jax.nn.relu(y + params["conv3_b"][None, :, None, None])
    feat = y.reshape(B, S, -1)
    feat = jax.nn.relu(feat @ params["fc4_w"].T + params["fc4_b"])
    H = hidden_dim
    h = jnp.zeros((B, H), jnp.float32)
    c = jnp.zeros((B, H), jnp.float32)
    outs = []
    for t in range(S):
        g = (feat[:, t] @ params["lstm_wih"].T + params["lstm_bih"]
             + h @ params["lstm_whh"].T + params["lstm_bhh"])
        i = jax.nn.sigmoid(g[:, :H]); f = jax.nn.sigmoid(g[:, H:2 * H])
        gg = jnp.tanh(g[:, 2 * H:3 * H]); o = jax.nn.sigmoid(g[:, 3 * H:])
        c = f * c + i * gg
        h = o * jnp.tanh(c)
        outs.append(h)
    lstm_out = jnp.stack(outs, axis=1)
    scores = jnp.tanh(lstm_out @ params["attn_w"].T + params["attn_b"])
    logits = scores @ params["ctx_w"].T
    w = jax.nn.softmax(logits, axis=1)
    ctx = jnp.sum(w * lstm_out, axis=1)
    return ctx @ params["fc5_w"].T + params["fc5_b"]


# ------------------------------------ main -----------------------------------

if __name__ == "__main__":
    B, S, SP = 2, 4, 12          # S == in_channels; 12x12 -> 4x4 after 3x3/stride-3 conv
    NUM_ACTIONS, HIDDEN = 6, 128

    root = jax.random.PRNGKey(0)
    k_params, k_x = jax.random.split(root)
    params = init_params(k_params, in_channels=S, num_actions=NUM_ACTIONS,
                         hidden_dim=HIDDEN)
    x = jax.random.normal(k_x, (B, S, SP, SP), jnp.float32)

    kparams = prepare_params(params)       # one-time weight relayout (hoisted)
    fwd = jax.jit(dqn_forward)

    out = jax.block_until_ready(fwd(kparams, x))
    assert out.shape == (B, NUM_ACTIONS), out.shape

    ref = jax.block_until_ready(dqn_reference(params, x, HIDDEN))
    assert jnp.allclose(out, ref, rtol=1e-4, atol=1e-4), (out, ref)

    print("KERNEL_OK")
</pallas_src>

<mosaic_0001>
module attributes {stable_mosaic.version = 11 : i64} {
  func.func @_dqn_fused_kernel(%arg0: memref<36x32xf32, #tpu.memory_space<vmem>>, %arg1: memref<84x36xf32, #tpu.memory_space<vmem>>, %arg2: memref<84x1xf32, #tpu.memory_space<vmem>>, %arg3: memref<42x84xf32, #tpu.memory_space<vmem>>, %arg4: memref<42x1xf32, #tpu.memory_space<vmem>>, %arg5: memref<21x42xf32, #tpu.memory_space<vmem>>, %arg6: memref<21x1xf32, #tpu.memory_space<vmem>>, %arg7: memref<84x168xf32, #tpu.memory_space<vmem>>, %arg8: memref<1x168xf32, #tpu.memory_space<vmem>>, %arg9: memref<168x512xf32, #tpu.memory_space<vmem>>, %arg10: memref<128x512xf32, #tpu.memory_space<vmem>>, %arg11: memref<1x512xf32, #tpu.memory_space<vmem>>, %arg12: memref<128x128xf32, #tpu.memory_space<vmem>>, %arg13: memref<1x128xf32, #tpu.memory_space<vmem>>, %arg14: memref<1x128xf32, #tpu.memory_space<vmem>>, %arg15: memref<128x6xf32, #tpu.memory_space<vmem>>, %arg16: memref<1x6xf32, #tpu.memory_space<vmem>>, %arg17: memref<2x6xf32, #tpu.memory_space<vmem>>, %arg18: memref<21x32xf32, #tpu.memory_space<vmem>>, %arg19: memref<8x84xf32, #tpu.memory_space<vmem>>, %arg20: memref<8x168xf32, #tpu.memory_space<vmem>>) attributes {dimension_semantics = [], scalar_prefetch = 0 : i64, scratch_operands = 3 : i64, tpu.core_type = #tpu.core_type<tc>} {
    %c0 = arith.constant 0 : index
    %c0_0 = arith.constant 0 : index
    %0 = vector.load %arg1[%c0, %c0_0] : memref<84x36xf32, #tpu.memory_space<vmem>>, vector<84x36xf32>
    %c0_1 = arith.constant 0 : index
    %c0_2 = arith.constant 0 : index
    %1 = vector.load %arg0[%c0_1, %c0_2] : memref<36x32xf32, #tpu.memory_space<vmem>>, vector<36x32xf32>
    %cst = arith.constant dense<0.000000e+00> : vector<84x32xf32>
    %2 = tpu.matmul %0, %1, %cst {dimension_numbers = #tpu.dot_dimension_numbers<[1], [0], [0], [1], [0, 0, 1, 1], [], []>} : vector<84x36xf32>, vector<36x32xf32>, vector<84x32xf32> -> vector<84x32xf32>
    %c0_3 = arith.constant 0 : index
    %c0_4 = arith.constant 0 : index
    %3 = vector.load %arg2[%c0_3, %c0_4] : memref<84x1xf32, #tpu.memory_space<vmem>>, vector<84x1xf32>
    %4 = vector.broadcast %3 : vector<84x1xf32> to vector<84x32xf32>
    %5 = arith.addf %2, %4 : vector<84x32xf32>
    %cst_5 = arith.constant 0.000000e+00 : f32
    %6 = vector.broadcast %cst_5 : f32 to vector<84x32xf32>
    %7 = arith.maximumf %5, %6 : vector<84x32xf32>
    %c0_6 = arith.constant 0 : index
    %c0_7 = arith.constant 0 : index
    %8 = vector.load %arg3[%c0_6, %c0_7] : memref<42x84xf32, #tpu.memory_space<vmem>>, vector<42x84xf32>
    %cst_8 = arith.constant dense<0.000000e+00> : vector<42x32xf32>
    %9 = tpu.matmul %8, %7, %cst_8 {dimension_numbers = #tpu.dot_dimension_numbers<[1], [0], [0], [1], [0, 0, 1, 1], [], []>} : vector<42x84xf32>, vector<84x32xf32>, vector<42x32xf32> -> vector<42x32xf32>
    %c0_9 = arith.constant 0 : index
    %c0_10 = arith.constant 0 : index
    %10 = vector.load %arg4[%c0_9, %c0_10] : memref<42x1xf32, #tpu.memory_space<vmem>>, vector<42x1xf32>
    %11 = vector.broadcast %10 : vector<42x1xf32> to vector<42x32xf32>
    %12 = arith.addf %9, %11 : vector<42x32xf32>
    %cst_11 = arith.constant 0.000000e+00 : f32
    %13 = vector.broadcast %cst_11 : f32 to vector<42x32xf32>
    %14 = arith.maximumf %12, %13 : vector<42x32xf32>
    %c0_12 = arith.constant 0 : index
    %c0_13 = arith.constant 0 : index
    %15 = vector.load %arg5[%c0_12, %c0_13] : memref<21x42xf32, #tpu.memory_space<vmem>>, vector<21x42xf32>
    %cst_14 = arith.constant dense<0.000000e+00> : vector<21x32xf32>
    %16 = tpu.matmul %15, %14, %cst_14 {dimension_numbers = #tpu.dot_dimension_numbers<[1], [0], [0], [1], [0, 0, 1, 1], [], []>} : vector<21x42xf32>, vector<42x32xf32>, vector<21x32xf32> -> vector<21x32xf32>
    %c0_15 = arith.constant 0 : index
    %c0_16 = arith.constant 0 : index
    %17 = vector.load %arg6[%c0_15, %c0_16] : memref<21x1xf32, #tpu.memory_space<vmem>>, vector<21x1xf32>
    %18 = vector.broadcast %17 : vector<21x1xf32> to vector<21x32xf32>
    %19 = arith.addf %16, %18 : vector<21x32xf32>
    %cst_17 = arith.constant 0.000000e+00 : f32
    %20 = vector.broadcast %cst_17 : f32 to vector<21x32xf32>
    %21 = arith.maximumf %19, %20 : vector<21x32xf32>
    %c0_18 = arith.constant 0 : index
    %c0_19 = arith.constant 0 : index
    %22 = vector.load %arg18[%c0_18, %c0_19] : memref<21x32xf32, #tpu.memory_space<vmem>>, vector<21x32xf32>
    tpu.vector_store %arg18[%c0_18, %c0_19], %21 {strides = array<i32>} : memref<21x32xf32, #tpu.memory_space<vmem>>, vector<21x32xf32>,
    %c0_20 = arith.constant 0 : index
    %c0_21 = arith.constant 0 : index
    %23 = vector.load %arg18[%c0_20, %c0_21] : memref<21x32xf32, #tpu.memory_space<vmem>>, vector<1x16xf32>
    %c0_22 = arith.constant 0 : index
    %c0_23 = arith.constant 0 : index
    %24 = vector.load %arg19[%c0_22, %c0_23] : memref<8x84xf32, #tpu.memory_space<vmem>>, vector<1x16xf32>
    tpu.vector_store %arg19[%c0_22, %c0_23], %23 {strides = array<i32>} : memref<8x84xf32, #tpu.memory_space<vmem>>, vector<1x16xf32>,
    %c1 = arith.constant 1 : index
    %c0_24 = arith.constant 0 : index
    %25 = vector.load %arg18[%c1, %c0_24] : memref<21x32xf32, #tpu.memory_space<vmem>>, vector<1x16xf32>
    %c0_25 = arith.constant 0 : index
    %c16 = arith.constant 16 : index
    %26 = vector.load %arg19[%c0_25, %c16] : memref<8x84xf32, #tpu.memory_space<vmem>>, vector<1x16xf32>
    tpu.vector_store %arg19[%c0_25, %c16], %25 {strides = array<i32>} : memref<8x84xf32, #tpu.memory_space<vmem>>, vector<1x16xf32>,
    %c2 = arith.constant 2 : index
    %c0_26 = arith.constant 0 : index
    %27 = vector.load %arg18[%c2, %c0_26] : memref<21x32xf32, #tpu.memory_space<vmem>>, vector<1x16xf32>
    %c0_27 = arith.constant 0 : index
    %c32 = arith.constant 32 : index
    %28 = vector.load %arg19[%c0_27, %c32] : memref<8x84xf32, #tpu.memory_space<vmem>>, vector<1x16xf32>
    tpu.vector_store %arg19[%c0_27, %c32], %27 {strides = array<i32>} : memref<8x84xf32, #tpu.memory_space<vmem>>, vector<1x16xf32>,
    %c3 = arith.constant 3 : index
    %c0_28 = arith.constant 0 : index
    %29 = vector.load %arg18[%c3, %c0_28] : memref<21x32xf32, #tpu.memory_space<vmem>>, vector<1x16xf32>
    %c0_29 = arith.constant 0 : index
    %c48 = arith.constant 48 : index
    %30 = vector.load %arg19[%c0_29, %c48] : memref<8x84xf32, #tpu.memory_space<vmem>>, vector<1x16xf32>
    tpu.vector_store %arg19[%c0_29, %c48], %29 {strides = array<i32>} : memref<8x84xf32, #tpu.memory_space<vmem>>, vector<1x16xf32>,
    %c4 = arith.constant 4 : index
    %c0_30 = arith.constant 0 : index
    %31 = vector.load %arg18[%c4, %c0_30] : memref<21x32xf32, #tpu.memory_space<vmem>>, vector<1x16xf32>
    %c0_31 = arith.constant 0 : index
    %c64 = arith.constant 64 : index
    %32 = vector.load %arg19[%c0_31, %c64] : memref<8x84xf32, #tpu.memory_space<vmem>>, vector<1x16xf32>
    tpu.vector_store %arg19[%c0_31, %c64], %31 {strides = array<i32>} : memref<8x84xf32, #tpu.memory_space<vmem>>, vector<1x16xf32>,
    %c5 = arith.constant 5 : index
    %c0_32 = arith.constant 0 : index
    %33 = vector.load %arg18[%c5, %c0_32] : memref<21x32xf32, #tpu.memory_space<vmem>>, vector<1x4xf32>
    %c0_33 = arith.constant 0 : index
    %c80 = arith.constant 80 : index
    %34 = vector.load %arg19[%c0_33, %c80] : memref<8x84xf32, #tpu.memory_space<vmem>>, vector<1x4xf32>
    tpu.vector_store %arg19[%c0_33, %c80], %33 {strides = array<i32>} : memref<8x84xf32, #tpu.memory_space<vmem>>, vector<1x4xf32>,
    %c0_34 = arith.constant 0 : index
    %c16_35 = arith.constant 16 : index
    %35 = vector.load %arg18[%c0_34, %c16_35] : memref<21x32xf32, #tpu.memory_space<vmem>>, vector<1x16xf32>
    %c1_36 = arith.constant 1 : index
    %c0_37 = arith.constant 0 : index
    %36 = vector.load %arg19[%c1_36, %c0_37] : memref<8x84xf32, #tpu.memory_space<vmem>>, vector<1x16xf32>
    tpu.vector_store %arg19[%c1_36, %c0_37], %35 {strides = array<i32>} : memref<8x84xf32, #tpu.memory_space<vmem>>, vector<1x16xf32>,
    %c1_38 = arith.constant 1 : index
    %c16_39 = arith.constant 16 : index
    %37 = vector.load %arg18[%c1_38, %c16_39] : memref<21x32xf32, #tpu.memory_space<vmem>>, vector<1x16xf32>
    %c1_40 = arith.constant 1 : index
    %c16_41 = arith.constant 16 : index
    %38 = vector.load %arg19[%c1_40, %c16_41] : memref<8x84xf32, #tpu.memory_space<vmem>>, vector<1x16xf32>
    tpu.vector_store %arg19[%c1_40, %c16_41], %37 {strides = array<i32>} : memref<8x84xf32, #tpu.memory_space<vmem>>, vector<1x16xf32>,
    %c2_42 = arith.constant 2 : index
    %c16_43 = arith.constant 16 : index
    %39 = vector.load %arg18[%c2_42, %c16_43] : memref<21x32xf32, #tpu.memory_space<vmem>>, vector<1x16xf32>
    %c1_44 = arith.constant 1 : index
    %c32_45 = arith.constant 32 : index
    %40 = vector.load %arg19[%c1_44, %c32_45] : memref<8x84xf32, #tpu.memory_space<vmem>>, vector<1x16xf32>
    tpu.vector_store %arg19[%c1_44, %c32_45], %39 {strides = array<i32>} : memref<8x84xf32, #tpu.memory_space<vmem>>, vector<1x16xf32>,
    %c3_46 = arith.constant 3 : index
    %c16_47 = arith.constant 16 : index
    %41 = vector.load %arg18[%c3_46, %c16_47] : memref<21x32xf32, #tpu.memory_space<vmem>>, vector<1x16xf32>
    %c1_48 = arith.constant 1 : index
    %c48_49 = arith.constant 48 : index
    %42 = vector.load %arg19[%c1_48, %c48_49] : memref<8x84xf32, #tpu.memory_space<vmem>>, vector<1x16xf32>
    tpu.vector_store %arg19[%c1_48, %c48_49], %41 {strides = array<i32>} : memref<8x84xf32, #tpu.memory_space<vmem>>, vector<1x16xf32>,
    %c4_50 = arith.constant 4 : index
    %c16_51 = arith.constant 16 : index
    %43 = vector.load %arg18[%c4_50, %c16_51] : memref<21x32xf32, #tpu.memory_space<vmem>>, vector<1x16xf32>
    %c1_52 = arith.constant 1 : index
    %c64_53 = arith.constant 64 : index
    %44 = vector.load %arg19[%c1_52, %c64_53] : memref<8x84xf32, #tpu.memory_space<vmem>>, vector<1x16xf32>
    tpu.vector_store %arg19[%c1_52, %c64_53], %43 {strides = array<i32>} : memref<8x84xf32, #tpu.memory_space<vmem>>, vector<1x16xf32>,
    %c5_54 = arith.constant 5 : index
    %c16_55 = arith.constant 16 : index
    %45 = vector.load %arg18[%c5_54, %c16_55] : memref<21x32xf32, #tpu.memory_space<vmem>>, vector<1x4xf32>
    %c1_56 = arith.constant 1 : index
    %c80_57 = arith.constant 80 : index
    %46 = vector.load %arg19[%c1_56, %c80_57] : memref<8x84xf32, #tpu.memory_space<vmem>>, vector<1x4xf32>
    tpu.vector_store %arg19[%c1_56, %c80_57], %45 {strides = array<i32>} : memref<8x84xf32, #tpu.memory_space<vmem>>, vector<1x4xf32>,
    %c5_58 = arith.constant 5 : index
    %c4_59 = arith.constant 4 : index
    %47 = vector.load %arg18[%c5_58, %c4_59] : memref<21x32xf32, #tpu.memory_space<vmem>>, vector<1x12xf32>
    %c2_60 = arith.constant 2 : index
    %c0_61 = arith.constant 0 : index
    %48 = vector.load %arg19[%c2_60, %c0_61] : memref<8x84xf32, #tpu.memory_space<vmem>>, vector<1x12xf32>
    tpu.vector_store %arg19[%c2_60, %c0_61], %47 {strides = array<i32>} : memref<8x84xf32, #tpu.memory_space<vmem>>, vector<1x12xf32>,
    %c6 = arith.constant 6 : index
    %c0_62 = arith.constant 0 : index
    %49 = vector.load %arg18[%c6, %c0_62] : memref<21x32xf32, #tpu.memory_space<vmem>>, vector<1x16xf32>
    %c2_63 = arith.constant 2 : index
    %c12 = arith.constant 12 : index
    %50 = vector.load %arg19[%c2_63, %c12] : memref<8x84xf32, #tpu.memory_space<vmem>>, vector<1x16xf32>
    tpu.vector_store %arg19[%c2_63, %c12], %49 {strides = array<i32>} : memref<8x84xf32, #tpu.memory_space<vmem>>, vector<1x16xf32>,
    %c7 = arith.constant 7 : index
    %c0_64 = arith.constant 0 : index
    %51 = vector.load %arg18[%c7, %c0_64] : memref<21x32xf32, #tpu.memory_space<vmem>>, vector<1x16xf32>
    %c2_65 = arith.constant 2 : index
    %c28 = arith.constant 28 : index
    %52 = vector.load %arg19[%c2_65, %c28] : memref<8x84xf32, #tpu.memory_space<vmem>>, vector<1x16xf32>
    tpu.vector_store %arg19[%c2_65, %c28], %51 {strides = array<i32>} : memref<8x84xf32, #tpu.memory_space<vmem>>, vector<1x16xf32>,
    %c8 = arith.constant 8 : index
    %c0_66 = arith.constant 0 : index
    %53 = vector.load %arg18[%c8, %c0_66] : memref<21x32xf32, #tpu.memory_space<vmem>>, vector<1x16xf32>
    %c2_67 = arith.constant 2 : index
    %c44 = arith.constant 44 : index
    %54 = vector.load %arg19[%c2_67, %c44] : memref<8x84xf32, #tpu.memory_space<vmem>>, vector<1x16xf32>
    tpu.vector_store %arg19[%c2_67, %c44], %53 {strides = array<i32>} : memref<8x84xf32, #tpu.memory_space<vmem>>, vector<1x16xf32>,
    %c9 = arith.constant 9 : index
    %c0_68 = arith.constant 0 : index
    %55 = vector.load %arg18[%c9, %c0_68] : memref<21x32xf32, #tpu.memory_space<vmem>>, vector<1x16xf32>
    %c2_69 = arith.constant 2 : index
    %c60 = arith.constant 60 : index
    %56 = vector.load %arg19[%c2_69, %c60] : memref<8x84xf32, #tpu.memory_space<vmem>>, vector<1x16xf32>
    tpu.vector_store %arg19[%c2_69, %c60], %55 {strides = array<i32>} : memref<8x84xf32, #tpu.memory_space<vmem>>, vector<1x16xf32>,
    %c10 = arith.constant 10 : index
    %c0_70 = arith.constant 0 : index
    %57 = vector.load %arg18[%c10, %c0_70] : memref<21x32xf32, #tpu.memory_space<vmem>>, vector<1x8xf32>
    %c2_71 = arith.constant 2 : index
    %c76 = arith.constant 76 : index
    %58 = vector.load %arg19[%c2_71, %c76] : memref<8x84xf32, #tpu.memory_space<vmem>>, vector<1x8xf32>
    tpu.vector_store %arg19[%c2_71, %c76], %57 {strides = array<i32>} : memref<8x84xf32, #tpu.memory_space<vmem>>, vector<1x8xf32>,
    %c5_72 = arith.constant 5 : index
    %c20 = arith.constant 20 : index
    %59 = vector.load %arg18[%c5_72, %c20] : memref<21x32xf32, #tpu.memory_space<vmem>>, vector<1x12xf32>
    %c3_73 = arith.constant 3 : index
    %c0_74 = arith.constant 0 : index
    %60 = vector.load %arg19[%c3_73, %c0_74] : memref<8x84xf32, #tpu.memory_space<vmem>>, vector<1x12xf32>
    tpu.vector_store %arg19[%c3_73, %c0_74], %59 {strides = array<i32>} : memref<8x84xf32, #tpu.memory_space<vmem>>, vector<1x12xf32>,
    %c6_75 = arith.constant 6 : index
    %c16_76 = arith.constant 16 : index
    %61 = vector.load %arg18[%c6_75, %c16_76] : memref<21x32xf32, #tpu.memory_space<vmem>>, vector<1x16xf32>
    %c3_77 = arith.constant 3 : index
    %c12_78 = arith.constant 12 : index
    %62 = vector.load %arg19[%c3_77, %c12_78] : memref<8x84xf32, #tpu.memory_space<vmem>>, vector<1x16xf32>
    tpu.vector_store %arg19[%c3_77, %c12_78], %61 {strides = array<i32>} : memref<8x84xf32, #tpu.memory_space<vmem>>, vector<1x16xf32>,
    %c7_79 = arith.constant 7 : index
    %c16_80 = arith.constant 16 : index
    %63 = vector.load %arg18[%c7_79, %c16_80] : memref<21x32xf32, #tpu.memory_space<vmem>>, vector<1x16xf32>
    %c3_81 = arith.constant 3 : index
    %c28_82 = arith.constant 28 : index
    %64 = vector.load %arg19[%c3_81, %c28_82] : memref<8x84xf32, #tpu.memory_space<vmem>>, vector<1x16xf32>
    tpu.vector_store %arg19[%c3_81, %c28_82], %63 {strides = array<i32>} : memref<8x84xf32, #tpu.memory_space<vmem>>, vector<1x16xf32>,
    %c8_83 = arith.constant 8 : index
    %c16_84 = arith.constant 16 : index
    %65 = vector.load %arg18[%c8_83, %c16_84] : memref<21x32xf32, #tpu.memory_space<vmem>>, vector<1x16xf32>
    %c3_85 = arith.constant 3 : index
    %c44_86 = arith.constant 44 : index
    %66 = vector.load %arg19[%c3_85, %c44_86] : memref<8x84xf32, #tpu.memory_space<vmem>>, vector<1x16xf32>
    tpu.vector_store %arg19[%c3_85, %c44_86], %65 {strides = array<i32>} : memref<8x84xf32, #tpu.memory_space<vmem>>, vector<1x16xf32>,
    %c9_87 = arith.constant 9 : index
    %c16_88 = arith.constant 16 : index
    %67 = vector.load %arg18[%c9_87, %c16_88] : memref<21x32xf32, #tpu.memory_space<vmem>>, vector<1x16xf32>
    %c3_89 = arith.constant 3 : index
    %c60_90 = arith.constant 60 : index
    %68 = vector.load %arg19[%c3_89, %c60_90] : memref<8x84xf32, #tpu.memory_space<vmem>>, vector<1x16xf32>
    tpu.vector_store %arg19[%c3_89, %c60_90], %67 {strides = array<i32>} : memref<8x84xf32, #tpu.memory_space<vmem>>, vector<1x16xf32>,
    %c10_91 = arith.constant 10 : index
    %c16_92 = arith.constant 16 : index
    %69 = vector.load %arg18[%c10_91, %c16_92] : memref<21x32xf32, #tpu.memory_space<vmem>>, vector<1x8xf32>
    %c3_93 = arith.constant 3 : index
    %c76_94 = arith.constant 76 : index
    %70 = vector.load %arg19[%c3_93, %c76_94] : memref<8x84xf32, #tpu.memory_space<vmem>>, vector<1x8xf32>
    tpu.vector_store %arg19[%c3_93, %c76_94], %69 {strides = array<i32>} : memref<8x84xf32, #tpu.memory_space<vmem>>, vector<1x8xf32>,
    %c10_95 = arith.constant 10 : index
    %c8_96 = arith.constant 8 : index
    %71 = vector.load %arg18[%c10_95, %c8_96] : memref<21x32xf32, #tpu.memory_space<vmem>>, vector<1x8xf32>
    %c4_97 = arith.constant 4 : index
    %c0_98 = arith.constant 0 : index
    %72 = vector.load %arg19[%c4_97, %c0_98] : memref<8x84xf32, #tpu.memory_space<vmem>>, vector<1x8xf32>
    tpu.vector_store %arg19[%c4_97, %c0_98], %71 {strides = array<i32>} : memref<8x84xf32, #tpu.memory_space<vmem>>, vector<1x8xf32>,
    %c11 = arith.constant 11 : index
    %c0_99 = arith.constant 0 : index
    %73 = vector.load %arg18[%c11, %c0_99] : memref<21x32xf32, #tpu.memory_space<vmem>>, vector<1x16xf32>
    %c4_100 = arith.constant 4 : index
    %c8_101 = arith.constant 8 : index
    %74 = vector.load %arg19[%c4_100, %c8_101] : memref<8x84xf32, #tpu.memory_space<vmem>>, vector<1x16xf32>
    tpu.vector_store %arg19[%c4_100, %c8_101], %73 {strides = array<i32>} : memref<8x84xf32, #tpu.memory_space<vmem>>, vector<1x16xf32>,
    %c12_102 = arith.constant 12 : index
    %c0_103 = arith.constant 0 : index
    %75 = vector.load %arg18[%c12_102, %c0_103] : memref<21x32xf32, #tpu.memory_space<vmem>>, vector<1x16xf32>
    %c4_104 = arith.constant 4 : index
    %c24 = arith.constant 24 : index
    %76 = vector.load %arg19[%c4_104, %c24] : memref<8x84xf32, #tpu.memory_space<vmem>>, vector<1x16xf32>
    tpu.vector_store %arg19[%c4_104, %c24], %75 {strides = array<i32>} : memref<8x84xf32, #tpu.memory_space<vmem>>, vector<1x16xf32>,
    %c13 = arith.constant 13 : index
    %c0_105 = arith.constant 0 : index
    %77 = vector.load %arg18[%c13, %c0_105] : memref<21x32xf32, #tpu.memory_space<vmem>>, vector<1x16xf32>
    %c4_106 = arith.constant 4 : index
    %c40 = arith.constant 40 : index
    %78 = vector.load %arg19[%c4_106, %c40] : memref<8x84xf32, #tpu.memory_space<vmem>>, vector<1x16xf32>
    tpu.vector_store %arg19[%c4_106, %c40], %77 {strides = array<i32>} : memref<8x84xf32, #tpu.memory_space<vmem>>, vector<1x16xf32>,
    %c14 = arith.constant 14 : index
    %c0_107 = arith.constant 0 : index
    %79 = vector.load %arg18[%c14, %c0_107] : memref<21x32xf32, #tpu.memory_space<vmem>>, vector<1x16xf32>
    %c4_108 = arith.constant 4 : index
    %c56 = arith.constant 56 : index
    %80 = vector.load %arg19[%c4_108, %c56] : memref<8x84xf32, #tpu.memory_space<vmem>>, vector<1x16xf32>
    tpu.vector_store %arg19[%c4_108, %c56], %79 {strides = array<i32>} : memref<8x84xf32, #tpu.memory_space<vmem>>, vector<1x16xf32>,
    %c15 = arith.constant 15 : index
    %c0_109 = arith.constant 0 : index
    %81 = vector.load %arg18[%c15, %c0_109] : memref<21x32xf32, #tpu.memory_space<vmem>>, vector<1x12xf32>
    %c4_110 = arith.constant 4 : index
    %c72 = arith.constant 72 : index
    %82 = vector.load %arg19[%c4_110, %c72] : memref<8x84xf32, #tpu.memory_space<vmem>>, vector<1x12xf32>
    tpu.vector_store %arg19[%c4_110, %c72], %81 {strides = array<i32>} : memref<8x84xf32, #tpu.memory_space<vmem>>, vector<1x12xf32>,
    %c10_111 = arith.constant 10 : index
    %c24_112 = arith.constant 24 : index
    %83 = vector.load %arg18[%c10_111, %c24_112] : memref<21x32xf32, #tpu.memory_space<vmem>>, vector<1x8xf32>
    %c5_113 = arith.constant 5 : index
    %c0_114 = arith.constant 0 : index
    %84 = vector.load %arg19[%c5_113, %c0_114] : memref<8x84xf32, #tpu.memory_space<vmem>>, vector<1x8xf32>
    tpu.vector_store %arg19[%c5_113, %c0_114], %83 {strides = array<i32>} : memref<8x84xf32, #tpu.memory_space<vmem>>, vector<1x8xf32>,
    %c11_115 = arith.constant 11 : index
    %c16_116 = arith.constant 16 : index
    %85 = vector.load %arg18[%c11_115, %c16_116] : memref<21x32xf32, #tpu.memory_space<vmem>>, vector<1x16xf32>
    %c5_117 = arith.constant 5 : index
    %c8_118 = arith.constant 8 : index
    %86 = vector.load %arg19[%c5_117, %c8_118] : memref<8x84xf32, #tpu.memory_space<vmem>>, vector<1x16xf32>
    tpu.vector_store %arg19[%c5_117, %c8_118], %85 {strides = array<i32>} : memref<8x84xf32, #tpu.memory_space<vmem>>, vector<1x16xf32>,
    %c12_119 = arith.constant 12 : index
    %c16_120 = arith.constant 16 : index
    %87 = vector.load %arg18[%c12_119, %c16_120] : memref<21x32xf32, #tpu.memory_space<vmem>>, vector<1x16xf32>
    %c5_121 = arith.constant 5 : index
    %c24_122 = arith.constant 24 : index
    %88 = vector.load %arg19[%c5_121, %c24_122] : memref<8x84xf32, #tpu.memory_space<vmem>>, vector<1x16xf32>
    tpu.vector_store %arg19[%c5_121, %c24_122], %87 {strides = array<i32>} : memref<8x84xf32, #tpu.memory_space<vmem>>, vector<1x16xf32>,
    %c13_123 = arith.constant 13 : index
    %c16_124 = arith.constant 16 : index
    %89 = vector.load %arg18[%c13_123, %c16_124] : memref<21x32xf32, #tpu.memory_space<vmem>>, vector<1x16xf32>
    %c5_125 = arith.constant 5 : index
    %c40_126 = arith.constant 40 : index
    %90 = vector.load %arg19[%c5_125, %c40_126] : memref<8x84xf32, #tpu.memory_space<vmem>>, vector<1x16xf32>
    tpu.vector_store %arg19[%c5_125, %c40_126], %89 {strides = array<i32>} : memref<8x84xf32, #tpu.memory_space<vmem>>, vector<1x16xf32>,
    %c14_127 = arith.constant 14 : index
    %c16_128 = arith.constant 16 : index
    %91 = vector.load %arg18[%c14_127, %c16_128] : memref<21x32xf32, #tpu.memory_space<vmem>>, vector<1x16xf32>
    %c5_129 = arith.constant 5 : index
    %c56_130 = arith.constant 56 : index
    %92 = vector.load %arg19[%c5_129, %c56_130] : memref<8x84xf32, #tpu.memory_space<vmem>>, vector<1x16xf32>
    tpu.vector_store %arg19[%c5_129, %c56_130], %91 {strides = array<i32>} : memref<8x84xf32, #tpu.memory_space<vmem>>, vector<1x16xf32>,
    %c15_131 = arith.constant 15 : index
    %c16_132 = arith.constant 16 : index
    %93 = vector.load %arg18[%c15_131, %c16_132] : memref<21x32xf32, #tpu.memory_space<vmem>>, vector<1x12xf32>
    %c5_133 = arith.constant 5 : index
    %c72_134 = arith.constant 72 : index
    %94 = vector.load %arg19[%c5_133, %c72_134] : memref<8x84xf32, #tpu.memory_space<vmem>>, vector<1x12xf32>
    tpu.vector_store %arg19[%c5_133, %c72_134], %93 {strides = array<i32>} : memref<8x84xf32, #tpu.memory_space<vmem>>, vector<1x12xf32>,
    %c15_135 = arith.constant 15 : index
    %c12_136 = arith.constant 12 : index
    %95 = vector.load %arg18[%c15_135, %c12_136] : memref<21x32xf32, #tpu.memory_space<vmem>>, vector<1x4xf32>
    %c6_137 = arith.constant 6 : index
    %c0_138 = arith.constant 0 : index
    %96 = vector.load %arg19[%c6_137, %c0_138] : memref<8x84xf32, #tpu.memory_space<vmem>>, vector<1x4xf32>
    tpu.vector_store %arg19[%c6_137, %c0_138], %95 {strides = array<i32>} : memref<8x84xf32, #tpu.memory_space<vmem>>, vector<1x4xf32>,
    %c16_139 = arith.constant 16 : index
    %c0_140 = arith.constant 0 : index
    %97 = vector.load %arg18[%c16_139, %c0_140] : memref<21x32xf32, #tpu.memory_space<vmem>>, vector<1x16xf32>
    %c6_141 = arith.constant 6 : index
    %c4_142 = arith.constant 4 : index
    %98 = vector.load %arg19[%c6_141, %c4_142] : memref<8x84xf32, #tpu.memory_space<vmem>>, vector<1x16xf32>
    tpu.vector_store %arg19[%c6_141, %c4_142], %97 {strides = array<i32>} : memref<8x84xf32, #tpu.memory_space<vmem>>, vector<1x16xf32>,
    %c17 = arith.constant 17 : index
    %c0_143 = arith.constant 0 : index
    %99 = vector.load %arg18[%c17, %c0_143] : memref<21x32xf32, #tpu.memory_space<vmem>>, vector<1x16xf32>
    %c6_144 = arith.constant 6 : index
    %c20_145 = arith.constant 20 : index
    %100 = vector.load %arg19[%c6_144, %c20_145] : memref<8x84xf32, #tpu.memory_space<vmem>>, vector<1x16xf32>
    tpu.vector_store %arg19[%c6_144, %c20_145], %99 {strides = array<i32>} : memref<8x84xf32, #tpu.memory_space<vmem>>, vector<1x16xf32>,
    %c18 = arith.constant 18 : index
    %c0_146 = arith.constant 0 : index
    %101 = vector.load %arg18[%c18, %c0_146] : memref<21x32xf32, #tpu.memory_space<vmem>>, vector<1x16xf32>
    %c6_147 = arith.constant 6 : index
    %c36 = arith.constant 36 : index
    %102 = vector.load %arg19[%c6_147, %c36] : memref<8x84xf32, #tpu.memory_space<vmem>>, vector<1x16xf32>
    tpu.vector_store %arg19[%c6_147, %c36], %101 {strides = array<i32>} : memref<8x84xf32, #tpu.memory_space<vmem>>, vector<1x16xf32>,
    %c19 = arith.constant 19 : index
    %c0_148 = arith.constant 0 : index
    %103 = vector.load %arg18[%c19, %c0_148] : memref<21x32xf32, #tpu.memory_space<vmem>>, vector<1x16xf32>
    %c6_149 = arith.constant 6 : index
    %c52 = arith.constant 52 : index
    %104 = vector.load %arg19[%c6_149, %c52] : memref<8x84xf32, #tpu.memory_space<vmem>>, vector<1x16xf32>
    tpu.vector_store %arg19[%c6_149, %c52], %103 {strides = array<i32>} : memref<8x84xf32, #tpu.memory_space<vmem>>, vector<1x16xf32>,
    %c20_150 = arith.constant 20 : index
    %c0_151 = arith.constant 0 : index
    %105 = vector.load %arg18[%c20_150, %c0_151] : memref<21x32xf32, #tpu.memory_space<vmem>>, vector<1x16xf32>
    %c6_152 = arith.constant 6 : index
    %c68 = arith.constant 68 : index
    %106 = vector.load %arg19[%c6_152, %c68] : memref<8x84xf32, #tpu.memory_space<vmem>>, vector<1x16xf32>
    tpu.vector_store %arg19[%c6_152, %c68], %105 {strides = array<i32>} : memref<8x84xf32, #tpu.memory_space<vmem>>, vector<1x16xf32>,
    %c15_153 = arith.constant 15 : index
    %c28_154 = arith.constant 28 : index
    %107 = vector.load %arg18[%c15_153, %c28_154] : memref<21x32xf32, #tpu.memory_space<vmem>>, vector<1x4xf32>
    %c7_155 = arith.constant 7 : index
    %c0_156 = arith.constant 0 : index
    %108 = vector.load %arg19[%c7_155, %c0_156] : memref<8x84xf32, #tpu.memory_space<vmem>>, vector<1x4xf32>
    tpu.vector_store %arg19[%c7_155, %c0_156], %107 {strides = array<i32>} : memref<8x84xf32, #tpu.memory_space<vmem>>, vector<1x4xf32>,
    %c16_157 = arith.constant 16 : index
    %c16_158 = arith.constant 16 : index
    %109 = vector.load %arg18[%c16_157, %c16_158] : memref<21x32xf32, #tpu.memory_space<vmem>>, vector<1x16xf32>
    %c7_159 = arith.constant 7 : index
    %c4_160 = arith.constant 4 : index
    %110 = vector.load %arg19[%c7_159, %c4_160] : memref<8x84xf32, #tpu.memory_space<vmem>>, vector<1x16xf32>
    tpu.vector_store %arg19[%c7_159, %c4_160], %109 {strides = array<i32>} : memref<8x84xf32, #tpu.memory_space<vmem>>, vector<1x16xf32>,
    %c17_161 = arith.constant 17 : index
    %c16_162 = arith.constant 16 : index
    %111 = vector.load %arg18[%c17_161, %c16_162] : memref<21x32xf32, #tpu.memory_space<vmem>>, vector<1x16xf32>
    %c7_163 = arith.constant 7 : index
    %c20_164 = arith.constant 20 : index
    %112 = vector.load %arg19[%c7_163, %c20_164] : memref<8x84xf32, #tpu.memory_space<vmem>>, vector<1x16xf32>
    tpu.vector_store %arg19[%c7_163, %c20_164], %111 {strides = array<i32>} : memref<8x84xf32, #tpu.memory_space<vmem>>, vector<1x16xf32>,
    %c18_165 = arith.constant 18 : index
    %c16_166 = arith.constant 16 : index
    %113 = vector.load %arg18[%c18_165, %c16_166] : memref<21x32xf32, #tpu.memory_space<vmem>>, vector<1x16xf32>
    %c7_167 = arith.constant 7 : index
    %c36_168 = arith.constant 36 : index
    %114 = vector.load %arg19[%c7_167, %c36_168] : memref<8x84xf32, #tpu.memory_space<vmem>>, vector<1x16xf32>
    tpu.vector_store %arg19[%c7_167, %c36_168], %113 {strides = array<i32>} : memref<8x84xf32, #tpu.memory_space<vmem>>, vector<1x16xf32>,
    %c19_169 = arith.constant 19 : index
    %c16_170 = arith.constant 16 : index
    %115 = vector.load %arg18[%c19_169, %c16_170] : memref<21x32xf32, #tpu.memory_space<vmem>>, vector<1x16xf32>
    %c7_171 = arith.constant 7 : index
    %c52_172 = arith.constant 52 : index
    %116 = vector.load %arg19[%c7_171, %c52_172] : memref<8x84xf32, #tpu.memory_space<vmem>>, vector<1x16xf32>
    tpu.vector_store %arg19[%c7_171, %c52_172], %115 {strides = array<i32>} : memref<8x84xf32, #tpu.memory_space<vmem>>, vector<1x16xf32>,
    %c20_173 = arith.constant 20 : index
    %c16_174 = arith.constant 16 : index
    %117 = vector.load %arg18[%c20_173, %c16_174] : memref<21x32xf32, #tpu.memory_space<vmem>>, vector<1x16xf32>
    %c7_175 = arith.constant 7 : index
    %c68_176 = arith.constant 68 : index
    %118 = vector.load %arg19[%c7_175, %c68_176] : memref<8x84xf32, #tpu.memory_space<vmem>>, vector<1x16xf32>
    tpu.vector_store %arg19[%c7_175, %c68_176], %117 {strides = array<i32>} : memref<8x84xf32, #tpu.memory_space<vmem>>, vector<1x16xf32>,
    %c0_177 = arith.constant 0 : index
    %c0_178 = arith.constant 0 : index
    %119 = vector.load %arg19[%c0_177, %c0_178] : memref<8x84xf32, #tpu.memory_space<vmem>>, vector<8x84xf32>
    %c0_179 = arith.constant 0 : index
    %c0_180 = arith.constant 0 : index
    %120 = vector.load %arg7[%c0_179, %c0_180] : memref<84x168xf32, #tpu.memory_space<vmem>>, vector<84x168xf32>
    %cst_181 = arith.constant dense<0.000000e+00> : vector<8x168xf32>
    %121 = tpu.matmul %119, %120, %cst_181 {dimension_numbers = #tpu.dot_dimension_numbers<[1], [0], [0], [1], [0, 0, 1, 1], [], []>} : vector<8x84xf32>, vector<84x168xf32>, vector<8x168xf32> -> vector<8x168xf32>
    %c0_182 = arith.constant 0 : index
    %c0_183 = arith.constant 0 : index
    %122 = vector.load %arg8[%c0_182, %c0_183] : memref<1x168xf32, #tpu.memory_space<vmem>>, vector<1x168xf32>
    %123 = vector.broadcast %122 : vector<1x168xf32> to vector<8x168xf32>
    %124 = arith.addf %121, %123 : vector<8x168xf32>
    %cst_184 = arith.constant 0.000000e+00 : f32
    %125 = vector.broadcast %cst_184 : f32 to vector<8x168xf32>
    %126 = arith.maximumf %124, %125 : vector<8x168xf32>
    %c0_185 = arith.constant 0 : index
    %c0_186 = arith.constant 0 : index
    %127 = vector.load %arg20[%c0_185, %c0_186] : memref<8x168xf32, #tpu.memory_space<vmem>>, vector<8x168xf32>
    tpu.vector_store %arg20[%c0_185, %c0_186], %126 {strides = array<i32>} : memref<8x168xf32, #tpu.memory_space<vmem>>, vector<8x168xf32>,
    %c0_187 = arith.constant 0 : index
    %c0_188 = arith.constant 0 : index
    %128 = vector.load %arg9[%c0_187, %c0_188] : memref<168x512xf32, #tpu.memory_space<vmem>>, vector<168x512xf32>
    %c0_189 = arith.constant 0 : index
    %c0_190 = arith.constant 0 : index
    %129 = vector.load %arg10[%c0_189, %c0_190] : memref<128x512xf32, #tpu.memory_space<vmem>>, vector<128x512xf32>
    %c0_191 = arith.constant 0 : index
    %c0_192 = arith.constant 0 : index
    %130 = vector.load %arg11[%c0_191, %c0_192] : memref<1x512xf32, #tpu.memory_space<vmem>>, vector<1x512xf32>
    %cst_193 = arith.constant 0.000000e+00 : f32
    %131 = vector.broadcast %cst_193 : f32 to vector<2x128xf32>
    %cst_194 = arith.constant 0.000000e+00 : f32
    %132 = vector.broadcast %cst_194 : f32 to vector<2x128xf32>
    %c0_195 = arith.constant 0 : index
    %c0_196 = arith.constant 0 : index
    %133 = vector.load %arg20[%c0_195, %c0_196] : memref<8x168xf32, #tpu.memory_space<vmem>>, vector<2x168xf32>
    %cst_197 = arith.constant dense<0.000000e+00> : vector<2x512xf32>
    %134 = tpu.matmul %133, %128, %cst_197 {dimension_numbers = #tpu.dot_dimension_numbers<[1], [0], [0], [1], [0, 0, 1, 1], [], []>} : vector<2x168xf32>, vector<168x512xf32>, vector<2x512xf32> -> vector<2x512xf32>
    %cst_198 = arith.constant dense<0.000000e+00> : vector<2x512xf32>
    %135 = tpu.matmul %131, %129, %cst_198 {dimension_numbers = #tpu.dot_dimension_numbers<[1], [0], [0], [1], [0, 0, 1, 1], [], []>} : vector<2x128xf32>, vector<128x512xf32>, vector<2x512xf32> -> vector<2x512xf32>
    %136 = arith.addf %134, %135 : vector<2x512xf32>
    %137 = vector.broadcast %130 : vector<1x512xf32> to vector<2x512xf32>
    %138 = arith.addf %136, %137 : vector<2x512xf32>
    %139 = vector.extract_strided_slice %138 {offsets = [0, 0], sizes = [2, 128], strides = [1, 1]} : vector<2x512xf32> to vector<2x128xf32>
    %140 = arith.negf %139 : vector<2x128xf32>
    %141 = math.exp %140 : vector<2x128xf32>
    %cst_199 = arith.constant 1.000000e+00 : f32
    %142 = vector.broadcast %cst_199 : f32 to vector<2x128xf32>
    %143 = arith.addf %142, %141 : vector<2x128xf32>
    %144 = arith.divf %142, %143 : vector<2x128xf32>
    %145 = vector.extract_strided_slice %138 {offsets = [0, 128], sizes = [2, 128], strides = [1, 1]} : vector<2x512xf32> to vector<2x128xf32>
    %146 = arith.negf %145 : vector<2x128xf32>
    %147 = math.exp %146 : vector<2x128xf32>
    %cst_200 = arith.constant 1.000000e+00 : f32
    %148 = vector.broadcast %cst_200 : f32 to vector<2x128xf32>
    %149 = arith.addf %148, %147 : vector<2x128xf32>
    %150 = arith.divf %148, %149 : vector<2x128xf32>
    %151 = vector.extract_strided_slice %138 {offsets = [0, 256], sizes = [2, 128], strides = [1, 1]} : vector<2x512xf32> to vector<2x128xf32>
    %152 = math.tanh %151 : vector<2x128xf32>
    %153 = vector.extract_strided_slice %138 {offsets = [0, 384], sizes = [2, 128], strides = [1, 1]} : vector<2x512xf32> to vector<2x128xf32>
    %154 = arith.negf %153 : vector<2x128xf32>
    %155 = math.exp %154 : vector<2x128xf32>
    %cst_201 = arith.constant 1.000000e+00 : f32
    %156 = vector.broadcast %cst_201 : f32 to vector<2x128xf32>
    %157 = arith.addf %156, %155 : vector<2x128xf32>
    %158 = arith.divf %156, %157 : vector<2x128xf32>
    %159 = arith.mulf %150, %132 : vector<2x128xf32>
    %160 = arith.mulf %144, %152 : vector<2x128xf32>
    %161 = arith.addf %159, %160 : vector<2x128xf32>
    %162 = math.tanh %161 : vector<2x128xf32>
    %163 = arith.mulf %158, %162 : vector<2x128xf32>
    %c2_202 = arith.constant 2 : index
    %c0_203 = arith.constant 0 : index
    %164 = vector.load %arg20[%c2_202, %c0_203] : memref<8x168xf32, #tpu.memory_space<vmem>>, vector<2x168xf32>
    %cst_204 = arith.constant dense<0.000000e+00> : vector<2x512xf32>
    %165 = tpu.matmul %164, %128, %cst_204 {dimension_numbers = #tpu.dot_dimension_numbers<[1], [0], [0], [1], [0, 0, 1, 1], [], []>} : vector<2x168xf32>, vector<168x512xf32>, vector<2x512xf32> -> vector<2x512xf32>
    %cst_205 = arith.constant dense<0.000000e+00> : vector<2x512xf32>
    %166 = tpu.matmul %163, %129, %cst_205 {dimension_numbers = #tpu.dot_dimension_numbers<[1], [0], [0], [1], [0, 0, 1, 1], [], []>} : vector<2x128xf32>, vector<128x512xf32>, vector<2x512xf32> -> vector<2x512xf32>
    %167 = arith.addf %165, %166 : vector<2x512xf32>
    %168 = vector.broadcast %130 : vector<1x512xf32> to vector<2x512xf32>
    %169 = arith.addf %167, %168 : vector<2x512xf32>
    %170 = vector.extract_strided_slice %169 {offsets = [0, 0], sizes = [2, 128], strides = [1, 1]} : vector<2x512xf32> to vector<2x128xf32>
    %171 = arith.negf %170 : vector<2x128xf32>
    %172 = math.exp %171 : vector<2x128xf32>
    %cst_206 = arith.constant 1.000000e+00 : f32
    %173 = vector.broadcast %cst_206 : f32 to vector<2x128xf32>
    %174 = arith.addf %173, %172 : vector<2x128xf32>
    %175 = arith.divf %173, %174 : vector<2x128xf32>
    %176 = vector.extract_strided_slice %169 {offsets = [0, 128], sizes = [2, 128], strides = [1, 1]} : vector<2x512xf32> to vector<2x128xf32>
    %177 = arith.negf %176 : vector<2x128xf32>
    %178 = math.exp %177 : vector<2x128xf32>
    %cst_207 = arith.constant 1.000000e+00 : f32
    %179 = vector.broadcast %cst_207 : f32 to vector<2x128xf32>
    %180 = arith.addf %179, %178 : vector<2x128xf32>
    %181 = arith.divf %179, %180 : vector<2x128xf32>
    %182 = vector.extract_strided_slice %169 {offsets = [0, 256], sizes = [2, 128], strides = [1, 1]} : vector<2x512xf32> to vector<2x128xf32>
    %183 = math.tanh %182 : vector<2x128xf32>
    %184 = vector.extract_strided_slice %169 {offsets = [0, 384], sizes = [2, 128], strides = [1, 1]} : vector<2x512xf32> to vector<2x128xf32>
    %185 = arith.negf %184 : vector<2x128xf32>
    %186 = math.exp %185 : vector<2x128xf32>
    %cst_208 = arith.constant 1.000000e+00 : f32
    %187 = vector.broadcast %cst_208 : f32 to vector<2x128xf32>
    %188 = arith.addf %187, %186 : vector<2x128xf32>
    %189 = arith.divf %187, %188 : vector<2x128xf32>
    %190 = arith.mulf %181, %161 : vector<2x128xf32>
    %191 = arith.mulf %175, %183 : vector<2x128xf32>
    %192 = arith.addf %190, %191 : vector<2x128xf32>
    %193 = math.tanh %192 : vector<2x128xf32>
    %194 = arith.mulf %189, %193 : vector<2x128xf32>
    %c4_209 = arith.constant 4 : index
    %c0_210 = arith.constant 0 : index
    %195 = vector.load %arg20[%c4_209, %c0_210] : memref<8x168xf32, #tpu.memory_space<vmem>>, vector<2x168xf32>
    %cst_211 = arith.constant dense<0.000000e+00> : vector<2x512xf32>
    %196 = tpu.matmul %195, %128, %cst_211 {dimension_numbers = #tpu.dot_dimension_numbers<[1], [0], [0], [1], [0, 0, 1, 1], [], []>} : vector<2x168xf32>, vector<168x512xf32>, vector<2x512xf32> -> vector<2x512xf32>
    %cst_212 = arith.constant dense<0.000000e+00> : vector<2x512xf32>
    %197 = tpu.matmul %194, %129, %cst_212 {dimension_numbers = #tpu.dot_dimension_numbers<[1], [0], [0], [1], [0, 0, 1, 1], [], []>} : vector<2x128xf32>, vector<128x512xf32>, vector<2x512xf32> -> vector<2x512xf32>
    %198 = arith.addf %196, %197 : vector<2x512xf32>
    %199 = vector.broadcast %130 : vector<1x512xf32> to vector<2x512xf32>
    %200 = arith.addf %198, %199 : vector<2x512xf32>
    %201 = vector.extract_strided_slice %200 {offsets = [0, 0], sizes = [2, 128], strides = [1, 1]} : vector<2x512xf32> to vector<2x128xf32>
    %202 = arith.negf %201 : vector<2x128xf32>
    %203 = math.exp %202 : vector<2x128xf32>
    %cst_213 = arith.constant 1.000000e+00 : f32
    %204 = vector.broadcast %cst_213 : f32 to vector<2x128xf32>
    %205 = arith.addf %204, %203 : vector<2x128xf32>
    %206 = arith.divf %204, %205 : vector<2x128xf32>
    %207 = vector.extract_strided_slice %200 {offsets = [0, 128], sizes = [2, 128], strides = [1, 1]} : vector<2x512xf32> to vector<2x128xf32>
    %208 = arith.negf %207 : vector<2x128xf32>
    %209 = math.exp %208 : vector<2x128xf32>
    %cst_214 = arith.constant 1.000000e+00 : f32
    %210 = vector.broadcast %cst_214 : f32 to vector<2x128xf32>
    %211 = arith.addf %210, %209 : vector<2x128xf32>
    %212 = arith.divf %210, %211 : vector<2x128xf32>
    %213 = vector.extract_strided_slice %200 {offsets = [0, 256], sizes = [2, 128], strides = [1, 1]} : vector<2x512xf32> to vector<2x128xf32>
    %214 = math.tanh %213 : vector<2x128xf32>
    %215 = vector.extract_strided_slice %200 {offsets = [0, 384], sizes = [2, 128], strides = [1, 1]} : vector<2x512xf32> to vector<2x128xf32>
    %216 = arith.negf %215 : vector<2x128xf32>
    %217 = math.exp %216 : vector<2x128xf32>
    %cst_215 = arith.constant 1.000000e+00 : f32
    %218 = vector.broadcast %cst_215 : f32 to vector<2x128xf32>
    %219 = arith.addf %218, %217 : vector<2x128xf32>
    %220 = arith.divf %218, %219 : vector<2x128xf32>
    %221 = arith.mulf %212, %192 : vector<2x128xf32>
    %222 = arith.mulf %206, %214 : vector<2x128xf32>
    %223 = arith.addf %221, %222 : vector<2x128xf32>
    %224 = math.tanh %223 : vector<2x128xf32>
    %225 = arith.mulf %220, %224 : vector<2x128xf32>
    %c6_216 = arith.constant 6 : index
    %c0_217 = arith.constant 0 : index
    %226 = vector.load %arg20[%c6_216, %c0_217] : memref<8x168xf32, #tpu.memory_space<vmem>>, vector<2x168xf32>
    %cst_218 = arith.constant dense<0.000000e+00> : vector<2x512xf32>
    %227 = tpu.matmul %226, %128, %cst_218 {dimension_numbers = #tpu.dot_dimension_numbers<[1], [0], [0], [1], [0, 0, 1, 1], [], []>} : vector<2x168xf32>, vector<168x512xf32>, vector<2x512xf32> -> vector<2x512xf32>
    %cst_219 = arith.constant dense<0.000000e+00> : vector<2x512xf32>
    %228 = tpu.matmul %225, %129, %cst_219 {dimension_numbers = #tpu.dot_dimension_numbers<[1], [0], [0], [1], [0, 0, 1, 1], [], []>} : vector<2x128xf32>, vector<128x512xf32>, vector<2x512xf32> -> vector<2x512xf32>
    %229 = arith.addf %227, %228 : vector<2x512xf32>
    %230 = vector.broadcast %130 : vector<1x512xf32> to vector<2x512xf32>
    %231 = arith.addf %229, %230 : vector<2x512xf32>
    %232 = vector.extract_strided_slice %231 {offsets = [0, 0], sizes = [2, 128], strides = [1, 1]} : vector<2x512xf32> to vector<2x128xf32>
    %233 = arith.negf %232 : vector<2x128xf32>
    %234 = math.exp %233 : vector<2x128xf32>
    %cst_220 = arith.constant 1.000000e+00 : f32
    %235 = vector.broadcast %cst_220 : f32 to vector<2x128xf32>
    %236 = arith.addf %235, %234 : vector<2x128xf32>
    %237 = arith.divf %235, %236 : vector<2x128xf32>
    %238 = vector.extract_strided_slice %231 {offsets = [0, 128], sizes = [2, 128], strides = [1, 1]} : vector<2x512xf32> to vector<2x128xf32>
    %239 = arith.negf %238 : vector<2x128xf32>
    %240 = math.exp %239 : vector<2x128xf32>
    %cst_221 = arith.constant 1.000000e+00 : f32
    %241 = vector.broadcast %cst_221 : f32 to vector<2x128xf32>
    %242 = arith.addf %241, %240 : vector<2x128xf32>
    %243 = arith.divf %241, %242 : vector<2x128xf32>
    %244 = vector.extract_strided_slice %231 {offsets = [0, 256], sizes = [2, 128], strides = [1, 1]} : vector<2x512xf32> to vector<2x128xf32>
    %245 = math.tanh %244 : vector<2x128xf32>
    %246 = vector.extract_strided_slice %231 {offsets = [0, 384], sizes = [2, 128], strides = [1, 1]} : vector<2x512xf32> to vector<2x128xf32>
    %247 = arith.negf %246 : vector<2x128xf32>
    %248 = math.exp %247 : vector<2x128xf32>
    %cst_222 = arith.constant 1.000000e+00 : f32
    %249 = vector.broadcast %cst_222 : f32 to vector<2x128xf32>
    %250 = arith.addf %249, %248 : vector<2x128xf32>
    %251 = arith.divf %249, %250 : vector<2x128xf32>
    %252 = arith.mulf %243, %223 : vector<2x128xf32>
    %253 = arith.mulf %237, %245 : vector<2x128xf32>
    %254 = arith.addf %252, %253 : vector<2x128xf32>
    %255 = math.tanh %254 : vector<2x128xf32>
    %256 = arith.mulf %251, %255 : vector<2x128xf32>
    %c0_223 = arith.constant 0 : index
    %c0_224 = arith.constant 0 : index
    %257 = vector.load %arg12[%c0_223, %c0_224] : memref<128x128xf32, #tpu.memory_space<vmem>>, vector<128x128xf32>
    %c0_225 = arith.constant 0 : index
    %c0_226 = arith.constant 0 : index
    %258 = vector.load %arg13[%c0_225, %c0_226] : memref<1x128xf32, #tpu.memory_space<vmem>>, vector<1x128xf32>
    %c0_227 = arith.constant 0 : index
    %c0_228 = arith.constant 0 : index
    %259 = vector.load %arg14[%c0_227, %c0_228] : memref<1x128xf32, #tpu.memory_space<vmem>>, vector<1x128xf32>
    %cst_229 = arith.constant dense<0.000000e+00> : vector<2x128xf32>
    %260 = tpu.matmul %163, %257, %cst_229 {dimension_numbers = #tpu.dot_dimension_numbers<[1], [0], [0], [1], [0, 0, 1, 1], [], []>} : vector<2x128xf32>, vector<128x128xf32>, vector<2x128xf32> -> vector<2x128xf32>
    %261 = vector.broadcast %258 : vector<1x128xf32> to vector<2x128xf32>
    %262 = arith.addf %260, %261 : vector<2x128xf32>
    %263 = math.tanh %262 : vector<2x128xf32>
    %264 = vector.broadcast %259 : vector<1x128xf32> to vector<2x128xf32>
    %265 = arith.mulf %263, %264 : vector<2x128xf32>
    %cst_230 = arith.constant dense<0.000000e+00> : vector<2xf32>
    %266 = vector.multi_reduction <add>, %265, %cst_230 [1] : vector<2x128xf32> to vector<2xf32>
    %267 = vector.shape_cast %266 : vector<2xf32> to vector<2x1xf32>
    %cst_231 = arith.constant dense<0.000000e+00> : vector<2x128xf32>
    %268 = tpu.matmul %194, %257, %cst_231 {dimension_numbers = #tpu.dot_dimension_numbers<[1], [0], [0], [1], [0, 0, 1, 1], [], []>} : vector<2x128xf32>, vector<128x128xf32>, vector<2x128xf32> -> vector<2x128xf32>
    %269 = vector.broadcast %258 : vector<1x128xf32> to vector<2x128xf32>
    %270 = arith.addf %268, %269 : vector<2x128xf32>
    %271 = math.tanh %270 : vector<2x128xf32>
    %272 = vector.broadcast %259 : vector<1x128xf32> to vector<2x128xf32>
    %273 = arith.mulf %271, %272 : vector<2x128xf32>
    %cst_232 = arith.constant dense<0.000000e+00> : vector<2xf32>
    %274 = vector.multi_reduction <add>, %273, %cst_232 [1] : vector<2x128xf32> to vector<2xf32>
    %275 = vector.shape_cast %274 : vector<2xf32> to vector<2x1xf32>
    %cst_233 = arith.constant dense<0.000000e+00> : vector<2x128xf32>
    %276 = tpu.matmul %225, %257, %cst_233 {dimension_numbers = #tpu.dot_dimension_numbers<[1], [0], [0], [1], [0, 0, 1, 1], [], []>} : vector<2x128xf32>, vector<128x128xf32>, vector<2x128xf32> -> vector<2x128xf32>
    %277 = vector.broadcast %258 : vector<1x128xf32> to vector<2x128xf32>
    %278 = arith.addf %276, %277 : vector<2x128xf32>
    %279 = math.tanh %278 : vector<2x128xf32>
    %280 = vector.broadcast %259 : vector<1x128xf32> to vector<2x128xf32>
    %281 = arith.mulf %279, %280 : vector<2x128xf32>
    %cst_234 = arith.constant dense<0.000000e+00> : vector<2xf32>
    %282 = vector.multi_reduction <add>, %281, %cst_234 [1] : vector<2x128xf32> to vector<2xf32>
    %283 = vector.shape_cast %282 : vector<2xf32> to vector<2x1xf32>
    %cst_235 = arith.constant dense<0.000000e+00> : vector<2x128xf32>
    %284 = tpu.matmul %256, %257, %cst_235 {dimension_numbers = #tpu.dot_dimension_numbers<[1], [0], [0], [1], [0, 0, 1, 1], [], []>} : vector<2x128xf32>, vector<128x128xf32>, vector<2x128xf32> -> vector<2x128xf32>
    %285 = vector.broadcast %258 : vector<1x128xf32> to vector<2x128xf32>
    %286 = arith.addf %284, %285 : vector<2x128xf32>
    %287 = math.tanh %286 : vector<2x128xf32>
    %288 = vector.broadcast %259 : vector<1x128xf32> to vector<2x128xf32>
    %289 = arith.mulf %287, %288 : vector<2x128xf32>
    %cst_236 = arith.constant dense<0.000000e+00> : vector<2xf32>
    %290 = vector.multi_reduction <add>, %289, %cst_236 [1] : vector<2x128xf32> to vector<2xf32>
    %291 = vector.shape_cast %290 : vector<2xf32> to vector<2x1xf32>
    %292 = arith.maximumf %267, %275 : vector<2x1xf32>
    %293 = arith.maximumf %292, %283 : vector<2x1xf32>
    %294 = arith.maximumf %293, %291 : vector<2x1xf32>
    %cst_237 = arith.constant 0.000000e+00 : f32
    %295 = vector.broadcast %cst_237 : f32 to vector<2x128xf32>
    %cst_238 = arith.constant 0.000000e+00 : f32
    %296 = vector.broadcast %cst_238 : f32 to vector<2x1xf32>
    %297 = arith.subf %267, %294 : vector<2x1xf32>
    %298 = math.exp %297 : vector<2x1xf32>
    %299 = arith.addf %296, %298 : vector<2x1xf32>
    %300 = vector.broadcast %298 : vector<2x1xf32> to vector<2x128xf32>
    %301 = arith.mulf %300, %163 : vector<2x128xf32>
    %302 = arith.addf %295, %301 : vector<2x128xf32>
    %303 = arith.subf %275, %294 : vector<2x1xf32>
    %304 = math.exp %303 : vector<2x1xf32>
    %305 = arith.addf %299, %304 : vector<2x1xf32>
    %306 = vector.broadcast %304 : vector<2x1xf32> to vector<2x128xf32>
    %307 = arith.mulf %306, %194 : vector<2x128xf32>
    %308 = arith.addf %302, %307 : vector<2x128xf32>
    %309 = arith.subf %283, %294 : vector<2x1xf32>
    %310 = math.exp %309 : vector<2x1xf32>
    %311 = arith.addf %305, %310 : vector<2x1xf32>
    %312 = vector.broadcast %310 : vector<2x1xf32> to vector<2x128xf32>
    %313 = arith.mulf %312, %225 : vector<2x128xf32>
    %314 = arith.addf %308, %313 : vector<2x128xf32>
    %315 = arith.subf %291, %294 : vector<2x1xf32>
    %316 = math.exp %315 : vector<2x1xf32>
    %317 = arith.addf %311, %316 : vector<2x1xf32>
    %318 = vector.broadcast %316 : vector<2x1xf32> to vector<2x128xf32>
    %319 = arith.mulf %318, %256 : vector<2x128xf32>
    %320 = arith.addf %314, %319 : vector<2x128xf32>
    %321 = vector.broadcast %317 : vector<2x1xf32> to vector<2x128xf32>
    %322 = arith.divf %320, %321 : vector<2x128xf32>
    %c0_239 = arith.constant 0 : index
    %c0_240 = arith.constant 0 : index
    %323 = vector.load %arg15[%c0_239, %c0_240] : memref<128x6xf32, #tpu.memory_space<vmem>>, vector<128x6xf32>
    %cst_241 = arith.constant dense<0.000000e+00> : vector<2x6xf32>
    %324 = tpu.matmul %322, %323, %cst_241 {dimension_numbers = #tpu.dot_dimension_numbers<[1], [0], [0], [1], [0, 0, 1, 1], [], []>} : vector<2x128xf32>, vector<128x6xf32>, vector<2x6xf32> -> vector<2x6xf32>
    %c0_242 = arith.constant 0 : index
    %c0_243 = arith.constant 0 : index
    %325 = vector.load %arg16[%c0_242, %c0_243] : memref<1x6xf32, #tpu.memory_space<vmem>>, vector<1x6xf32>
    %326 = vector.broadcast %325 : vector<1x6xf32> to vector<2x6xf32>
    %327 = arith.addf %324, %326 : vector<2x6xf32>
    %c0_244 = arith.constant 0 : index
    %c0_245 = arith.constant 0 : index
    %328 = vector.load %arg17[%c0_244, %c0_245] : memref<2x6xf32, #tpu.memory_space<vmem>>, vector<2x6xf32>
    tpu.vector_store %arg17[%c0_244, %c0_245], %327 {strides = array<i32>} : memref<2x6xf32, #tpu.memory_space<vmem>>, vector<2x6xf32>,
    return
  }
}

</mosaic_0001>

<bundles_post_ra>
// kernel: dqn_forward.1
= control target key start
LH: loop header
LB: loop body
LE: loop exit
PB: predicated region body
PF: predicated region fallthrough
CT: control target
= control target key end

     0   :  { %s5852_s0 = inlined_call_operand.vmem [shape: f32[36,32], index: 0, kind: input, shape index: {}]   ;;  %s5853_s1 = inlined_call_operand.vmem [shape: f32[84,36], index: 1, kind: input, shape index: {}]   ;;  %s5854_s2 = inlined_call_operand.vmem [shape: f32[84,1], index: 2, kind: input, shape index: {}]   ;;  %s5855_s3 = inlined_call_operand.vmem [shape: f32[42,84], index: 3, kind: input, shape index: {}]   ;;  %s5856_s4 = inlined_call_operand.vmem [shape: f32[42,1], index: 4, kind: input, shape index: {}]   ;;  %s5857_s5 = inlined_call_operand.vmem [shape: f32[21,42], index: 5, kind: input, shape index: {}]   ;;  %s5858_s6 = inlined_call_operand.vmem [shape: f32[21,1], index: 6, kind: input, shape index: {}]   ;;  %s5859_s7 = inlined_call_operand.vmem [shape: f32[84,168], index: 7, kind: input, shape index: {}]   ;;  %s5860_s8 = inlined_call_operand.vmem [shape: f32[1,168], index: 8, kind: input, shape index: {}]   ;;  %s5861_s9 = inlined_call_operand.vmem [shape: f32[168,512], index: 9, kind: input, shape index: {}]   ;;  %s5862_s10 = inlined_call_operand.vmem [shape: f32[128,512], index: 10, kind: input, shape index: {}]   ;;  %s5863_s11 = inlined_call_operand.vmem [shape: f32[1,512], index: 11, kind: input, shape index: {}]   ;;  %s5864_s12 = inlined_call_operand.vmem [shape: f32[128,128], index: 12, kind: input, shape index: {}]   ;;  %s5865_s13 = inlined_call_operand.vmem [shape: f32[1,128], index: 13, kind: input, shape index: {}]   ;;  %s5866_s14 = inlined_call_operand.vmem [shape: f32[1,128], index: 14, kind: input, shape index: {}]   ;;  %s5867_s15 = inlined_call_operand.vmem [shape: f32[128,6], index: 15, kind: input, shape index: {}]   ;;  %s5868_s16 = inlined_call_operand.vmem [shape: f32[1,6], index: 16, kind: input, shape index: {}]   ;;  %s5869_s17 = inlined_call_operand.hbm [shape: f32[2,6], index: 17, kind: output, shape index: {}]  }
   0x1   :  { %5962 = sst [smem:[#allocation58_spill]] %s5852_s0 }
   0x2   :  { %5963 = sst [smem:[#allocation59_spill]] %s5853_s1 }
   0x3   :  { %s5964_s26 = sld [smem:[#allocation58_spill]]  ;;  %v5872_v3 = vmov 0.0|0.0   ;;  %vm4294_vm0 = vmmov 0   ;;  %v5874_v6 = vmov 0.0   ;;  %v4296_v8 = vmov 0   ;;  %v73_v9 = vld [vmem:[%s5854_s2] sm:$0xff] }
   0x4   :  { %3384 = vmatprep.subr.bf16.mxu0 %v5872_v3  ;;  %3124 = vmatprep.mubr.msk.f32.mxu0 %vm4294_vm0, %v5874_v6  ;;  %v75_v10 = vld [vmem:[%s5854_s2 + $0x10] sm:$0xff]  ;;  %v74_v11 = vld [vmem:[%s5854_s2 + $0x8] sm:$0xff]  ;;  %v76_v12 = vld [vmem:[%s5854_s2 + $0x18] sm:$0xff]  ;;  %vm173_vm1 = vcmask 1043456   ;;  %s5965_s30 = sld [smem:[#allocation59_spill]]  ;;  %vm139_vm2 = vcmask 293888  }
   0x5   :  { %4185 = vset.pattern.permute.xlu0 %v4296_v8  ;;  %4186 = vset.pattern.permute.xlu1 %v4296_v8  ;;  %v77_v15 = vld [vmem:[%s5854_s2 + $0x20] sm:$0xff]  ;;  %v78_v16 = vld [vmem:[%s5854_s2 + $0x28] sm:$0xff] }
   0x6   :  { %86 = vperm.xlu0 %4185, %v73_v9   ;;  %96 = vperm.xlu1 %4186, %v75_v10  }
   0x9   :  { %v68_v0 = vld [vmem:[%s5964_s26] sm:$0xff]  ;;  %v69_v1 = vld [vmem:[%s5964_s26 + $0x8] sm:$0xff]  ;;  %v70_v2 = vld [vmem:[%s5964_s26 + $0x10] sm:$0xff] }
   0xa   :  { %v3385_v4 = vpack.c.bf16 %v69_v1, %v68_v0  ;;  %v71_v5 = vld [vmem:[%s5964_s26 + $0x18] sm:$0xff]  ;;  %v72_v13 = vld [vmem:[%s5964_s26 + $0x20] sm:$0xf]  ;;  %91 = vperm.xlu0 %4185, %v74_v11   ;;  %101 = vperm.xlu1 %4186, %v76_v12  }
   0xb   :  { %v3388_v7 = vpack.c.bf16 %v71_v5, %v70_v2  ;;  %v57_v14 = vld [vmem:[%s5965_s30] sm:$0xff] }
   0xc   :  { %3386 = vmatpush3.bf16.msra.mxu0 %v3385_v4 }
   0xd   :  { %3387 = vmatprep.subr.bf16.mxu0 %v5872_v3 }
  0x10   :  { %3389 = vmatpush3.bf16.msra.mxu0 %v3388_v7 }
  0x11   :  { %3122 = vmatprep.subr.mxu0 %v5874_v6 }
  0x14   :  { %3123 = vmatpush3.msk.msra.mxu0 %vm173_vm1, %v72_v13 }
  0x15   :  { %3125 = vmatmul.mubr.msk.f32.vlgmr.msra.gmra.mrb[0].mxu0 %vm139_vm2, %v57_v14 }
  0x16   :  { %22 = vsyncpa [#allocation6], 0  ;;  %3127 = vmatprep.mubr.msk.f32.mxu0 %vm4294_vm0, %v5874_v6  ;;  %v58_v17 = vld [vmem:[%s5965_s30 + $0x8] sm:$0xff]  ;;  %106 = vperm.xlu0 %4185, %v77_v15   ;;  %v79_v18 = vld [vmem:[%s5854_s2 + $0x30] sm:$0xff]  ;;  %vm350_vm3 = vcmask 687104   ;;  %vm504_vm4 = vcmask 1041408  }
  0x17   :  { %111 = vperm.xlu1 %4186, %v78_v16   ;;  %v80_v19 = vld [vmem:[%s5854_s2 + $0x38] sm:$0xff]  ;;  %v59_v20 = vld [vmem:[%s5965_s30 + $0x10] sm:$0xff]  ;;  %v81_v21 = vld [vmem:[%s5854_s2 + $0x40] sm:$0xff]  ;;  %vm4297_vm5 = vmmov 1   ;;  %vm494_vm7 = vcmask 343040   ;;  %vm591_vm8 = vcmask 261120  }
  0x18   :  { %v82_v22 = vld [vmem:[%s5854_s2 + $0x48] sm:$0xff]  ;;  %v60_v23 = vld [vmem:[%s5965_s30 + $0x18] sm:$0xff]  ;;  %v83_v24 = vld [vmem:[%s5854_s2 + $0x50] sm:$0xf]  ;;  %vm594_vm9 = vcmask 258048   ;;  %s4299_s21 = smov 112  }
  0x19   :  { %3128 = vmatmul.mubr.msk.f32.gmra.mrb[2].mxu0 %vm139_vm2, %v58_v17  ;;  %v314_v25 = vld [vmem:[%s5856_s4] sm:$0xff]  ;;  %v315_v27 = vld [vmem:[%s5856_s4 + $0x8] sm:$0xff]  ;;  %v316_v28 = vld [vmem:[%s5856_s4 + $0x10] sm:$0xff]  ;;  %s4300_s22 = smov 108   ;;  %s4301_s23 = smov 16   ;;  %vm597_vm10 = vcmask 122880  }
  0x1a   :  { %3130 = vmatprep.mubr.msk.f32.mxu0 %vm4294_vm0, %v5874_v6  ;;  %116 = vperm.xlu0 %4185, %v79_v18   ;;  %v61_v26 = vld [vmem:[%s5965_s30 + $0x20] sm:$0xff]  ;;  %v62_v29 = vld [vmem:[%s5965_s30 + $0x28] sm:$0xff]  ;;  %v317_v30 = vld [vmem:[%s5856_s4 + $0x18] sm:$0xff]  ;;  %s4303_s24 = smov 32   ;;  %s4304_s25 = smov 28   ;;  %vm671_vm11 = vcmask 90112  }
  0x1b   :  { %121 = vperm.xlu1 %4186, %v80_v19   ;;  %v318_v31 = vld [vmem:[%s5856_s4 + $0x20] sm:$0xff]  ;;  %v63_v32 = vld [vmem:[%s5965_s30 + $0x30] sm:$0xff]  ;;  %v319_v33 = vld [vmem:[%s5856_s4 + $0x28] sm:$0x3]  ;;  %s4305_s27 = smov 48   ;;  %s4306_s28 = smov 64  }
  0x1c   :  { %v476_v34 = vld [vmem:[%s5858_s6] sm:$0xff]  ;;  %v64_v35 = vld [vmem:[%s5965_s30 + $0x38] sm:$0xff]  ;;  %v477_v36 = vld [vmem:[%s5858_s6 + $0x8] sm:$0xff]  ;;  %s4307_s2 = smov 80   ;;  %s4308_s29 = smov 104   ;;  %vm604_vm12 = vcmask 254080  }
  0x1d   :  { %3131 = vmatmul.mubr.msk.f32.gmra.mrb[4].mxu0 %vm139_vm2, %v59_v20  ;;  %v478_v37 = vld [vmem:[%s5858_s6 + $0x10] sm:$0x1f]  ;;  %v65_v38 = vld [vmem:[%s5965_s30 + $0x40] sm:$0xff]  ;;  %v66_v39 = vld [vmem:[%s5965_s30 + $0x48] sm:$0xff]  ;;  %s4309_s0 = smov 120   ;;  %s4310_s4 = smov 100  }
  0x1e   :  { %3133 = vmatprep.mubr.msk.f32.mxu0 %vm4294_vm0, %v5874_v6  ;;  %126 = vperm.xlu0 %4185, %v81_v21   ;;  %v67_v40 = vld [vmem:[%s5965_s30 + $0x50] sm:$0xf]  ;;  %v308_v41 = vld [vmem:[%s5855_s3] sm:$0xff]  ;;  %vm3418_vm6 = vmpackc.low %vm504_vm4, %vm4297_vm5  ;;  %s4302_s30 = smov 12   ;;  %s4311_s18 = smov 116   ;;  %vm678_vm13 = vcmask 221280  }
  0x1f   :  { %131 = vperm.xlu1 %4186, %v82_v22   ;;  %3179 = vmatprep.mubr.msk.f32.mxu1 %vm350_vm3, %v308_v41  ;;  %v310_v41 = vld [vmem:[%s5855_s3 + $0x10] sm:$0xff]  ;;  %s4318_s19 = smov 76   ;;  %s4323_s20 = smov 52   ;;  %vm611_vm14 = vcmask 385280   ;;  %vm685_vm15 = vcmask 352480   ;;  %vm632_vm5 = vcmask 680576  }
  0x21   :  { %3134 = vmatmul.mubr.msk.f32.gmra.mrb[6].mxu0 %vm139_vm2, %v60_v23 }
  0x22   :  { %3136 = vmatprep.mubr.msk.f32.mxu0 %vm4294_vm0, %v5874_v6  ;;  %136 = vperm.xlu0 %4185, %v83_v24  }
  0x23   :  { %322 = vperm.xlu1 %4186, %v314_v25  }
  0x25   :  { %3137 = vmatmul.mubr.msk.f32.gmra.mrb[8].mxu0 %vm139_vm2, %v61_v26 }
  0x26   :  { %3139 = vmatprep.mubr.msk.f32.mxu0 %vm4294_vm0, %v5874_v6  ;;  %327 = vperm.xlu0 %4185, %v315_v27  }
  0x27   :  { %332 = vperm.xlu1 %4186, %v316_v28  }
  0x29   :  { %3140 = vmatmul.mubr.msk.f32.gmra.mrb[10].mxu0 %vm139_vm2, %v62_v29 }
  0x2a   :  { %3142 = vmatprep.mubr.msk.f32.mxu0 %vm4294_vm0, %v5874_v6  ;;  %337 = vperm.xlu0 %4185, %v317_v30  }
  0x2b   :  { %342 = vperm.xlu1 %4186, %v318_v31  }
  0x2d   :  { %3143 = vmatmul.mubr.msk.f32.gmra.mrb[12].mxu0 %vm139_vm2, %v63_v32 }
  0x2e   :  { %3145 = vmatprep.mubr.msk.f32.mxu0 %vm4294_vm0, %v5874_v6  ;;  %347 = vperm.xlu0 %4185, %v319_v33  }
  0x2f   :  { %481 = vperm.xlu1 %4186, %v476_v34  }
  0x31   :  { %3146 = vmatmul.mubr.msk.f32.gmra.mrb[14].mxu0 %vm139_vm2, %v64_v35 }
  0x32   :  { %3148 = vmatprep.mubr.msk.f32.mxu0 %vm4294_vm0, %v5874_v6  ;;  %486 = vperm.xlu0 %4185, %v477_v36  }
  0x33   :  { %491 = vperm.xlu1 %4186, %v478_v37  }
  0x35   :  { %3149 = vmatmul.mubr.msk.f32.gmra.mrb[16].mxu0 %vm139_vm2, %v65_v38 }
  0x36   :  { %3151 = vmatprep.mubr.msk.f32.mxu0 %vm4294_vm0, %v5874_v6 }
  0x39   :  { %3152 = vmatmul.mubr.msk.f32.gmra.mrb[18].mxu0 %vm139_vm2, %v66_v39 }
  0x3a   :  { %3154 = vmatprep.mubr.msk.f32.mxu0 %vm4294_vm0, %v5874_v6 }
  0x3d   :  { %3155 = vmatmul.mubr.msk.f32.gmra.mrb[20].mxu0 %vm139_vm2, %v67_v40  ;;  %v309_v40 = vld [vmem:[%s5855_s3 + $0x8] sm:$0xff]  ;;  %vm625_vm2 = vcmask 647680  }
  0x3e   :  { %1008 = vmatprep.mubr.f32.mxu0 %v5874_v6 }
  0x85   :  { %v87_v42 = vpop.permute.xlu0 %86  ;;  %v97_v50 = vpop.permute.xlu1 %96 }
  0x89   :  { %v92_v46 = vpop.permute.xlu0 %91  ;;  %v102_v57 = vpop.permute.xlu1 %101 }
  0x95   :  { %v107_v2 = vpop.permute.xlu0 %106 }
  0x96   :  { %v112_v5 = vpop.permute.xlu1 %111 }
  0x99   :  { %v117_v15 = vpop.permute.xlu0 %116 }
  0x9a   :  { %v122_v17 = vpop.permute.xlu1 %121 }
  0x9d   :  { %v127_v26 = vpop.permute.xlu0 %126 }
  0x9e   :  { %v132_v28 = vpop.permute.xlu1 %131 }
  0xa1   :  { %v137_v34 = vpop.permute.xlu0 %136 }
  0xe8   :  { %v243_v43 = vpop.f32.mrb[0].mxu0 }
  0xe9   :  { %v3126_v44 = vpop.f32.mrb[1].mxu0  ;;  %v244_v45 = vadd.f32 %v243_v43, %v87_v42  ;;  %v311_v42 = vld [vmem:[%s5855_s3 + $0x18] sm:$0xff]  ;;  %v312_v43 = vld [vmem:[%s5855_s3 + $0x20] sm:$0xff] }
  0xea   :  { %v313_v44 = vld [vmem:[%s5855_s3 + $0x28] sm:$0x3] }
  0xeb   :  { %v297_v51 = vmax.f32 %v244_v45, 0.0  ;;  %v328_v45 = vpop.permute.xlu0 %327 }
  0xec   :  { %v248_v47 = vpop.f32.mrb[2].mxu0 }
  0xed   :  { %v249_v48 = vadd.f32 %v248_v47, %v92_v46  ;;  %v3129_v49 = vpop.f32.mrb[3].mxu0  ;;  %v323_v46 = vpop.permute.xlu1 %322 }
  0xef   :  { %v298_v52 = vmax.f32 %v249_v48, 0.0 }
  0xf0   :  { %v253_v53 = vpop.f32.mrb[4].mxu0 }
  0xf1   :  { %v3132_v54 = vpop.f32.mrb[5].mxu0  ;;  %v3390_v55 = vpack.c.bf16 %v298_v52, %v297_v51  ;;  %v254_v56 = vadd.f32 %v253_v53, %v97_v50  ;;  %v338_v50 = vpop.permute.xlu0 %337 }
  0xf2   :  { %v333_v52 = vpop.permute.xlu1 %332 }
  0xf3   :  { %3391 = vmatprep.subr.bf16.mxu1 %v3390_v55  ;;  %v299_v61 = vmax.f32 %v254_v56, 0.0 }
  0xf4   :  { %v258_v58 = vpop.f32.mrb[6].mxu0  ;;  %3393 = vmatpush3.bf16.msra.mxu1 %v3390_v55 }
  0xf5   :  { %v259_v59 = vadd.f32 %v258_v58, %v102_v57  ;;  %v3135_v60 = vpop.f32.mrb[7].mxu0 }
  0xf7   :  { %v300_v62 = vmax.f32 %v259_v59, 0.0 }
  0xf8   :  { %v263_v63 = vpop.f32.mrb[8].mxu0 }
  0xf9   :  { %v3394_v0 = vpack.c.bf16 %v300_v62, %v299_v61  ;;  %v3138_v1 = vpop.f32.mrb[9].mxu0  ;;  %v264_v4 = vadd.f32 %v263_v63, %v107_v2  ;;  %v348_v61 = vpop.permute.xlu0 %347 }
  0xfb   :  { %3395 = vmatprep.subr.bf16.mxu1 %v3394_v0  ;;  %v301_v10 = vmax.f32 %v264_v4, 0.0 }
  0xfc   :  { %v268_v7 = vpop.f32.mrb[10].mxu0  ;;  %3397 = vmatpush3.bf16.msra.mxu1 %v3394_v0  ;;  %v343_v0 = vpop.permute.xlu1 %342 }
  0xfd   :  { %v269_v8 = vadd.f32 %v268_v7, %v112_v5  ;;  %v3141_v9 = vpop.f32.mrb[11].mxu0 }
  0xff   :  { %v302_v11 = vmax.f32 %v269_v8, 0.0 }
 0x100   :  { %v273_v12 = vpop.f32.mrb[12].mxu0 }
 0x101   :  { %v3398_v13 = vpack.c.bf16 %v302_v11, %v301_v10  ;;  %v3144_v14 = vpop.f32.mrb[13].mxu0  ;;  %v274_v16 = vadd.f32 %v273_v12, %v117_v15  ;;  %v473_v10 = vld [vmem:[%s5857_s5] sm:$0xff]  ;;  %v474_v11 = vld [vmem:[%s5857_s5 + $0x8] sm:$0xff]  ;;  %v475_v12 = vld [vmem:[%s5857_s5 + $0x10] sm:$0x1f]  ;;  %s4298_s5 = smov 124  }
 0x103   :  { %3399 = vmatprep.subr.bf16.mxu1 %v3398_v13  ;;  %v303_v21 = vmax.f32 %v274_v16, 0.0 }
 0x104   :  { %v278_v18 = vpop.f32.mrb[14].mxu0  ;;  %3401 = vmatpush3.bf16.msra.mxu1 %v3398_v13  ;;  %v482_v13 = vpop.permute.xlu1 %481 }
 0x105   :  { %v279_v19 = vadd.f32 %v278_v18, %v122_v17  ;;  %v3147_v20 = vpop.f32.mrb[15].mxu0  ;;  %v487_v18 = vpop.permute.xlu0 %486 }
 0x107   :  { %v304_v22 = vmax.f32 %v279_v19, 0.0 }
 0x108   :  { %v283_v23 = vpop.f32.mrb[16].mxu0 }
 0x109   :  { %v3402_v24 = vpack.c.bf16 %v304_v22, %v303_v21  ;;  %v3150_v25 = vpop.f32.mrb[17].mxu0  ;;  %v284_v27 = vadd.f32 %v283_v23, %v127_v26  ;;  %v492_v23 = vpop.permute.xlu1 %491 }
 0x10b   :  { %3403 = vmatprep.subr.bf16.mxu1 %v3402_v24  ;;  %v305_v32 = vmax.f32 %v284_v27, 0.0 }
 0x10c   :  { %v288_v29 = vpop.f32.mrb[18].mxu0  ;;  %3405 = vmatpush3.bf16.msra.mxu1 %v3402_v24 }
 0x10d   :  { %v289_v30 = vadd.f32 %v288_v29, %v132_v28  ;;  %v3153_v31 = vpop.f32.mrb[19].mxu0 }
 0x10f   :  { %v306_v33 = vmax.f32 %v289_v30, 0.0 }
 0x110   :  { %v293_v35 = vpop.f32.mrb[20].mxu0 }
 0x111   :  { %v3406_v36 = vpack.c.bf16 %v306_v33, %v305_v32  ;;  %v294_v37 = vadd.f32 %v293_v35, %v137_v34  ;;  %v3156_v38 = vpop.f32.mrb[21].mxu0 }
 0x113   :  { %v307_v39 = vmax.f32 %v294_v37, 0.0  ;;  %3407 = vmatprep.subr.bf16.mxu1 %v3406_v36 }
 0x114   :  { %3409 = vmatpush3.bf16.msra.mxu1 %v3406_v36 }
 0x115   :  { %3177 = vmatprep.subr.msk.mxu1 %vm173_vm1, %v307_v39 }
 0x118   :  { %3178 = vmatpush3.msk.msra.mxu1 %vm173_vm1, %v307_v39 }
 0x119   :  { %3180 = vmatmul.mubr.msk.f32.vlgmr.msra.gmra.mrb[0].mxu1 %vm350_vm3, %v309_v40  ;;  %3410 = vmatprep.subr.bf16.mxu1 %v5872_v3 }
 0x11a   :  { %3182 = vmatprep.mubr.msk.f32.mxu1 %vm350_vm3, %v310_v41 }
 0x11d   :  { %3183 = vmatmul.mubr.msk.f32.gmra.mrb[2].mxu1 %vm350_vm3, %v311_v42 }
 0x11e   :  { %3185 = vmatprep.mubr.msk.f32.mxu1 %vm350_vm3, %v312_v43 }
 0x121   :  { %3186 = vmatmul.mubr.msk.f32.gmra.mrb[4].mxu1 %vm350_vm3, %v313_v44 }
 0x122   :  { %3200 = vmatprep.mubr.msk.f32.mxu1 %vm4294_vm0, %v5874_v6 }
 0x1ec   :  { %v3181_v47 = vpop.f32.mrb[0].mxu1 }
 0x1ed   :  { %v444_v48 = vadd.f32 %v3181_v47, %v328_v45  ;;  %v438_v49 = vpop.f32.mrb[1].mxu1 }
 0x1ee   :  { %v439_v51 = vadd.f32 %v438_v49, %v323_v46 }
 0x1ef   :  { %v468_v53 = vmax.f32 %v444_v48, 0.0 }
 0x1f0   :  { %v467_v54 = vmax.f32 %v439_v51, 0.0  ;;  %v3184_v55 = vpop.f32.mrb[2].mxu1  ;;  %v902_v51 = vld [vmem:[%s5859_s7 + $0x8] sm:$0xff] }
 0x1f1   :  { %v454_v56 = vadd.f32 %v3184_v55, %v338_v50  ;;  %v448_v57 = vpop.f32.mrb[3].mxu1  ;;  %v903_v55 = vld [vmem:[%s5859_s7 + $0x10] sm:$0xff] }
 0x1f2   :  { %v3411_v58 = vpack.c.bf16 %v468_v53, %v467_v54  ;;  %v449_v59 = vadd.f32 %v448_v57, %v333_v52  ;;  %v904_v52 = vld [vmem:[%s5859_s7 + $0x18] sm:$0xff]  ;;  %v901_v53 = vld [vmem:[%s5859_s7] sm:$0xff] }
 0x1f3   :  { %v470_v60 = vmax.f32 %v454_v56, 0.0  ;;  %v3420_v54 = vpack.c.bf16 %v904_v52, %v902_v51  ;;  %v3422_v56 = vpack.c.bf16 %v903_v55, %v901_v53  ;;  %v1113_v53 = vld [vmem:[%s5862_s10 + $0x48] sm:$0xff] }
 0x1f4   :  { %v469_v62 = vmax.f32 %v449_v59, 0.0  ;;  %v3187_v63 = vpop.f32.mrb[4].mxu1  ;;  %3412 = vmatpush3.bf16.msra.mxu1 %v3411_v58 }
 0x1f5   :  { %v464_v1 = vadd.f32 %v3187_v63, %v348_v61  ;;  %v458_v2 = vpop.f32.mrb[5].mxu1  ;;  %3413 = vmatprep.subr.bf16.mxu1 %v5872_v3  ;;  %3421 = vmatprep.subr.bf16.mxu0 %v3420_v54  ;;  %v906_v61 = vld [vmem:[%s5859_s7 + $0x28] sm:$0xff]  ;;  %v905_v63 = vld [vmem:[%s5859_s7 + $0x20] sm:$0xff] }
 0x1f6   :  { %v3414_v4 = vpack.c.bf16 %v470_v60, %v469_v62  ;;  %v459_v5 = vadd.f32 %v458_v2, %v343_v0  ;;  %3423 = vmatpush1.bf16.msra.mxu0 %v3422_v56  ;;  %v908_v62 = vld [vmem:[%s5859_s7 + $0x38] sm:$0xff]  ;;  %v1117_v54 = vld [vmem:[%s5862_s10 + $0x68] sm:$0xff] }
 0x1f7   :  { %v472_v7 = vmax.f32 %v464_v1, 0.0  ;;  %v3424_v0 = vpack.c.bf16 %v908_v62, %v906_v61  ;;  %v907_v1 = vld [vmem:[%s5859_s7 + $0x30] sm:$0xff]  ;;  %v4713_v56 = vpack.c.bf16 %v1117_v54, %v1113_v53  ;;  %v1125_v61 = vld [vmem:[%s5862_s10 + $0xa8] sm:$0xff] }
 0x1f8   :  { %v471_v8 = vmax.f32 %v459_v5, 0.0  ;;  %3415 = vmatpush3.bf16.msra.mxu1 %v3414_v4  ;;  %v3426_v2 = vpack.c.bf16 %v907_v1, %v905_v63  ;;  %v1120_v63 = vld [vmem:[%s5862_s10 + $0x80] sm:$0xff]  ;;  %v1129_v1 = vld [vmem:[%s5862_s10 + $0xc8] sm:$0xff] }
 0x1f9   :  { %3416 = vmatprep.subr.bf16.mxu1 %v5872_v3  ;;  %3425 = vmatprep.subr.bf16.mxu0 %v3424_v0  ;;  %v1124_v0 = vld [vmem:[%s5862_s10 + $0xa0] sm:$0xff]  ;;  %v1037_v53 = vld [vmem:[%s5861_s9 + $0x88] sm:$0xff]  ;;  %v1066_v3 = vld [vmem:[%s5861_s9 + $0x170] sm:$0xff] }
 0x1fa   :  { %v3417_v9 = vpack.c.bf16 %v472_v7, %v471_v8  ;;  %3427 = vmatpush1.bf16.msra.mxu0 %v3426_v2  ;;  %v910_v7 = vld [vmem:[%s5859_s7 + $0x48] sm:$0xff]  ;;  %v912_v8 = vld [vmem:[%s5859_s7 + $0x58] sm:$0xff] }
 0x1fb   :  { %v1133_v2 = vld [vmem:[%s5862_s10 + $0xe8] sm:$0xff] }
 0x1fc   :  { %3419 = vmatpush3.bf16.msk.msra.mxu1 %vm3418_vm6, %v3417_v9  ;;  %v3428_v9 = vpack.c.bf16 %v912_v8, %v910_v7  ;;  %v1128_v7 = vld [vmem:[%s5862_s10 + $0xc0] sm:$0xff]  ;;  %v1041_v54 = vld [vmem:[%s5861_s9 + $0xa8] sm:$0xff]  ;;  %vm749_vm6 = vcmask 57344  }
 0x1fd   :  { %v1132_v8 = vld [vmem:[%s5862_s10 + $0xe0] sm:$0xff] }
 0x1fe   :  { %3429 = vmatprep.subr.bf16.mxu0 %v3428_v9  ;;  %v1137_v9 = vld [vmem:[%s5862_s10 + $0x108] sm:$0xff] }
 0x1ff   :  { %3201 = vmatmul.mubr.msk.f32.vlgmr.msra.gmra.mrb[6].mxu1 %vm494_vm7, %v473_v10 }
 0x200   :  { %3203 = vmatprep.mubr.msk.f32.mxu1 %vm4294_vm0, %v5874_v6 }
 0x203   :  { %3204 = vmatmul.mubr.msk.f32.gmra.mrb[8].mxu1 %vm494_vm7, %v474_v11 }
 0x204   :  { %3206 = vmatprep.mubr.msk.f32.mxu1 %vm4294_vm0, %v5874_v6 }
 0x207   :  { %3207 = vmatmul.mubr.msk.f32.gmra.mrb[10].mxu1 %vm494_vm7, %v475_v12  ;;  %v909_v12 = vld [vmem:[%s5859_s7 + $0x40] sm:$0xff]  ;;  %vm827_vm7 = vcmask 24576  }
 0x208   :  { %1235 = vmatprep.mubr.f32.mxu1 %v5874_v6 }
 0x2d2   :  { %v574_v14 = vpop.f32.mrb[6].mxu1 }
 0x2d3   :  { %v575_v15 = vadd.f32 %v574_v14, %v482_v13  ;;  %v3202_v16 = vpop.f32.mrb[7].mxu1  ;;  %v911_v13 = vld [vmem:[%s5859_s7 + $0x50] sm:$0xff] }
 0x2d4   :  { %v3430_v14 = vpack.c.bf16 %v911_v13, %v909_v12  ;;  %v1136_v13 = vld [vmem:[%s5862_s10 + $0x100] sm:$0xff] }
 0x2d5   :  { %v588_v17 = vmax.f32 %v575_v15, 0.0 }
 0x2d6   :  { %v579_v19 = vpop.f32.mrb[8].mxu1  ;;  %3431 = vmatpush1.bf16.msra.mxu0 %v3430_v14  ;;  %v1140_v14 = vld [vmem:[%s5862_s10 + $0x120] sm:$0xff] }
 0x2d7   :  { %592 = vst.msk [vmem:[#allocation2] sm:$0xff] %vm591_vm8, %v588_v17  ;;  %v580_v20 = vadd.f32 %v579_v19, %v487_v18  ;;  %v3205_v21 = vpop.f32.mrb[9].mxu1  ;;  %v914_v17 = vld [vmem:[%s5859_s7 + $0x68] sm:$0xff]  ;;  %v916_v18 = vld [vmem:[%s5859_s7 + $0x78] sm:$0xff]  ;;  %v913_v19 = vld [vmem:[%s5859_s7 + $0x60] sm:$0xff] }
 0x2d8   :  { %v915_v21 = vld [vmem:[%s5859_s7 + $0x70] sm:$0xff] }
 0x2d9   :  { %v589_v22 = vmax.f32 %v580_v20, 0.0  ;;  %v3432_v20 = vpack.c.bf16 %v916_v18, %v914_v17  ;;  %v4782_v17 = vpack.c.bf16 %v1140_v14, %v1136_v13  ;;  %v1048_v13 = vld [vmem:[%s5861_s9 + $0xe0] sm:$0xff]  ;;  %v1053_v14 = vld [vmem:[%s5861_s9 + $0x108] sm:$0xff] }
 0x2da   :  { %v584_v24 = vpop.f32.mrb[10].mxu1 }
 0x2db   :  { %593 = vst.msk [vmem:[#allocation2 + $0x8] sm:$0xff] %vm591_vm8, %v589_v22  ;;  %v585_v25 = vadd.f32 %v584_v24, %v492_v23  ;;  %v3208_v26 = vpop.f32.mrb[11].mxu1  ;;  %v3434_v22 = vpack.c.bf16 %v915_v21, %v913_v19  ;;  %3433 = vmatprep.subr.bf16.mxu0 %v3432_v20  ;;  %5970 = vst [vmem:[#allocation12_spill] sm:$0xff] %v4782_v17  ;;  %v1144_v19 = vld [vmem:[%s5862_s10 + $0x140] sm:$0xff]  ;;  %v1153_v21 = vld [vmem:[%s5862_s10 + $0x188] sm:$0xff]  ;;  %vm756_vm8 = vcmask 188480  }
 0x2dc   :  { %v1148_v20 = vld [vmem:[%s5862_s10 + $0x160] sm:$0xff] }
 0x2dd   :  { %v590_v27 = vmax.f32 %v585_v25, 0.0  ;;  %3435 = vmatpush1.bf16.msra.mxu0 %v3434_v22  ;;  %v1157_v22 = vld [vmem:[%s5862_s10 + $0x1a8] sm:$0xff] }
 0x2de   :  { %v666_v28 = vld [vmem:[#allocation2 + $0x5] sm:$0x1]  ;;  %v634_v29 = vld [vmem:[#allocation2] sm:$0x1]  ;;  %v599_v31 = vld [vmem:[#allocation2 + $0x1] sm:$0x1] }
 0x2df   :  { %595 = vst.msk [vmem:[#allocation2 + $0x10] sm:$0x1f] %vm594_vm9, %v590_v27  ;;  %668 = vrot.lane.b32.xlu1 %v666_v28, %s4298_s5  ;;  %636 = vrot.lane.b32.xlu0 %v634_v29, %s4299_s21  ;;  %v708_v30 = vld [vmem:[#allocation2 + $0x5] sm:$0x1]  ;;  %v673_v32 = vld [vmem:[#allocation2 + $0x6] sm:$0x1] }
 0x2e0   :  { %v714_v33 = vld [vmem:[#allocation2 + $0x6] sm:$0x1]  ;;  %v606_v34 = vld [vmem:[#allocation2 + $0x2] sm:$0x1]  ;;  %v596_v36 = vld [vmem:[#allocation2] sm:$0x1] }
 0x2e1   :  { %v642_v35 = vld [vmem:[#allocation2 + $0x2] sm:$0x1]  ;;  %v680_v37 = vld [vmem:[#allocation2 + $0x7] sm:$0x1]  ;;  %598 = vst.msk [vmem:[#allocation3] sm:$0x1] %vm597_vm10, %v596_v36 }
 0x2e2   :  { %v720_v38 = vld [vmem:[#allocation2 + $0x7] sm:$0x1]  ;;  %v613_v39 = vld [vmem:[#allocation2 + $0x3] sm:$0x1]  ;;  %v620_v41 = vld [vmem:[#allocation2 + $0x4] sm:$0x1] }
 0x2e3   :  { %710 = vrot.lane.b32.xlu0 %v708_v30, %s4300_s22  ;;  %601 = vrot.lane.b32.xlu1 %v599_v31, %s4301_s23  ;;  %v648_v40 = vld [vmem:[#allocation2 + $0x3] sm:$0x1]  ;;  %v654_v42 = vld [vmem:[#allocation2 + $0x4] sm:$0x1]  ;;  %v627_v43 = vld [vmem:[#allocation2 + $0x5] sm:$0x1] }
 0x2e4   :  { %v660_v44 = vld [vmem:[#allocation2 + $0x5] sm:$0x1]  ;;  %v786_v45 = vld [vmem:[#allocation2 + $0xa] sm:$0x1]  ;;  %v864_v47 = vld [vmem:[#allocation2 + $0xf] sm:$0x1] }
 0x2e5   :  { %v744_v46 = vld [vmem:[#allocation2 + $0xa] sm:$0x1]  ;;  %v822_v48 = vld [vmem:[#allocation2 + $0xf] sm:$0x1]  ;;  %v751_v49 = vld [vmem:[#allocation2 + $0xb] sm:$0x1] }
 0x2e6   :  { %v792_v50 = vld [vmem:[#allocation2 + $0xb] sm:$0x1]  ;;  %v758_v57 = vld [vmem:[#allocation2 + $0xc] sm:$0x1]  ;;  %v726_v59 = vld [vmem:[#allocation2 + $0x8] sm:$0x1] }
 0x2e7   :  { %675 = vrot.lane.b32.xlu0 %v673_v32, %s4302_s30  ;;  %716 = vrot.lane.b32.xlu1 %v714_v33, %s4298_s5  ;;  %s4312_s5 = smov 8   ;;  %v798_v58 = vld [vmem:[#allocation2 + $0xc] sm:$0x1]  ;;  %v687_v60 = vld [vmem:[#allocation2 + $0x8] sm:$0x1]  ;;  %v920_v28 = vld [vmem:[%s5859_s7 + $0x98] sm:$0xff] }
 0x2e8   :  { %v804_v4 = vld [vmem:[#allocation2 + $0xd] sm:$0x1]  ;;  %v732_v10 = vld [vmem:[#allocation2 + $0x9] sm:$0x1]  ;;  %v810_v15 = vld [vmem:[#allocation2 + $0xe] sm:$0x1] }
 0x2e9   :  { %v765_v5 = vld [vmem:[#allocation2 + $0xd] sm:$0x1]  ;;  %v694_v11 = vld [vmem:[#allocation2 + $0x9] sm:$0x1]  ;;  %v772_v16 = vld [vmem:[#allocation2 + $0xe] sm:$0x1] }
 0x2ea   :  { %v738_v23 = vld [vmem:[#allocation2 + $0xa] sm:$0x1]  ;;  %v816_v25 = vld [vmem:[#allocation2 + $0xf] sm:$0x1]  ;;  %v917_v29 = vld [vmem:[%s5859_s7 + $0x80] sm:$0xff]  ;;  %s4319_s21 = smov 72  }
 0x2eb   :  { %608 = vrot.lane.b32.xlu0 %v606_v34, %s4303_s24  ;;  %644 = vrot.lane.b32.xlu1 %v642_v35, %s4301_s23  ;;  %s4313_s23 = smov 24   ;;  %v701_v24 = vld [vmem:[#allocation2 + $0xa] sm:$0x1]  ;;  %v779_v26 = vld [vmem:[#allocation2 + $0xf] sm:$0x1]  ;;  %v919_v31 = vld [vmem:[%s5859_s7 + $0x90] sm:$0xff] }
 0x2ec   :  { %v918_v27 = vld [vmem:[%s5859_s7 + $0x88] sm:$0xff]  ;;  %v3438_v32 = vpack.c.bf16 %v919_v31, %v917_v29  ;;  %v870_v33 = vld [vmem:[#allocation2 + $0x10] sm:$0x1]  ;;  %v876_v35 = vld [vmem:[#allocation2 + $0x11] sm:$0x1]  ;;  %vm763_vm9 = vcmask 319680  }
 0x2ed   :  { %v3436_v30 = vpack.c.bf16 %v920_v28, %v918_v27  ;;  %v829_v34 = vld [vmem:[#allocation2 + $0x10] sm:$0x1]  ;;  %v836_v36 = vld [vmem:[#allocation2 + $0x11] sm:$0x1]  ;;  %v894_v51 = vld [vmem:[#allocation2 + $0x14] sm:$0x1] }
 0x2ee   :  { %v857_v55 = vld [vmem:[#allocation2 + $0x14] sm:$0x1]  ;;  %v1161_v27 = vld [vmem:[%s5862_s10 + $0x1c8] sm:$0xff]  ;;  %v1160_v31 = vld [vmem:[%s5862_s10 + $0x1c0] sm:$0xff]  ;;  %s4325_s22 = smov [#allocation5]  }
 0x2ef   :  { %682 = vrot.lane.b32.xlu0 %v680_v37, %s4304_s25  ;;  %722 = vrot.lane.b32.xlu1 %v720_v38, %s4302_s30  ;;  %s4316_s30 = smov 60   ;;  %v922_v37 = vld [vmem:[%s5859_s7 + $0xa8] sm:$0xf]  ;;  %v921_v38 = vld [vmem:[%s5859_s7 + $0xa0] sm:$0xf] }
 0x2f0   :  { %3437 = vmatprep.subr.bf16.mxu0 %v3436_v30  ;;  %v1165_v28 = vld [vmem:[%s5862_s10 + $0x1e8] sm:$0xff] }
 0x2f1   :  { %3439 = vmatpush1.bf16.msra.mxu0 %v3438_v32  ;;  %v4821_v30 = vpack.c.bf16 %v1165_v28, %v1161_v27  ;;  %v1164_v32 = vld [vmem:[%s5862_s10 + $0x1e0] sm:$0xff]  ;;  %v1065_v27 = vld [vmem:[%s5861_s9 + $0x168] sm:$0xff] }
 0x2f2   :  { %2961 = vmatprep.subr.msk.mxu0 %vm173_vm1, %v922_v37 }
 0x2f3   :  { %615 = vrot.lane.b32.xlu0 %v613_v39, %s4305_s27  ;;  %650 = vrot.lane.b32.xlu1 %v648_v40, %s4303_s24  ;;  %v882_v39 = vld [vmem:[#allocation2 + $0x12] sm:$0x1]  ;;  %5975 = vst [vmem:[#allocation17_spill] sm:$0xff] %v4821_v30 }
 0x2f4   :  { %v843_v40 = vld [vmem:[#allocation2 + $0x12] sm:$0x1] }
 0x2f5   :  { %2962 = vmatpush1.msk.msra.mxu0 %vm173_vm1, %v921_v38  ;;  %vm618_vm1 = vcmask 516480  }
 0x2f7   :  { %622 = vrot.lane.b32.xlu0 %v620_v41, %s4306_s28  ;;  %656 = vrot.lane.b32.xlu1 %v654_v42, %s4305_s27  ;;  %v888_v41 = vld [vmem:[#allocation2 + $0x13] sm:$0x1] }
 0x2f8   :  { %v850_v42 = vld [vmem:[#allocation2 + $0x13] sm:$0x1] }
 0x2fb   :  { %629 = vrot.lane.b32.xlu0 %v627_v43, %s4307_s2  ;;  %662 = vrot.lane.b32.xlu1 %v660_v44, %s4306_s28  ;;  %v1105_v43 = vld [vmem:[%s5862_s10 + $0x8] sm:$0xff] }
 0x2fc   :  { %v1109_v44 = vld [vmem:[%s5862_s10 + $0x28] sm:$0xff] }
 0x2ff   :  { %788 = vrot.lane.b32.xlu0 %v786_v45, %s4308_s29  ;;  %746 = vrot.lane.b32.xlu1 %v744_v46, %s4309_s0  ;;  %s4321_s29 = smov 20   ;;  %v1107_v45 = vld [vmem:[%s5862_s10 + $0x18] sm:$0xff]  ;;  %v4690_v46 = vpack.c.bf16 %v1109_v44, %v1105_v43  ;;  %v1033_v43 = vld [vmem:[%s5861_s9 + $0x68] sm:$0xff] }
 0x301   :  { %5966 = vst [vmem:[#allocation8_spill] sm:$0xff] %v4690_v46  ;;  %3441 = vmatprep.subr.bf16.mxu1 %v4690_v46 }
 0x303   :  { %866 = vrot.lane.b32.xlu0 %v864_v47, %s4310_s4  ;;  %824 = vrot.lane.b32.xlu1 %v822_v48, %s4311_s18  ;;  %v1111_v47 = vld [vmem:[%s5862_s10 + $0x38] sm:$0xff]  ;;  %v1104_v48 = vld [vmem:[%s5862_s10] sm:$0xff] }
 0x307   :  { %753 = vrot.lane.b32.xlu0 %v751_v49, %s4312_s5  ;;  %794 = vrot.lane.b32.xlu1 %v792_v50, %s4309_s0  ;;  %s4314_s0 = smov 44   ;;  %v4698_v49 = vpack.c.bf16 %v1111_v47, %v1107_v45  ;;  %v1108_v50 = vld [vmem:[%s5862_s10 + $0x20] sm:$0xff] }
 0x308   :  { %v4704_v52 = vpack.c.bf16 %v1108_v50, %v1104_v48  ;;  %v1028_v50 = vld [vmem:[%s5861_s9 + $0x40] sm:$0xff] }
 0x309   :  { %5967 = vst [vmem:[#allocation9_spill] sm:$0xff] %v4698_v49  ;;  %3473 = vmatprep.subr.bf16.mxu0 %v4698_v49 }
 0x30a   :  { %3443 = vmatpush1.bf16.msra.mxu1 %v4704_v52 }
 0x30b   :  { %760 = vrot.lane.b32.xlu0 %v758_v57, %s4313_s23  ;;  %800 = vrot.lane.b32.xlu1 %v798_v58, %s4312_s5  ;;  %v1112_v57 = vld [vmem:[%s5862_s10 + $0x40] sm:$0xff] }
 0x30c   :  { %v1116_v58 = vld [vmem:[%s5862_s10 + $0x60] sm:$0xff]  ;;  %3445 = vmatprep.subr.bf16.mxu1 %v4713_v56 }
 0x30f   :  { %728 = vrot.lane.b32.xlu1 %v726_v59, %s4304_s25  ;;  %689 = vrot.lane.b32.xlu0 %v687_v60, %s4314_s0  ;;  %s4315_s25 = smov 40   ;;  %v4722_v59 = vpack.c.bf16 %v1116_v58, %v1112_v57  ;;  %v1121_v60 = vld [vmem:[%s5862_s10 + $0x88] sm:$0xff] }
 0x310   :  { %v4731_v62 = vpack.c.bf16 %v1125_v61, %v1121_v60  ;;  %v4881_v60 = vpack.c.bf16 %v1041_v54, %v1037_v53  ;;  %v1036_v61 = vld [vmem:[%s5861_s9 + $0x80] sm:$0xff] }
 0x311   :  { %3447 = vmatpush1.bf16.msra.mxu1 %v4722_v59 }
 0x312   :  { %3449 = vmatprep.subr.bf16.mxu1 %v4731_v62 }
 0x313   :  { %806 = vrot.lane.b32.xlu1 %v804_v4, %s4313_s23  ;;  %767 = vrot.lane.b32.xlu0 %v765_v5, %s4315_s25  ;;  %s4320_s23 = smov 4   ;;  %v4746_v4 = vpack.c.bf16 %v1124_v0, %v1120_v63  ;;  %v4749_v5 = vpack.c.bf16 %v1133_v2, %v1129_v1  ;;  %v1040_v63 = vld [vmem:[%s5861_s9 + $0xa0] sm:$0xff]  ;;  %v1045_v0 = vld [vmem:[%s5861_s9 + $0xc8] sm:$0xff] }
 0x314   :  { %v1049_v1 = vld [vmem:[%s5861_s9 + $0xe8] sm:$0xff]  ;;  %v4896_v2 = vpack.c.bf16 %v1040_v63, %v1036_v61 }
 0x315   :  { %3451 = vmatpush1.bf16.msra.mxu1 %v4746_v4 }
 0x316   :  { %3453 = vmatprep.subr.bf16.mxu1 %v4749_v5 }
 0x317   :  { %734 = vrot.lane.b32.xlu1 %v732_v10, %s4314_s0  ;;  %696 = vrot.lane.b32.xlu0 %v694_v11, %s4316_s30  ;;  %s4317_s0 = smov 56   ;;  %v1141_v10 = vld [vmem:[%s5862_s10 + $0x128] sm:$0xff]  ;;  %v4764_v11 = vpack.c.bf16 %v1132_v8, %v1128_v7 }
 0x318   :  { %v4767_v12 = vpack.c.bf16 %v1141_v10, %v1137_v9  ;;  %v4899_v9 = vpack.c.bf16 %v1049_v1, %v1045_v0  ;;  %v1044_v10 = vld [vmem:[%s5861_s9 + $0xc0] sm:$0xff] }
 0x319   :  { %5968 = vst [vmem:[#allocation10_spill] sm:$0xff] %v4764_v11  ;;  %3455 = vmatpush1.bf16.msra.mxu1 %v4764_v11 }
 0x31a   :  { %5969 = vst [vmem:[#allocation11_spill] sm:$0xff] %v4767_v12  ;;  %3457 = vmatprep.subr.bf16.mxu1 %v4767_v12 }
 0x31b   :  { %812 = vrot.lane.b32.xlu1 %v810_v15, %s4315_s25  ;;  %774 = vrot.lane.b32.xlu0 %v772_v16, %s4317_s0  ;;  %v1145_v15 = vld [vmem:[%s5862_s10 + $0x148] sm:$0xff] }
 0x31c   :  { %v1149_v16 = vld [vmem:[%s5862_s10 + $0x168] sm:$0xff] }
 0x31d   :  { %v4785_v18 = vpack.c.bf16 %v1149_v16, %v1145_v15  ;;  %3459 = vmatpush1.bf16.msra.mxu1 %v4782_v17  ;;  %v1057_v15 = vld [vmem:[%s5861_s9 + $0x128] sm:$0xff]  ;;  %v4914_v16 = vpack.c.bf16 %v1048_v13, %v1044_v10 }
 0x31f   :  { %740 = vrot.lane.b32.xlu1 %v738_v23, %s4316_s30  ;;  %703 = vrot.lane.b32.xlu0 %v701_v24, %s4318_s19  ;;  %5971 = vst [vmem:[#allocation13_spill] sm:$0xff] %v4785_v18  ;;  %v4800_v23 = vpack.c.bf16 %v1148_v20, %v1144_v19  ;;  %v4803_v24 = vpack.c.bf16 %v1157_v22, %v1153_v21  ;;  %v1052_v22 = vld [vmem:[%s5861_s9 + $0x100] sm:$0xff]  ;;  %s2930_s30 = sshll.u32 %s4325_s22, 4  ;;  %s2931_s30 = int_to_ptr.vmem [resolvable:$true] %s2930_s30 }
 0x320   :  { %3461 = vmatprep.subr.bf16.mxu1 %v4785_v18  ;;  %v4917_v21 = vpack.c.bf16 %v1057_v15, %v1053_v14  ;;  %p4274_p1 = scmp.lt.s32.totalorder %s2931_s30, %s2931_s30 }
 0x321   :  { %5972 = vst [vmem:[#allocation14_spill] sm:$0xff] %v4800_v23  ;;  %5973 = vst [vmem:[#allocation15_spill] sm:$0xff] %v4803_v24  ;;  %3463 = vmatpush1.bf16.msra.mxu1 %v4800_v23 }
 0x322   :  { %3465 = vmatprep.subr.bf16.mxu1 %v4803_v24 }
 0x323   :  { %818 = vrot.lane.b32.xlu1 %v816_v25, %s4317_s0  ;;  %781 = vrot.lane.b32.xlu0 %v779_v26, %s4319_s21  ;;  %s4324_s0 = smov 68   ;;  %v1152_v25 = vld [vmem:[%s5862_s10 + $0x180] sm:$0xff] }
 0x324   :  { %v1156_v26 = vld [vmem:[%s5862_s10 + $0x1a0] sm:$0xff] }
 0x325   :  { %v4818_v29 = vpack.c.bf16 %v1156_v26, %v1152_v25  ;;  %v1056_v25 = vld [vmem:[%s5861_s9 + $0x120] sm:$0xff]  ;;  %v1061_v26 = vld [vmem:[%s5861_s9 + $0x148] sm:$0xff] }
 0x326   :  { %v4932_v28 = vpack.c.bf16 %v1056_v25, %v1052_v22 }
 0x327   :  { %872 = vrot.lane.b32.xlu1 %v870_v33, %s4311_s18  ;;  %831 = vrot.lane.b32.xlu0 %v829_v34, %s4320_s23  ;;  %s4322_s18 = smov 36   ;;  %5974 = vst [vmem:[#allocation16_spill] sm:$0xff] %v4818_v29  ;;  %v1021_v33 = vld [vmem:[%s5861_s9 + $0x8] sm:$0xff] }
 0x328   :  { %v1025_v34 = vld [vmem:[%s5861_s9 + $0x28] sm:$0xff]  ;;  %3467 = vmatpush1.bf16.msra.mxu1 %v4818_v29 }
 0x329   :  { %3469 = vmatprep.subr.bf16.mxu1 %v4821_v30  ;;  %v4839_v38 = vpack.c.bf16 %v1025_v34, %v1021_v33  ;;  %v4935_v33 = vpack.c.bf16 %v1065_v27, %v1061_v26  ;;  %v1060_v34 = vld [vmem:[%s5861_s9 + $0x140] sm:$0xff] }
 0x32b   :  { %878 = vrot.lane.b32.xlu1 %v876_v35, %s4320_s23  ;;  %838 = vrot.lane.b32.xlu0 %v836_v36, %s4321_s29  ;;  %v4836_v35 = vpack.c.bf16 %v1164_v32, %v1160_v31  ;;  %5977 = vst [vmem:[#allocation19_spill] sm:$0xff] %v4839_v38  ;;  %5978 = vst [vmem:[#allocation20_spill] sm:$0xff] %v4935_v33  ;;  %s4269_s23 = scalar_lea.vmem %s2931_s30, 32 }
 0x32c   :  { %p4270_p0 = scmp.ne.s32.totalorder %s2931_s30, %s4269_s23  ;;  %p4275_p2 = scmp.lt.s32.totalorder %s4269_s23, %s4269_s23 }
 0x32d   :  { %5976 = vst [vmem:[#allocation18_spill] sm:$0xff] %v4836_v35  ;;  %3471 = vmatpush1.bf16.msra.mxu1 %v4836_v35 }
 0x32e   :  { %3505 = vmatprep.subr.bf16.mxu1 %v4839_v38  ;;  %p4276_p3 = por %p4275_p2, %p4274_p1 }
 0x32f   :  { %884 = vrot.lane.b32.xlu1 %v882_v39, %s4321_s29  ;;  %845 = vrot.lane.b32.xlu0 %v843_v40, %s4322_s18  ;;  %v640_v39 = vld [vmem:[#allocation2 + $0x1] sm:$0x1] }
 0x330   :  { %v1020_v40 = vld [vmem:[%s5861_s9] sm:$0xff]  ;;  %1236 = vmatmul.mubr.f32.vlgmr.msra.gmra.mrb[12].mxu1 %v5874_v6  ;;  %p4277_p4 = pnand %p4276_p3, %p4270_p0 }
 0x333   :  { %890 = vrot.lane.b32.xlu1 %v888_v41, %s4322_s18  ;;  %852 = vrot.lane.b32.xlu0 %v850_v42, %s4323_s20  ;;  %v1024_v41 = vld [vmem:[%s5861_s9 + $0x20] sm:$0xff]  ;;  %v1029_v42 = vld [vmem:[%s5861_s9 + $0x48] sm:$0xff] }
 0x334   :  { %v4857_v44 = vpack.c.bf16 %v1024_v41, %v1020_v40  ;;  %v4860_v48 = vpack.c.bf16 %v1033_v43, %v1029_v42 }
 0x336   :  { %3507 = vmatpush1.bf16.msra.mxu1 %v4857_v44 }
 0x337   :  { %896 = vrot.lane.b32.xlu1 %v894_v51, %s4323_s20  ;;  %859 = vrot.lane.b32.xlu0 %v857_v55, %s4324_s0  ;;  %v1032_v51 = vld [vmem:[%s5861_s9 + $0x60] sm:$0xff] }
 0x338   :  { %v4878_v55 = vpack.c.bf16 %v1032_v51, %v1028_v50  ;;  %3509 = vmatprep.subr.bf16.mxu1 %v4860_v48 }
 0x33a   :  { %3511 = vmatpush1.bf16.msra.mxu1 %v4878_v55 }
 0x33b   :  { %3513 = vmatprep.subr.bf16.mxu1 %v4881_v60 }
 0x33e   :  { %3515 = vmatpush1.bf16.msra.mxu1 %v4896_v2 }
 0x33f   :  { %3517 = vmatprep.subr.bf16.mxu1 %v4899_v9 }
 0x342   :  { %3519 = vmatpush1.bf16.msra.mxu1 %v4914_v16 }
 0x343   :  { %3521 = vmatprep.subr.bf16.mxu1 %v4917_v21 }
 0x346   :  { %3523 = vmatpush1.bf16.msra.mxu1 %v4932_v28 }
 0x347   :  { %3525 = vmatprep.subr.bf16.mxu1 %v4935_v33  ;;  %v1086_v33 = vld [vmem:[%s5861_s9 + $0x210] sm:$0xff] }
 0x351   :  { %v669_v36 = vpop.permute.xlu1 %668  ;;  %v637_v37 = vpop.permute.xlu0 %636 }
 0x352   :  { %672 = vst.msk [vmem:[#allocation3 + $0x2] sm:$0x1] %vm671_vm11, %v669_v36  ;;  %v1064_v36 = vld [vmem:[%s5861_s9 + $0x160] sm:$0xff] }
 0x353   :  { %639 = vst.msk [vmem:[#allocation3 + $0x1] sm:$0x1] %vm597_vm10, %v637_v37  ;;  %v1069_v37 = vld [vmem:[%s5861_s9 + $0x188] sm:$0xff]  ;;  %v4950_v40 = vpack.c.bf16 %v1064_v36, %v1060_v34  ;;  %vm692_vm10 = vcmask 483680  }
 0x354   :  { %641 = vst.msk [vmem:[#allocation3 + $0x1] sm:$0x1] %vm604_vm12, %v640_v39  ;;  %v1073_v39 = vld [vmem:[%s5861_s9 + $0x1a8] sm:$0xff] }
 0x355   :  { %v711_v45 = vpop.permute.xlu0 %710  ;;  %v602_v47 = vpop.permute.xlu1 %601  ;;  %5979 = vst [vmem:[#allocation21_spill] sm:$0xff] %v4950_v40  ;;  %v4953_v43 = vpack.c.bf16 %v1073_v39, %v1069_v37  ;;  %3527 = vmatpush1.bf16.msra.mxu1 %v4950_v40  ;;  %v1085_v40 = vld [vmem:[%s5861_s9 + $0x208] sm:$0xff] }
 0x356   :  { %713 = vst.msk [vmem:[#allocation3 + $0x3] sm:$0x1] %vm671_vm11, %v711_v45  ;;  %v1068_v45 = vld [vmem:[%s5861_s9 + $0x180] sm:$0xff]  ;;  %vm770_vm11 = vcmask 450880  }
 0x357   :  { %605 = vst.msk [vmem:[#allocation3] sm:$0x1] %vm604_vm12, %v602_v47  ;;  %5980 = vst [vmem:[#allocation22_spill] sm:$0xff] %v4953_v43  ;;  %v1072_v47 = vld [vmem:[%s5861_s9 + $0x1a0] sm:$0xff]  ;;  %3529 = vmatprep.subr.bf16.mxu1 %v4953_v43  ;;  %vm699_vm12 = vcmask 614880  }
 0x358   :  { %v4962_v50 = vpack.c.bf16 %v1072_v47, %v1068_v45 }
 0x359   :  { %v676_v57 = vpop.permute.xlu0 %675  ;;  %v717_v58 = vpop.permute.xlu1 %716 }
 0x35a   :  { %679 = vst.msk [vmem:[#allocation3 + $0x2] sm:$0x1] %vm678_vm13, %v676_v57  ;;  %719 = vst.msk [vmem:[#allocation3 + $0x3] sm:$0x1] %vm678_vm13, %v717_v58  ;;  %3531 = vmatpush1.bf16.msra.mxu1 %v4962_v50  ;;  %vm777_vm13 = vcmask 582080  }
 0x35b   :  { %5981 = vst [vmem:[#allocation23_spill] sm:$0xff] %v4962_v50  ;;  %v1074_v50 = vld [vmem:[%s5861_s9 + $0x1b0] sm:$0xff] }
 0x35d   :  { %v609_v7 = vpop.permute.xlu0 %608  ;;  %v645_v8 = vpop.permute.xlu1 %644 }
 0x35e   :  { %612 = vst.msk [vmem:[#allocation3] sm:$0x1] %vm611_vm14, %v609_v7  ;;  %647 = vst.msk [vmem:[#allocation3 + $0x1] sm:$0x1] %vm611_vm14, %v645_v8  ;;  %vm706_vm14 = vcmask 680544  }
 0x361   :  { %v683_v19 = vpop.permute.xlu0 %682  ;;  %v723_v20 = vpop.permute.xlu1 %722 }
 0x362   :  { %686 = vst.msk [vmem:[#allocation3 + $0x2] sm:$0x1] %vm685_vm15, %v683_v19  ;;  %725 = vst.msk [vmem:[#allocation3 + $0x3] sm:$0x1] %vm685_vm15, %v723_v20  ;;  %vm784_vm15 = vcmask 680512  }
 0x365   :  { %v616_v31 = vpop.permute.xlu0 %615  ;;  %v651_v32 = vpop.permute.xlu1 %650 }
 0x366   :  { %619 = vst.msk [vmem:[#allocation3] sm:$0x1] %vm618_vm1, %v616_v31  ;;  %653 = vst.msk [vmem:[#allocation3 + $0x1] sm:$0x1] %vm618_vm1, %v651_v32  ;;  %vm834_vm1 = vcmask 155680  }
 0x369   :  { %v623_v41 = vpop.permute.xlu0 %622  ;;  %v657_v42 = vpop.permute.xlu1 %656 }
 0x36a   :  { %626 = vst.msk [vmem:[#allocation3] sm:$0x1] %vm625_vm2, %v623_v41  ;;  %659 = vst.msk [vmem:[#allocation3 + $0x1] sm:$0x1] %vm625_vm2, %v657_v42  ;;  %vm841_vm2 = vcmask 286880  }
 0x36d   :  { %v630_v51 = vpop.permute.xlu0 %629  ;;  %v663_v53 = vpop.permute.xlu1 %662 }
 0x36e   :  { %633 = vst.msk [vmem:[#allocation3] sm:$0x1] %vm632_vm5, %v630_v51  ;;  %665 = vst.msk [vmem:[#allocation3 + $0x1] sm:$0x1] %vm632_vm5, %v663_v53  ;;  %vm848_vm5 = vcmask 418080   ;;  %v1106_v53 = vld [vmem:[%s5862_s10 + $0x10] sm:$0xff] }
 0x371   :  { %v789_v54 = vpop.permute.xlu0 %788  ;;  %v747_v57 = vpop.permute.xlu1 %746 }
 0x372   :  { %791 = vst.msk [vmem:[#allocation3 + $0x5] sm:$0x1] %vm749_vm6, %v789_v54  ;;  %750 = vst.msk [vmem:[#allocation3 + $0x4] sm:$0x1] %vm749_vm6, %v747_v57  ;;  %vm855_vm6 = vcmask 549280   ;;  %v1110_v54 = vld [vmem:[%s5862_s10 + $0x30] sm:$0xff] }
 0x373   :  { %v1115_v57 = vld [vmem:[%s5862_s10 + $0x58] sm:$0xff] }
 0x375   :  { %v867_v58 = vpop.permute.xlu0 %866  ;;  %v825_v61 = vpop.permute.xlu1 %824 }
 0x376   :  { %869 = vst.msk [vmem:[#allocation3 + $0x7] sm:$0x1] %vm827_vm7, %v867_v58  ;;  %828 = vst.msk [vmem:[#allocation3 + $0x6] sm:$0x1] %vm827_vm7, %v825_v61  ;;  %vm862_vm7 = vcmask 680480   ;;  %v1119_v58 = vld [vmem:[%s5862_s10 + $0x78] sm:$0xff]  ;;  %v4978_v61 = vpack.c.bf16 %v1110_v54, %v1106_v53 }
 0x377   :  { %v1146_v53 = vld [vmem:[%s5862_s10 + $0x150] sm:$0xff] }
 0x378   :  { %v1150_v54 = vld [vmem:[%s5862_s10 + $0x170] sm:$0xff] }
 0x379   :  { %v754_v63 = vpop.permute.xlu0 %753  ;;  %v795_v0 = vpop.permute.xlu1 %794 }
 0x37a   :  { %757 = vst.msk [vmem:[#allocation3 + $0x4] sm:$0x1] %vm756_vm8, %v754_v63  ;;  %797 = vst.msk [vmem:[#allocation3 + $0x5] sm:$0x1] %vm756_vm8, %v795_v0  ;;  %v4980_v63 = vpack.c.bf16 %v1119_v58, %v1115_v57  ;;  %v1114_v0 = vld [vmem:[%s5862_s10 + $0x50] sm:$0xff]  ;;  %v1155_v57 = vld [vmem:[%s5862_s10 + $0x198] sm:$0xff] }
 0x37b   :  { %v1159_v58 = vld [vmem:[%s5862_s10 + $0x1b8] sm:$0xff] }
 0x37d   :  { %v761_v1 = vpop.permute.xlu0 %760  ;;  %v801_v7 = vpop.permute.xlu1 %800 }
 0x37e   :  { %764 = vst.msk [vmem:[#allocation3 + $0x4] sm:$0x1] %vm763_vm9, %v761_v1  ;;  %803 = vst.msk [vmem:[#allocation3 + $0x5] sm:$0x1] %vm763_vm9, %v801_v7  ;;  %v1118_v1 = vld [vmem:[%s5862_s10 + $0x70] sm:$0xff] }
 0x381   :  { %v729_v8 = vpop.permute.xlu1 %728  ;;  %v690_v10 = vpop.permute.xlu0 %689 }
 0x382   :  { %731 = vst.msk [vmem:[#allocation3 + $0x3] sm:$0x1] %vm692_vm10, %v729_v8  ;;  %693 = vst.msk [vmem:[#allocation3 + $0x2] sm:$0x1] %vm692_vm10, %v690_v10  ;;  %v1123_v8 = vld [vmem:[%s5862_s10 + $0x98] sm:$0xff] }
 0x383   :  { %v1127_v10 = vld [vmem:[%s5862_s10 + $0xb8] sm:$0xff] }
 0x385   :  { %v807_v13 = vpop.permute.xlu1 %806  ;;  %v768_v14 = vpop.permute.xlu0 %767 }
 0x386   :  { %809 = vst.msk [vmem:[#allocation3 + $0x5] sm:$0x1] %vm770_vm11, %v807_v13  ;;  %771 = vst.msk [vmem:[#allocation3 + $0x4] sm:$0x1] %vm770_vm11, %v768_v14  ;;  %v4996_v13 = vpack.c.bf16 %v1118_v1, %v1114_v0  ;;  %v5000_v14 = vpack.c.bf16 %v1127_v10, %v1123_v8  ;;  %v5069_v0 = vpack.c.bf16 %v1150_v54, %v1146_v53  ;;  %v1158_v8 = vld [vmem:[%s5862_s10 + $0x1b0] sm:$0xff]  ;;  %v1163_v10 = vld [vmem:[%s5862_s10 + $0x1d8] sm:$0xff] }
 0x387   :  { %v5072_v1 = vpack.c.bf16 %v1159_v58, %v1155_v57  ;;  %v1035_v53 = vld [vmem:[%s5861_s9 + $0x78] sm:$0xff]  ;;  %v1030_v58 = vld [vmem:[%s5861_s9 + $0x50] sm:$0xff] }
 0x388   :  { %5987 = vst [vmem:[#allocation29_spill] sm:$0xff] %v5069_v0 }
 0x389   :  { %v735_v15 = vpop.permute.xlu1 %734  ;;  %v697_v19 = vpop.permute.xlu0 %696  ;;  %5988 = vst [vmem:[#allocation30_spill] sm:$0xff] %v5072_v1 }
 0x38a   :  { %737 = vst.msk [vmem:[#allocation3 + $0x3] sm:$0x1] %vm699_vm12, %v735_v15  ;;  %700 = vst.msk [vmem:[#allocation3 + $0x2] sm:$0x1] %vm699_vm12, %v697_v19  ;;  %v1122_v15 = vld [vmem:[%s5862_s10 + $0x90] sm:$0xff] }
 0x38b   :  { %v1126_v19 = vld [vmem:[%s5862_s10 + $0xb0] sm:$0xff] }
 0x38d   :  { %v813_v20 = vpop.permute.xlu1 %812  ;;  %v775_v22 = vpop.permute.xlu0 %774 }
 0x38e   :  { %815 = vst.msk [vmem:[#allocation3 + $0x5] sm:$0x1] %vm777_vm13, %v813_v20  ;;  %778 = vst.msk [vmem:[#allocation3 + $0x4] sm:$0x1] %vm777_vm13, %v775_v22  ;;  %v1131_v20 = vld [vmem:[%s5862_s10 + $0xd8] sm:$0xff] }
 0x38f   :  { %v1135_v22 = vld [vmem:[%s5862_s10 + $0xf8] sm:$0xff] }
 0x391   :  { %v741_v25 = vpop.permute.xlu1 %740  ;;  %v704_v26 = vpop.permute.xlu0 %703 }
 0x392   :  { %743 = vst.msk [vmem:[#allocation3 + $0x3] sm:$0x1] %vm706_vm14, %v741_v25  ;;  %707 = vst.msk [vmem:[#allocation3 + $0x2] sm:$0x1] %vm706_vm14, %v704_v26  ;;  %v5015_v25 = vpack.c.bf16 %v1126_v19, %v1122_v15  ;;  %v5018_v26 = vpack.c.bf16 %v1135_v22, %v1131_v20  ;;  %v1167_v15 = vld [vmem:[%s5862_s10 + $0x1f8] sm:$0xff]  ;;  %v1162_v22 = vld [vmem:[%s5862_s10 + $0x1d0] sm:$0xff] }
 0x393   :  { %v5090_v20 = vpack.c.bf16 %v1167_v15, %v1163_v10  ;;  %v1043_v10 = vld [vmem:[%s5861_s9 + $0xb8] sm:$0xff] }
 0x394   :  { %5982 = vst [vmem:[#allocation24_spill] sm:$0xff] %v5018_v26 }
 0x395   :  { %v819_v27 = vpop.permute.xlu1 %818  ;;  %v782_v31 = vpop.permute.xlu0 %781  ;;  %5990 = vst [vmem:[#allocation32_spill] sm:$0xff] %v5090_v20 }
 0x396   :  { %821 = vst.msk [vmem:[#allocation3 + $0x5] sm:$0x1] %vm784_vm15, %v819_v27  ;;  %785 = vst.msk [vmem:[#allocation3 + $0x4] sm:$0x1] %vm784_vm15, %v782_v31  ;;  %v1130_v27 = vld [vmem:[%s5862_s10 + $0xd0] sm:$0xff] }
 0x397   :  { %v1134_v31 = vld [vmem:[%s5862_s10 + $0xf0] sm:$0xff] }
 0x399   :  { %v873_v32 = vpop.permute.xlu1 %872  ;;  %v832_v34 = vpop.permute.xlu0 %831 }
 0x39a   :  { %875 = vst.msk [vmem:[#allocation3 + $0x7] sm:$0x1] %vm834_vm1, %v873_v32  ;;  %835 = vst.msk [vmem:[#allocation3 + $0x6] sm:$0x1] %vm834_vm1, %v832_v34  ;;  %v1139_v32 = vld [vmem:[%s5862_s10 + $0x118] sm:$0xff] }
 0x39b   :  { %v1143_v34 = vld [vmem:[%s5862_s10 + $0x138] sm:$0xff] }
 0x39d   :  { %v879_v36 = vpop.permute.xlu1 %878  ;;  %v839_v37 = vpop.permute.xlu0 %838 }
 0x39e   :  { %881 = vst.msk [vmem:[#allocation3 + $0x7] sm:$0x1] %vm841_vm2, %v879_v36  ;;  %842 = vst.msk [vmem:[#allocation3 + $0x6] sm:$0x1] %vm841_vm2, %v839_v37  ;;  %v5033_v36 = vpack.c.bf16 %v1134_v31, %v1130_v27  ;;  %v5036_v37 = vpack.c.bf16 %v1143_v34, %v1139_v32  ;;  %v1166_v27 = vld [vmem:[%s5862_s10 + $0x1f0] sm:$0xff]  ;;  %v1023_v31 = vld [vmem:[%s5861_s9 + $0x18] sm:$0xff] }
 0x39f   :  { %v1027_v32 = vld [vmem:[%s5861_s9 + $0x38] sm:$0xff]  ;;  %v5105_v34 = vpack.c.bf16 %v1166_v27, %v1162_v22  ;;  %v1038_v27 = vld [vmem:[%s5861_s9 + $0x90] sm:$0xff] }
 0x3a0   :  { %5983 = vst [vmem:[#allocation25_spill] sm:$0xff] %v5033_v36  ;;  %5984 = vst [vmem:[#allocation26_spill] sm:$0xff] %v5036_v37 }
 0x3a1   :  { %v885_v39 = vpop.permute.xlu1 %884  ;;  %v846_v41 = vpop.permute.xlu0 %845  ;;  %5991 = vst [vmem:[#allocation33_spill] sm:$0xff] %v5105_v34 }
 0x3a2   :  { %887 = vst.msk [vmem:[#allocation3 + $0x7] sm:$0x1] %vm848_vm5, %v885_v39  ;;  %849 = vst.msk [vmem:[#allocation3 + $0x6] sm:$0x1] %vm848_vm5, %v846_v41  ;;  %v1138_v39 = vld [vmem:[%s5862_s10 + $0x110] sm:$0xff] }
 0x3a3   :  { %v1142_v41 = vld [vmem:[%s5862_s10 + $0x130] sm:$0xff] }
 0x3a5   :  { %v891_v42 = vpop.permute.xlu1 %890  ;;  %v853_v45 = vpop.permute.xlu0 %852 }
 0x3a6   :  { %893 = vst.msk [vmem:[#allocation3 + $0x7] sm:$0x1] %vm855_vm6, %v891_v42  ;;  %856 = vst.msk [vmem:[#allocation3 + $0x6] sm:$0x1] %vm855_vm6, %v853_v45  ;;  %v1147_v42 = vld [vmem:[%s5862_s10 + $0x158] sm:$0xff] }
 0x3a7   :  { %v1151_v45 = vld [vmem:[%s5862_s10 + $0x178] sm:$0xff] }
 0x3a9   :  { %v897_v47 = vpop.permute.xlu1 %896  ;;  %v860_v51 = vpop.permute.xlu0 %859 }
 0x3aa   :  { %899 = vst.msk [vmem:[#allocation3 + $0x7] sm:$0x1] %vm862_vm7, %v897_v47  ;;  %863 = vst.msk [vmem:[#allocation3 + $0x6] sm:$0x1] %vm862_vm7, %v860_v51  ;;  %v5051_v47 = vpack.c.bf16 %v1142_v41, %v1138_v39  ;;  %v5054_v51 = vpack.c.bf16 %v1151_v45, %v1147_v42  ;;  %v5108_v39 = vpack.c.bf16 %v1027_v32, %v1023_v31  ;;  %v1022_v41 = vld [vmem:[%s5861_s9 + $0x10] sm:$0xff]  ;;  %v1031_v45 = vld [vmem:[%s5861_s9 + $0x58] sm:$0xff] }
 0x3ab   :  { %v1026_v42 = vld [vmem:[%s5861_s9 + $0x30] sm:$0xff]  ;;  %v5126_v57 = vpack.c.bf16 %v1035_v53, %v1031_v45  ;;  %v1047_v32 = vld [vmem:[%s5861_s9 + $0xd8] sm:$0xff] }
 0x3ac   :  { %5985 = vst [vmem:[#allocation27_spill] sm:$0xff] %v5051_v47  ;;  %5986 = vst [vmem:[#allocation28_spill] sm:$0xff] %v5054_v51  ;;  %v5123_v54 = vpack.c.bf16 %v1026_v42, %v1022_v41  ;;  %v1042_v31 = vld [vmem:[%s5861_s9 + $0xb0] sm:$0xff]  ;;  %v1051_v41 = vld [vmem:[%s5861_s9 + $0xf8] sm:$0xff] }
 0x3ad   :  { %5992 = vst [vmem:[#allocation34_spill] sm:$0xff] %v5108_v39  ;;  %v5160_v42 = vpack.c.bf16 %v1042_v31, %v1038_v27  ;;  %v5163_v45 = vpack.c.bf16 %v1051_v41, %v1047_v32  ;;  %v1046_v53 = vld [vmem:[%s5861_s9 + $0xd0] sm:$0xff]  ;;  %v1063_v41 = vld [vmem:[%s5861_s9 + $0x158] sm:$0xff] }
 0x3ae   :  { %v1054_v31 = vld [vmem:[%s5861_s9 + $0x110] sm:$0xff] }
 0x3af   :  { %v1058_v32 = vld [vmem:[%s5861_s9 + $0x130] sm:$0xff] }
 0x3b1   :  { %v900_v7 = vld [vmem:[#allocation3] sm:$0xff] }
 0x3b2   :  { %2963 = vmatmul.mubr.msk.f32.vlgmr.msra.gmra.mrb[22].mxu0 %vm350_vm3, %v900_v7  ;;  %v1154_v7 = vld [vmem:[%s5862_s10 + $0x190] sm:$0xff]  ;;  %vm1018_vm3 = vcmask 326656  }
 0x3b3   :  { %3475 = vmatpush1.bf16.msra.mxu0 %v4978_v61  ;;  %1306 = vmatprep.mubr.f32.mxu0 %v5874_v6  ;;  %v5087_v19 = vpack.c.bf16 %v1158_v8, %v1154_v7  ;;  %v1034_v7 = vld [vmem:[%s5861_s9 + $0x70] sm:$0xff]  ;;  %v1039_v8 = vld [vmem:[%s5861_s9 + $0x98] sm:$0xff] }
 0x3b4   :  { %3477 = vmatprep.subr.bf16.mxu0 %v4980_v63  ;;  %v5142_v15 = vpack.c.bf16 %v1034_v7, %v1030_v58  ;;  %v5145_v22 = vpack.c.bf16 %v1043_v10, %v1039_v8  ;;  %v1050_v58 = vld [vmem:[%s5861_s9 + $0xf0] sm:$0xff]  ;;  %v1055_v7 = vld [vmem:[%s5861_s9 + $0x118] sm:$0xff] }
 0x3b5   :  { %5989 = vst [vmem:[#allocation31_spill] sm:$0xff] %v5087_v19  ;;  %v1059_v8 = vld [vmem:[%s5861_s9 + $0x138] sm:$0xff]  ;;  %v5178_v10 = vpack.c.bf16 %v1050_v58, %v1046_v53  ;;  %v5196_v58 = vpack.c.bf16 %v1058_v32, %v1054_v31 }
 0x3b6   :  { %v5181_v27 = vpack.c.bf16 %v1059_v8, %v1055_v7  ;;  %v1067_v53 = vld [vmem:[%s5861_s9 + $0x178] sm:$0xff]  ;;  %v1062_v8 = vld [vmem:[%s5861_s9 + $0x150] sm:$0xff] }
 0x3b7   :  { %3479 = vmatpush1.bf16.msra.mxu0 %v4996_v13  ;;  %5993 = vst [vmem:[#allocation35_spill] sm:$0xff] %v5196_v58  ;;  %v5199_v7 = vpack.c.bf16 %v1067_v53, %v1063_v41  ;;  %v1075_v31 = vld [vmem:[%s5861_s9 + $0x1b8] sm:$0xff]  ;;  %v5214_v32 = vpack.c.bf16 %v1066_v3, %v1062_v8  ;;  %v1070_v53 = vld [vmem:[%s5861_s9 + $0x190] sm:$0xff]  ;;  %v1077_v3 = vld [vmem:[%s5861_s9 + $0x1c8] sm:$0xff] }
 0x3b8   :  { %3481 = vmatprep.subr.bf16.mxu0 %v5000_v14  ;;  %v5226_v43 = vpack.c.bf16 %v1074_v50, %v1070_v53  ;;  %v1079_v8 = vld [vmem:[%s5861_s9 + $0x1d8] sm:$0xff]  ;;  %v1076_v53 = vld [vmem:[%s5861_s9 + $0x1c0] sm:$0xff] }
 0x3b9   :  { %5994 = vst [vmem:[#allocation36_spill] sm:$0xff] %v5199_v7  ;;  %5995 = vst [vmem:[#allocation37_spill] sm:$0xff] %v5214_v32  ;;  %v1083_v50 = vld [vmem:[%s5861_s9 + $0x1f8] sm:$0xff] }
 0x3ba   :  { %5997 = vst [vmem:[#allocation39_spill] sm:$0xff] %v5226_v43 }
 0x3bb   :  { %3483 = vmatpush1.bf16.msra.mxu0 %v5015_v25 }
 0x3bc   :  { %3485 = vmatprep.subr.bf16.mxu0 %v5018_v26 }
 0x3bf   :  { %3487 = vmatpush1.bf16.msra.mxu0 %v5033_v36 }
 0x3c0   :  { %3489 = vmatprep.subr.bf16.mxu0 %v5036_v37 }
 0x3c3   :  { %3491 = vmatpush1.bf16.msra.mxu0 %v5051_v47 }
 0x3c4   :  { %3493 = vmatprep.subr.bf16.mxu0 %v5054_v51 }
 0x3c7   :  { %3495 = vmatpush1.bf16.msra.mxu0 %v5069_v0 }
 0x3c8   :  { %3497 = vmatprep.subr.bf16.mxu0 %v5072_v1 }
 0x3cb   :  { %3499 = vmatpush1.bf16.msra.mxu0 %v5087_v19 }
 0x3cc   :  { %3501 = vmatprep.subr.bf16.mxu0 %v5090_v20 }
 0x3cf   :  { %3503 = vmatpush1.bf16.msra.mxu0 %v5105_v34 }
 0x3d0   :  { %3545 = vmatprep.subr.bf16.mxu0 %v5108_v39 }
 0x3d2   :  { %1307 = vmatmul.mubr.f32.vlgmr.msra.gmra.mrb[24].mxu0 %v5874_v6  ;;  %v1071_v6 = vld [vmem:[%s5861_s9 + $0x198] sm:$0xff] }
 0x3d3   :  { %3547 = vmatpush1.bf16.msra.mxu0 %v5123_v54  ;;  %v5217_v41 = vpack.c.bf16 %v1075_v31, %v1071_v6  ;;  %v1081_v6 = vld [vmem:[%s5861_s9 + $0x1e8] sm:$0xff] }
 0x3d4   :  { %3549 = vmatprep.subr.bf16.mxu0 %v5126_v57  ;;  %v5239_v31 = vpack.c.bf16 %v1081_v6, %v1077_v3  ;;  %v1078_v3 = vld [vmem:[%s5861_s9 + $0x1d0] sm:$0xff] }
 0x3d5   :  { %5996 = vst [vmem:[#allocation38_spill] sm:$0xff] %v5217_v41  ;;  %v1082_v6 = vld [vmem:[%s5861_s9 + $0x1f0] sm:$0xff] }
 0x3d6   :  { %5998 = vst [vmem:[#allocation40_spill] sm:$0xff] %v5239_v31  ;;  %3533 = vmatprep.subr.bf16.mxu1 %v5239_v31  ;;  %v1088_v31 = vld [vmem:[%s5861_s9 + $0x220] sm:$0xff] }
 0x3d7   :  { %3551 = vmatpush1.bf16.msra.mxu0 %v5142_v15 }
 0x3d8   :  { %3553 = vmatprep.subr.bf16.mxu0 %v5145_v22 }
 0x3db   :  { %3555 = vmatpush1.bf16.msra.mxu0 %v5160_v42 }
 0x3dc   :  { %3557 = vmatprep.subr.bf16.mxu0 %v5163_v45 }
 0x3df   :  { %3559 = vmatpush1.bf16.msra.mxu0 %v5178_v10 }
 0x3e0   :  { %3561 = vmatprep.subr.bf16.mxu0 %v5181_v27 }
 0x3e3   :  { %3563 = vmatpush1.bf16.msra.mxu0 %v5196_v58 }
 0x3e4   :  { %3565 = vmatprep.subr.bf16.mxu0 %v5199_v7  ;;  %v5264_v7 = vpack.c.bf16 %v1082_v6, %v1078_v3  ;;  %v1084_v6 = vld [vmem:[%s5861_s9 + $0x200] sm:$0xff] }
 0x3e6   :  { %6001 = vst [vmem:[#allocation43_spill] sm:$0xff] %v5264_v7 }
 0x3e7   :  { %3567 = vmatpush1.bf16.msra.mxu0 %v5214_v32 }
 0x3e8   :  { %3569 = vmatprep.subr.bf16.mxu0 %v5217_v41  ;;  %v5250_v41 = vpack.c.bf16 %v1083_v50, %v1079_v8  ;;  %v1087_v8 = vld [vmem:[%s5861_s9 + $0x218] sm:$0xff] }
 0x3e9   :  { %v1091_v50 = vld [vmem:[%s5861_s9 + $0x238] sm:$0xff] }
 0x3ea   :  { %5999 = vst [vmem:[#allocation41_spill] sm:$0xff] %v5250_v41  ;;  %v5279_v3 = vpack.c.bf16 %v1091_v50, %v1087_v8  ;;  %v1097_v8 = vld [vmem:[%s5861_s9 + $0x268] sm:$0xff] }
 0x3eb   :  { %3571 = vmatpush1.bf16.msra.mxu0 %v5226_v43  ;;  %v1080_v43 = vld [vmem:[%s5861_s9 + $0x1e0] sm:$0xff] }
 0x3ec   :  { %v5252_v32 = vpack.c.bf16 %v1080_v43, %v1076_v53  ;;  %v1089_v43 = vld [vmem:[%s5861_s9 + $0x228] sm:$0xff]  ;;  %3573 = vmatprep.subr.bf16.mxu0 %v5250_v41  ;;  %6003 = vst [vmem:[#allocation45_spill] sm:$0xff] %v5279_v3  ;;  %v5291_v41 = vpack.c.bf16 %v1088_v31, %v1084_v6  ;;  %v1095_v6 = vld [vmem:[%s5861_s9 + $0x258] sm:$0xff] }
 0x3ed   :  { %v5277_v53 = vpack.c.bf16 %v1089_v43, %v1085_v40  ;;  %v1090_v40 = vld [vmem:[%s5861_s9 + $0x230] sm:$0xff]  ;;  %v1093_v43 = vld [vmem:[%s5861_s9 + $0x248] sm:$0xff] }
 0x3ee   :  { %6000 = vst [vmem:[#allocation42_spill] sm:$0xff] %v5252_v32  ;;  %3535 = vmatpush1.bf16.msra.mxu1 %v5252_v32  ;;  %6004 = vst [vmem:[#allocation46_spill] sm:$0xff] %v5291_v41  ;;  %v5304_v50 = vpack.c.bf16 %v1090_v40, %v1086_v33  ;;  %v5306_v31 = vpack.c.bf16 %v1097_v8, %v1093_v43  ;;  %v1092_v32 = vld [vmem:[%s5861_s9 + $0x240] sm:$0xff]  ;;  %v1094_v40 = vld [vmem:[%s5861_s9 + $0x250] sm:$0xff] }
 0x3ef   :  { %6002 = vst [vmem:[#allocation44_spill] sm:$0xff] %v5277_v53  ;;  %3575 = vmatpush1.bf16.msra.mxu0 %v5264_v7  ;;  %3537 = vmatprep.subr.bf16.mxu1 %v5277_v53  ;;  %v1099_v7 = vld [vmem:[%s5861_s9 + $0x278] sm:$0xff]  ;;  %v1096_v33 = vld [vmem:[%s5861_s9 + $0x260] sm:$0xff]  ;;  %v1098_v43 = vld [vmem:[%s5861_s9 + $0x270] sm:$0xff] }
 0x3f0   :  { %3577 = vmatprep.subr.bf16.mxu0 %v5279_v3  ;;  %6005 = vst [vmem:[#allocation47_spill] sm:$0xff] %v5304_v50  ;;  %6006 = vst [vmem:[#allocation48_spill] sm:$0xff] %v5306_v31  ;;  %v5317_v58 = vpack.c.bf16 %v1099_v7, %v1095_v6  ;;  %v5329_v8 = vpack.c.bf16 %v1096_v33, %v1092_v32  ;;  %v5333_v7 = vpack.c.bf16 %v1098_v43, %v1094_v40  ;;  %v5339_v6 = vld [vmem:[%s5861_s9 + $0x288] sm:$0xff]  ;;  %v5344_v3 = vld [vmem:[%s5861_s9 + $0x298] sm:$0xff]  ;;  %v925_v40 = vlaneseq }
 0x3f1   :  { %6010 = vst [vmem:[#allocation52_spill] sm:$0xff] %v5339_v6  ;;  %6011 = vst [vmem:[#allocation53_spill] sm:$0xff] %v5344_v3  ;;  %v5352_v32 = vld [vmem:[%s5861_s9 + $0x280] sm:$0xff]  ;;  %v5358_v33 = vld [vmem:[%s5861_s9 + $0x290] sm:$0xff] }
 0x3f2   :  { %6007 = vst [vmem:[#allocation49_spill] sm:$0xff] %v5317_v58  ;;  %3539 = vmatpush1.bf16.msra.mxu1 %v5291_v41  ;;  %6008 = vst [vmem:[#allocation50_spill] sm:$0xff] %v5329_v8  ;;  %v5364_v43 = vshrl.u32 %v925_v40, 7 }
 0x3f3   :  { %3579 = vmatpush1.bf16.msra.mxu0 %v5304_v50  ;;  %3541 = vmatprep.subr.bf16.mxu1 %v5306_v31  ;;  %6009 = vst [vmem:[#allocation51_spill] sm:$0xff] %v5333_v7  ;;  %6012 = vst [vmem:[#allocation54_spill] sm:$0xff] %v5352_v32 }
 0x3f4   :  { %3581 = vmatprep.subr.bf16.mxu0 %v5317_v58  ;;  %6013 = vst [vmem:[#allocation55_spill] sm:$0xff] %v5358_v33 }
 0x3f6   :  { %3543 = vmatpush1.bf16.msra.mxu1 %v5329_v8 }
 0x3f7   :  { %3583 = vmatpush1.bf16.msra.mxu0 %v5333_v7  ;;  %1356 = vmatprep.subr.mxu1 %v5339_v6  ;;  %v927_v6 = vsub.s32 0, %v5364_v43  ;;  %v931_v7 = vsub.s32 1, %v5364_v43 }
 0x3f8   :  { %1427 = vmatprep.subr.mxu0 %v5344_v3  ;;  %v923_v3 = vld [vmem:[%s5860_s8] sm:$0x3] }
 0x3f9   :  { %v928_v8 = vrot.slane %v923_v3, %v927_v6  ;;  %v932_v58 = vrot.slane %v923_v3, %v931_v7 }
 0x3fa   :  { %1357 = vmatpush1.msra.mxu1 %v5352_v32 }
 0x3fb   :  { %1428 = vmatpush1.msra.mxu0 %v5358_v33  ;;  %3585 = vmatprep.subr.bf16.mxu1 %v4690_v46 }
 0x3fc   :  { %3617 = vmatprep.subr.bf16.mxu0 %v4698_v49 }
 0x485   :  { %v1010_v32 = vpop.f32.mrb[22].mxu0 }
 0x486   :  { %v1011_v31 = vadd.f32 %v1010_v32, %v928_v8  ;;  %v1012_v33 = vpop.f32.mrb[23].mxu0 }
 0x487   :  { %v1013_v50 = vadd.f32 %v1012_v33, %v932_v58  ;;  %v6014_v58 = vmov 0.0  }
 0x488   :  { %v1015_v46 = vmax.f32 %v1011_v31, 0.0  ;;  %v1473_v31 = vsub.s32 3, %v5364_v43 }
 0x489   :  { %v1016_v49 = vmax.f32 %v1013_v50, 0.0 }
 0x48a   :  { %1017 = vst [vmem:[#allocation4] sm:$0xff] %v1015_v46  ;;  %v1168_v46 = vld [vmem:[%s5863_s11] sm:$0xf] }
 0x48b   :  { %1019 = vst.msk [vmem:[#allocation4 + $0x8] sm:$0xff] %vm1018_vm3, %v1016_v49  ;;  %v5411_v49 = vrot.slane %v1168_v46, %v927_v6  ;;  %v1469_v6 = vsub.s32 2, %v5364_v43 }
 0x48d   :  { %6015 = vst [vmem:[#allocation56_spill] sm:$0xff] %v5411_v49 }
 0x491   :  { %v1169_v41 = vld [vmem:[#allocation4] sm:$0x3] }
 0x492   :  { %v1170_v40 = vld [vmem:[#allocation4 + $0x8] sm:$0x3] }
 0x493   :  { %2964 = vmatprep.mubr.msk.f32.mxu1 %vm1018_vm3, %v1170_v40  ;;  %2965 = vmatprep.mubr.msk.f32.mxu0 %vm1018_vm3, %v1170_v40 }
 0x494   :  { %1381 = vmatmul.mubr.f32.vlgmr.msra.gmra.mrb[12].mxu1 %v1169_v41  ;;  %1452 = vmatmul.mubr.f32.vlgmr.msra.gmra.mrb[24].mxu0 %v1169_v41  ;;  %v5413_v41 = vrot.slane %v1168_v46, %v931_v7 }
 0x495   :  { %3587 = vmatpush1.bf16.msra.mxu1 %v4704_v52  ;;  %3619 = vmatpush1.bf16.msra.mxu0 %v4978_v61 }
 0x496   :  { %3589 = vmatprep.subr.bf16.mxu1 %v4713_v56  ;;  %3621 = vmatprep.subr.bf16.mxu0 %v4980_v63 }
 0x497   :  { %1573 = vmatprep.mubr.f32.mxu1 %v6014_v58  ;;  %1644 = vmatprep.mubr.f32.mxu0 %v6014_v58 }
 0x499   :  { %3591 = vmatpush1.bf16.msra.mxu1 %v4722_v59  ;;  %3623 = vmatpush1.bf16.msra.mxu0 %v4996_v13 }
 0x49a   :  { %3593 = vmatprep.subr.bf16.mxu1 %v4731_v62  ;;  %3625 = vmatprep.subr.bf16.mxu0 %v5000_v14 }
 0x49d   :  { %3595 = vmatpush1.bf16.msra.mxu1 %v4746_v4  ;;  %3627 = vmatpush1.bf16.msra.mxu0 %v5015_v25 }
 0x49e   :  { %3597 = vmatprep.subr.bf16.mxu1 %v4749_v5  ;;  %3629 = vmatprep.subr.bf16.mxu0 %v5018_v26 }
 0x4a1   :  { %3599 = vmatpush1.bf16.msra.mxu1 %v4764_v11  ;;  %3631 = vmatpush1.bf16.msra.mxu0 %v5033_v36 }
 0x4a2   :  { %3601 = vmatprep.subr.bf16.mxu1 %v4767_v12  ;;  %3633 = vmatprep.subr.bf16.mxu0 %v5036_v37 }
 0x4a5   :  { %3603 = vmatpush1.bf16.msra.mxu1 %v4782_v17  ;;  %3635 = vmatpush1.bf16.msra.mxu0 %v5051_v47 }
 0x4a6   :  { %3605 = vmatprep.subr.bf16.mxu1 %v4785_v18  ;;  %3637 = vmatprep.subr.bf16.mxu0 %v5054_v51 }
 0x4a9   :  { %3607 = vmatpush1.bf16.msra.mxu1 %v4800_v23  ;;  %3639 = vmatpush1.bf16.msra.mxu0 %v5069_v0 }
 0x4aa   :  { %3609 = vmatprep.subr.bf16.mxu1 %v4803_v24  ;;  %3641 = vmatprep.subr.bf16.mxu0 %v5072_v1 }
 0x4ad   :  { %3611 = vmatpush1.bf16.msra.mxu1 %v4818_v29  ;;  %3643 = vmatpush1.bf16.msra.mxu0 %v5087_v19 }
 0x4ae   :  { %3613 = vmatprep.subr.bf16.mxu1 %v4821_v30  ;;  %3645 = vmatprep.subr.bf16.mxu0 %v5090_v20 }
 0x4b1   :  { %3615 = vmatpush1.bf16.msra.mxu1 %v4836_v35  ;;  %3647 = vmatpush1.bf16.msra.mxu0 %v5105_v34  ;;  %v5418_v34 = vrot.slane %v1168_v46, %v1473_v31  ;;  %v5422_v35 = vrot.slane %v1168_v46, %v1469_v6 }
 0x4b2   :  { %3649 = vmatprep.subr.bf16.mxu1 %v4839_v38  ;;  %3689 = vmatprep.subr.bf16.mxu0 %v5108_v39 }
 0x567   :  { %v1382_v3 = vpop.f32.mrb[12].mxu1  ;;  %v1453_v50 = vpop.f32.mrb[24].mxu0 }
 0x568   :  { %v1479_v8 = vadd.f32 %v5411_v49, %v1382_v3  ;;  %v1384_v32 = vpop.f32.mrb[13].mxu1  ;;  %v1455_v33 = vpop.f32.mrb[25].mxu0  ;;  %v1481_v30 = vadd.f32 %v5422_v35, %v1453_v50 }
 0x569   :  { %v1480_v40 = vadd.f32 %v5413_v41, %v1384_v32  ;;  %v1482_v7 = vadd.f32 %v5418_v34, %v1455_v33 }
 0x56a   :  { %v2966_v38 = vmul.f32 -1.442695, %v1479_v8 }
 0x56b   :  { %v2967_v39 = vmul.f32 -1.442695, %v1480_v40  ;;  %v2968_v20 = vmul.f32 -1.442695, %v1482_v7  ;;  %v1508_v7 = vld [vmem:[#allocation4 + $0x8] sm:$0xc] }
 0x56c   :  { %4187 = vpow2.f32 %v2966_v38 }
 0x56d   :  { %4189 = vpow2.f32 %v2967_v39 }
 0x56e   :  { %4191 = vpow2.f32 %v2968_v20 }
 0x56f   :  { %4193 = vtanh.f32 %v1481_v30  ;;  %v1654_v30 = vrot.slane %v1508_v7, 2  ;;  %v6030_v7 = vld [vmem:[#allocation45_spill] sm:$0xff] }
 0x576   :  { %v4188_v3 = vpop.eup %4187 }
 0x577   :  { %v4190_v49 = vpop.eup %4189  ;;  %v1486_v19 = vadd.f32 1.0, %v4188_v3  ;;  %v6019_v3 = vld [vmem:[#allocation36_spill] sm:$0xff] }
 0x578   :  { %v1492_v8 = vadd.f32 1.0, %v4190_v49  ;;  %v4192_v31 = vpop.eup %4191  ;;  %v6018_v49 = vld [vmem:[#allocation20_spill] sm:$0xff] }
 0x579   :  { %4195 = vrcp.f32 %v1486_v19  ;;  %v4194_v38 = vpop.eup %4193  ;;  %v1499_v40 = vadd.f32 1.0, %v4192_v31  ;;  %v6017_v19 = vld [vmem:[#allocation35_spill] sm:$0xff]  ;;  %v6021_v31 = vld [vmem:[#allocation37_spill] sm:$0xff] }
 0x57a   :  { %4197 = vrcp.f32 %v1492_v8  ;;  %v6020_v8 = vld [vmem:[#allocation21_spill] sm:$0xff] }
 0x57b   :  { %4199 = vrcp.f32 %v1499_v40  ;;  %v6026_v40 = vld [vmem:[#allocation40_spill] sm:$0xff] }
 0x583   :  { %v4196_v32 = vpop.eup %4195 }
 0x584   :  { %v4198_v43 = vpop.eup %4197  ;;  %v1503_v39 = vmul.f32 %v4196_v32, %v4194_v38  ;;  %v6022_v38 = vld [vmem:[#allocation22_spill] sm:$0xff] }
 0x585   :  { %v1502_v33 = vmul.f32 0.0, %v4198_v43  ;;  %v4200_v50 = vpop.eup %4199  ;;  %v6023_v32 = vld [vmem:[#allocation38_spill] sm:$0xff]  ;;  %v6024_v43 = vld [vmem:[#allocation23_spill] sm:$0xff] }
 0x587   :  { %v5425_v46 = vadd.f32 %v1503_v39, %v1502_v33  ;;  %v6025_v39 = vld [vmem:[#allocation39_spill] sm:$0xff]  ;;  %v6027_v33 = vld [vmem:[#allocation41_spill] sm:$0xff] }
 0x589   :  { %4201 = vtanh.f32 %v5425_v46 }
 0x593   :  { %v4202_v6 = vpop.eup %4201 }
 0x594   :  { %v5428_v20 = vmul.f32 %v4202_v6, %v4200_v50  ;;  %v6028_v50 = vld [vmem:[#allocation42_spill] sm:$0xff]  ;;  %v6029_v6 = vld [vmem:[#allocation43_spill] sm:$0xff] }
 0x596   :  { %6016 = vst [vmem:[#allocation57_spill] sm:$0xff] %v5428_v20  ;;  %1574 = vmatmul.mubr.f32.vlgmr.msra.gmra.mrb[14].mxu1 %v5428_v20  ;;  %1645 = vmatmul.mubr.f32.vlgmr.msra.gmra.mrb[26].mxu0 %v5428_v20  ;;  %v6032_v20 = vld [vmem:[#allocation47_spill] sm:$0xff] }
 0x597   :  { %3651 = vmatpush1.bf16.msra.mxu1 %v4857_v44  ;;  %3691 = vmatpush1.bf16.msra.mxu0 %v5123_v54 }
 0x598   :  { %2969 = vmatprep.mubr.msk.f32.mxu1 %vm1018_vm3, %v1654_v30  ;;  %2970 = vmatprep.mubr.msk.f32.mxu0 %vm1018_vm3, %v1654_v30  ;;  %v6031_v30 = vld [vmem:[#allocation46_spill] sm:$0xff] }
 0x599   :  { %3653 = vmatprep.subr.bf16.mxu1 %v4860_v48  ;;  %3693 = vmatprep.subr.bf16.mxu0 %v5126_v57 }
 0x59b   :  { %3655 = vmatpush1.bf16.msra.mxu1 %v4878_v55  ;;  %3695 = vmatpush1.bf16.msra.mxu0 %v5142_v15 }
 0x59c   :  { %3657 = vmatprep.subr.bf16.mxu1 %v4881_v60  ;;  %3697 = vmatprep.subr.bf16.mxu0 %v5145_v22 }
 0x59f   :  { %3659 = vmatpush1.bf16.msra.mxu1 %v4896_v2  ;;  %3699 = vmatpush1.bf16.msra.mxu0 %v5160_v42 }
 0x5a0   :  { %3661 = vmatprep.subr.bf16.mxu1 %v4899_v9  ;;  %3701 = vmatprep.subr.bf16.mxu0 %v5163_v45 }
 0x5a3   :  { %3663 = vmatpush1.bf16.msra.mxu1 %v4914_v16  ;;  %3703 = vmatpush1.bf16.msra.mxu0 %v5178_v10 }
 0x5a4   :  { %3665 = vmatprep.subr.bf16.mxu1 %v4917_v21  ;;  %3705 = vmatprep.subr.bf16.mxu0 %v5181_v27 }
 0x5a7   :  { %3667 = vmatpush1.bf16.msra.mxu1 %v4932_v28  ;;  %3707 = vmatpush1.bf16.msra.mxu0 %v6017_v19 }
 0x5a8   :  { %3669 = vmatprep.subr.bf16.mxu1 %v6018_v49  ;;  %3709 = vmatprep.subr.bf16.mxu0 %v6019_v3 }
 0x5ab   :  { %3671 = vmatpush1.bf16.msra.mxu1 %v6020_v8  ;;  %3711 = vmatpush1.bf16.msra.mxu0 %v6021_v31 }
 0x5ac   :  { %3673 = vmatprep.subr.bf16.mxu1 %v6022_v38  ;;  %3713 = vmatprep.subr.bf16.mxu0 %v6023_v32  ;;  %v6033_v32 = vld [vmem:[#allocation48_spill] sm:$0xff]  ;;  %v6039_v38 = vld [vmem:[#allocation54_spill] sm:$0xff] }
 0x5af   :  { %3675 = vmatpush1.bf16.msra.mxu1 %v6024_v43  ;;  %3715 = vmatpush1.bf16.msra.mxu0 %v6025_v39  ;;  %v6034_v43 = vld [vmem:[#allocation49_spill] sm:$0xff]  ;;  %v6035_v39 = vld [vmem:[#allocation50_spill] sm:$0xff] }
 0x5b0   :  { %3677 = vmatprep.subr.bf16.mxu1 %v6026_v40  ;;  %3717 = vmatprep.subr.bf16.mxu0 %v6027_v33  ;;  %v6036_v40 = vld [vmem:[#allocation51_spill] sm:$0xff]  ;;  %v1507_v33 = vld [vmem:[#allocation4] sm:$0xc] }
 0x5b3   :  { %3679 = vmatpush1.bf16.msra.mxu1 %v6028_v50  ;;  %3719 = vmatpush1.bf16.msra.mxu0 %v6029_v6  ;;  %v6037_v50 = vld [vmem:[#allocation52_spill] sm:$0xff]  ;;  %v6038_v6 = vld [vmem:[#allocation53_spill] sm:$0xff] }
 0x5b4   :  { %3681 = vmatprep.subr.bf16.mxu1 %v5277_v53  ;;  %3721 = vmatprep.subr.bf16.mxu0 %v6030_v7  ;;  %v1653_v53 = vrot.slane %v1507_v33, 2  ;;  %v6040_v7 = vld [vmem:[#allocation55_spill] sm:$0xff]  ;;  %v6044_v33 = vld [vmem:[#allocation17_spill] sm:$0xff] }
 0x5b7   :  { %3683 = vmatpush1.bf16.msra.mxu1 %v6031_v30  ;;  %3723 = vmatpush1.bf16.msra.mxu0 %v6032_v20  ;;  %v6041_v20 = vld [vmem:[#allocation8_spill] sm:$0xff] }
 0x5b8   :  { %3685 = vmatprep.subr.bf16.mxu1 %v6033_v32  ;;  %3725 = vmatprep.subr.bf16.mxu0 %v6034_v43  ;;  %v6042_v32 = vld [vmem:[#allocation9_spill] sm:$0xff] }
 0x5bb   :  { %3687 = vmatpush1.bf16.msra.mxu1 %v6035_v39  ;;  %3727 = vmatpush1.bf16.msra.mxu0 %v6036_v40 }
 0x5bc   :  { %1698 = vmatprep.subr.mxu1 %v6037_v50  ;;  %1769 = vmatprep.subr.mxu0 %v6038_v6 }
 0x5bf   :  { %1699 = vmatpush1.msra.mxu1 %v6039_v38  ;;  %1770 = vmatpush1.msra.mxu0 %v6040_v7 }
 0x5c0   :  { %1723 = vmatmul.mubr.f32.vlgmr.msra.gmra.mrb[14].mxu1 %v1653_v53  ;;  %1794 = vmatmul.mubr.f32.vlgmr.msra.gmra.mrb[26].mxu0 %v1653_v53  ;;  %v6043_v53 = vld [vmem:[#allocation31_spill] sm:$0xff] }
 0x5c1   :  { %3729 = vmatprep.subr.bf16.mxu1 %v6041_v20  ;;  %3761 = vmatprep.subr.bf16.mxu0 %v6042_v32 }
 0x5c2   :  { %3731 = vmatpush1.bf16.msra.mxu1 %v4704_v52  ;;  %3763 = vmatpush1.bf16.msra.mxu0 %v4978_v61 }
 0x5c3   :  { %3733 = vmatprep.subr.bf16.mxu1 %v4713_v56  ;;  %3765 = vmatprep.subr.bf16.mxu0 %v4980_v63 }
 0x5c4   :  { %1894 = vmatprep.mubr.f32.mxu1 %v6014_v58  ;;  %1965 = vmatprep.mubr.f32.mxu0 %v6014_v58 }
 0x5c6   :  { %3735 = vmatpush1.bf16.msra.mxu1 %v4722_v59  ;;  %3767 = vmatpush1.bf16.msra.mxu0 %v4996_v13 }
 0x5c7   :  { %3737 = vmatprep.subr.bf16.mxu1 %v4731_v62  ;;  %3769 = vmatprep.subr.bf16.mxu0 %v5000_v14 }
 0x5ca   :  { %3739 = vmatpush1.bf16.msra.mxu1 %v4746_v4  ;;  %3771 = vmatpush1.bf16.msra.mxu0 %v5015_v25 }
 0x5cb   :  { %3741 = vmatprep.subr.bf16.mxu1 %v4749_v5  ;;  %3773 = vmatprep.subr.bf16.mxu0 %v5018_v26 }
 0x5ce   :  { %3743 = vmatpush1.bf16.msra.mxu1 %v4764_v11  ;;  %3775 = vmatpush1.bf16.msra.mxu0 %v5033_v36 }
 0x5cf   :  { %3745 = vmatprep.subr.bf16.mxu1 %v4767_v12  ;;  %3777 = vmatprep.subr.bf16.mxu0 %v5036_v37  ;;  %v6050_v37 = vld [vmem:[#allocation56_spill] sm:$0xff] }
 0x5d2   :  { %3747 = vmatpush1.bf16.msra.mxu1 %v4782_v17  ;;  %3779 = vmatpush1.bf16.msra.mxu0 %v5051_v47  ;;  %v6045_v17 = vld [vmem:[#allocation32_spill] sm:$0xff]  ;;  %v6046_v47 = vld [vmem:[#allocation18_spill] sm:$0xff] }
 0x5d3   :  { %3749 = vmatprep.subr.bf16.mxu1 %v4785_v18  ;;  %3781 = vmatprep.subr.bf16.mxu0 %v5054_v51  ;;  %v6047_v18 = vld [vmem:[#allocation33_spill] sm:$0xff]  ;;  %v6048_v51 = vld [vmem:[#allocation19_spill] sm:$0xff] }
 0x5d6   :  { %3751 = vmatpush1.bf16.msra.mxu1 %v4800_v23  ;;  %3783 = vmatpush1.bf16.msra.mxu0 %v5069_v0  ;;  %v6049_v23 = vld [vmem:[#allocation34_spill] sm:$0xff] }
 0x5d7   :  { %3753 = vmatprep.subr.bf16.mxu1 %v4803_v24  ;;  %3785 = vmatprep.subr.bf16.mxu0 %v5072_v1 }
 0x5da   :  { %3755 = vmatpush1.bf16.msra.mxu1 %v4818_v29  ;;  %3787 = vmatpush1.bf16.msra.mxu0 %v6043_v53 }
 0x5db   :  { %3757 = vmatprep.subr.bf16.mxu1 %v6044_v33  ;;  %3789 = vmatprep.subr.bf16.mxu0 %v6045_v17 }
 0x5de   :  { %3759 = vmatpush1.bf16.msra.mxu1 %v6046_v47  ;;  %3791 = vmatpush1.bf16.msra.mxu0 %v6047_v18 }
 0x5df   :  { %3793 = vmatprep.subr.bf16.mxu1 %v6048_v51  ;;  %3833 = vmatprep.subr.bf16.mxu0 %v6049_v23 }
 0x693   :  { %v1724_v0 = vpop.f32.mrb[14].mxu1  ;;  %v1795_v24 = vpop.f32.mrb[26].mxu0 }
 0x694   :  { %v1800_v1 = vadd.f32 %v1724_v0, %v6050_v37  ;;  %v1726_v12 = vpop.f32.mrb[15].mxu1  ;;  %v1797_v29 = vpop.f32.mrb[27].mxu0  ;;  %v1802_v18 = vadd.f32 %v1795_v24, %v5422_v35 }
 0x695   :  { %v1801_v53 = vadd.f32 %v1726_v12, %v5413_v41  ;;  %v1803_v47 = vadd.f32 %v1797_v29, %v5418_v34 }
 0x696   :  { %v2971_v36 = vmul.f32 -1.442695, %v1800_v1 }
 0x697   :  { %v2972_v33 = vmul.f32 -1.442695, %v1801_v53  ;;  %v2973_v17 = vmul.f32 -1.442695, %v1803_v47 }
 0x698   :  { %4203 = vpow2.f32 %v2971_v36 }
 0x699   :  { %4205 = vpow2.f32 %v2972_v33 }
 0x69a   :  { %4207 = vpow2.f32 %v2973_v17  ;;  %v1829_v17 = vld [vmem:[#allocation4 + $0x8] sm:$0x30] }
 0x69b   :  { %4209 = vtanh.f32 %v1802_v18 }
 0x6a2   :  { %v4204_v51 = vpop.eup %4203 }
 0x6a3   :  { %v4206_v11 = vpop.eup %4205  ;;  %v1807_v23 = vadd.f32 1.0, %v4204_v51  ;;  %v6054_v51 = vld [vmem:[#allocation39_spill] sm:$0xff] }
 0x6a4   :  { %v1813_v26 = vadd.f32 1.0, %v4206_v11  ;;  %v4208_v0 = vpop.eup %4207  ;;  %v1975_v11 = vrot.slane %v1829_v17, 4 }
 0x6a5   :  { %4211 = vrcp.f32 %v1807_v23  ;;  %v4210_v37 = vpop.eup %4209  ;;  %v1820_v36 = vadd.f32 1.0, %v4208_v0  ;;  %v6051_v23 = vld [vmem:[#allocation22_spill] sm:$0xff]  ;;  %v6056_v0 = vld [vmem:[#allocation41_spill] sm:$0xff] }
 0x6a6   :  { %4213 = vrcp.f32 %v1813_v26  ;;  %v6052_v26 = vld [vmem:[#allocation38_spill] sm:$0xff] }
 0x6a7   :  { %4215 = vrcp.f32 %v1820_v36  ;;  %v6060_v36 = vld [vmem:[#allocation45_spill] sm:$0xff] }
 0x6af   :  { %v4212_v12 = vpop.eup %4211 }
 0x6b0   :  { %v4214_v1 = vpop.eup %4213  ;;  %v1824_v53 = vmul.f32 %v4212_v12, %v4210_v37  ;;  %v6053_v37 = vld [vmem:[#allocation23_spill] sm:$0xff]  ;;  %v6057_v12 = vld [vmem:[#allocation42_spill] sm:$0xff] }
 0x6b1   :  { %v1823_v33 = vmul.f32 %v4214_v1, %v5425_v46  ;;  %v4216_v24 = vpop.eup %4215  ;;  %v6055_v46 = vld [vmem:[#allocation40_spill] sm:$0xff]  ;;  %v6058_v1 = vld [vmem:[#allocation43_spill] sm:$0xff] }
 0x6b3   :  { %v5517_v29 = vadd.f32 %v1824_v53, %v1823_v33  ;;  %v6059_v53 = vld [vmem:[#allocation44_spill] sm:$0xff]  ;;  %v6061_v33 = vld [vmem:[#allocation47_spill] sm:$0xff] }
 0x6b5   :  { %4217 = vtanh.f32 %v5517_v29 }
 0x6bf   :  { %v4218_v47 = vpop.eup %4217 }
 0x6c0   :  { %v5520_v18 = vmul.f32 %v4218_v47, %v4216_v24  ;;  %v6062_v24 = vld [vmem:[#allocation48_spill] sm:$0xff]  ;;  %v1828_v47 = vld [vmem:[#allocation4] sm:$0x30] }
 0x6c1   :  { %v1974_v17 = vrot.slane %v1828_v47, 4  ;;  %v6077_v47 = vld [vmem:[#allocation31_spill] sm:$0xff] }
 0x6c2   :  { %1895 = vmatmul.mubr.f32.vlgmr.msra.gmra.mrb[16].mxu1 %v5520_v18  ;;  %1966 = vmatmul.mubr.f32.vlgmr.msra.gmra.mrb[28].mxu0 %v5520_v18 }
 0x6c3   :  { %3795 = vmatpush1.bf16.msra.mxu1 %v4857_v44  ;;  %3835 = vmatpush1.bf16.msra.mxu0 %v5123_v54 }
 0x6c4   :  { %2974 = vmatprep.mubr.msk.f32.mxu1 %vm1018_vm3, %v1975_v11  ;;  %2975 = vmatprep.mubr.msk.f32.mxu0 %vm1018_vm3, %v1975_v11  ;;  %v6076_v11 = vld [vmem:[#allocation16_spill] sm:$0xff] }
 0x6c5   :  { %3797 = vmatprep.subr.bf16.mxu1 %v4860_v48  ;;  %3837 = vmatprep.subr.bf16.mxu0 %v5126_v57 }
 0x6c7   :  { %3799 = vmatpush1.bf16.msra.mxu1 %v4878_v55  ;;  %3839 = vmatpush1.bf16.msra.mxu0 %v5142_v15 }
 0x6c8   :  { %3801 = vmatprep.subr.bf16.mxu1 %v4881_v60  ;;  %3841 = vmatprep.subr.bf16.mxu0 %v5145_v22 }
 0x6cb   :  { %3803 = vmatpush1.bf16.msra.mxu1 %v4896_v2  ;;  %3843 = vmatpush1.bf16.msra.mxu0 %v5160_v42 }
 0x6cc   :  { %3805 = vmatprep.subr.bf16.mxu1 %v4899_v9  ;;  %3845 = vmatprep.subr.bf16.mxu0 %v5163_v45 }
 0x6cf   :  { %3807 = vmatpush1.bf16.msra.mxu1 %v4914_v16  ;;  %3847 = vmatpush1.bf16.msra.mxu0 %v5178_v10 }
 0x6d0   :  { %3809 = vmatprep.subr.bf16.mxu1 %v4917_v21  ;;  %3849 = vmatprep.subr.bf16.mxu0 %v5181_v27 }
 0x6d3   :  { %3811 = vmatpush1.bf16.msra.mxu1 %v4932_v28  ;;  %3851 = vmatpush1.bf16.msra.mxu0 %v6017_v19 }
 0x6d4   :  { %3813 = vmatprep.subr.bf16.mxu1 %v6018_v49  ;;  %3853 = vmatprep.subr.bf16.mxu0 %v6019_v3 }
 0x6d7   :  { %3815 = vmatpush1.bf16.msra.mxu1 %v6020_v8  ;;  %3855 = vmatpush1.bf16.msra.mxu0 %v6021_v31 }
 0x6d8   :  { %3817 = vmatprep.subr.bf16.mxu1 %v6051_v23  ;;  %3857 = vmatprep.subr.bf16.mxu0 %v6052_v26 }
 0x6db   :  { %3819 = vmatpush1.bf16.msra.mxu1 %v6053_v37  ;;  %3859 = vmatpush1.bf16.msra.mxu0 %v6054_v51 }
 0x6dc   :  { %3821 = vmatprep.subr.bf16.mxu1 %v6055_v46  ;;  %3861 = vmatprep.subr.bf16.mxu0 %v6056_v0 }
 0x6df   :  { %3823 = vmatpush1.bf16.msra.mxu1 %v6057_v12  ;;  %3863 = vmatpush1.bf16.msra.mxu0 %v6058_v1 }
 0x6e0   :  { %3825 = vmatprep.subr.bf16.mxu1 %v6059_v53  ;;  %3865 = vmatprep.subr.bf16.mxu0 %v6060_v36 }
 0x6e3   :  { %3827 = vmatpush1.bf16.msra.mxu1 %v6031_v30  ;;  %3867 = vmatpush1.bf16.msra.mxu0 %v6061_v33 }
 0x6e4   :  { %3829 = vmatprep.subr.bf16.mxu1 %v6062_v24  ;;  %3869 = vmatprep.subr.bf16.mxu0 %v6034_v43 }
 0x6e7   :  { %3831 = vmatpush1.bf16.msra.mxu1 %v6035_v39  ;;  %3871 = vmatpush1.bf16.msra.mxu0 %v6036_v40 }
 0x6e8   :  { %2019 = vmatprep.subr.mxu1 %v6037_v50  ;;  %2090 = vmatprep.subr.mxu0 %v6038_v6 }
 0x6eb   :  { %2020 = vmatpush1.msra.mxu1 %v6039_v38  ;;  %2091 = vmatpush1.msra.mxu0 %v6040_v7 }
 0x6ec   :  { %2044 = vmatmul.mubr.f32.vlgmr.msra.gmra.mrb[16].mxu1 %v1974_v17  ;;  %2115 = vmatmul.mubr.f32.vlgmr.msra.gmra.mrb[28].mxu0 %v1974_v17  ;;  %v6078_v17 = vld [vmem:[#allocation17_spill] sm:$0xff] }
 0x6ed   :  { %3873 = vmatprep.subr.bf16.mxu1 %v6041_v20  ;;  %3905 = vmatprep.subr.bf16.mxu0 %v6042_v32  ;;  %v6074_v20 = vld [vmem:[#allocation15_spill] sm:$0xff]  ;;  %v6075_v32 = vld [vmem:[#allocation30_spill] sm:$0xff] }
 0x6ee   :  { %3875 = vmatpush1.bf16.msra.mxu1 %v4704_v52  ;;  %3907 = vmatpush1.bf16.msra.mxu0 %v4978_v61  ;;  %v6063_v52 = vld [vmem:[#allocation24_spill] sm:$0xff]  ;;  %v6065_v61 = vld [vmem:[#allocation25_spill] sm:$0xff] }
 0x6ef   :  { %3877 = vmatprep.subr.bf16.mxu1 %v4713_v56  ;;  %3909 = vmatprep.subr.bf16.mxu0 %v4980_v63  ;;  %v6064_v56 = vld [vmem:[#allocation10_spill] sm:$0xff]  ;;  %v6066_v63 = vld [vmem:[#allocation11_spill] sm:$0xff] }
 0x6f0   :  { %2215 = vmatprep.mubr.f32.mxu1 %v6014_v58  ;;  %2286 = vmatprep.mubr.f32.mxu0 %v6014_v58 }
 0x6f2   :  { %3879 = vmatpush1.bf16.msra.mxu1 %v4722_v59  ;;  %3911 = vmatpush1.bf16.msra.mxu0 %v4996_v13  ;;  %v6067_v59 = vld [vmem:[#allocation26_spill] sm:$0xff]  ;;  %v6068_v13 = vld [vmem:[#allocation12_spill] sm:$0xff] }
 0x6f3   :  { %3881 = vmatprep.subr.bf16.mxu1 %v4731_v62  ;;  %3913 = vmatprep.subr.bf16.mxu0 %v5000_v14  ;;  %v6069_v62 = vld [vmem:[#allocation27_spill] sm:$0xff]  ;;  %v6070_v14 = vld [vmem:[#allocation13_spill] sm:$0xff] }
 0x6f6   :  { %3883 = vmatpush1.bf16.msra.mxu1 %v4746_v4  ;;  %3915 = vmatpush1.bf16.msra.mxu0 %v5015_v25  ;;  %v6071_v4 = vld [vmem:[#allocation28_spill] sm:$0xff]  ;;  %v6072_v25 = vld [vmem:[#allocation14_spill] sm:$0xff] }
 0x6f7   :  { %3885 = vmatprep.subr.bf16.mxu1 %v4749_v5  ;;  %3917 = vmatprep.subr.bf16.mxu0 %v6063_v52  ;;  %v6073_v5 = vld [vmem:[#allocation29_spill] sm:$0xff]  ;;  %v6079_v52 = vld [vmem:[#allocation32_spill] sm:$0xff] }
 0x6fa   :  { %3887 = vmatpush1.bf16.msra.mxu1 %v6064_v56  ;;  %3919 = vmatpush1.bf16.msra.mxu0 %v6065_v61  ;;  %v6080_v56 = vld [vmem:[#allocation18_spill] sm:$0xff]  ;;  %v6081_v61 = vld [vmem:[#allocation33_spill] sm:$0xff] }
 0x6fb   :  { %3889 = vmatprep.subr.bf16.mxu1 %v6066_v63  ;;  %3921 = vmatprep.subr.bf16.mxu0 %v6067_v59  ;;  %v6082_v63 = vld [vmem:[#allocation19_spill] sm:$0xff]  ;;  %v6083_v59 = vld [vmem:[#allocation34_spill] sm:$0xff] }
 0x6fe   :  { %3891 = vmatpush1.bf16.msra.mxu1 %v6068_v13  ;;  %3923 = vmatpush1.bf16.msra.mxu0 %v6069_v62 }
 0x6ff   :  { %3893 = vmatprep.subr.bf16.mxu1 %v6070_v14  ;;  %3925 = vmatprep.subr.bf16.mxu0 %v6071_v4  ;;  %v6084_v14 = vld [vmem:[#allocation56_spill] sm:$0xff] }
 0x702   :  { %3895 = vmatpush1.bf16.msra.mxu1 %v6072_v25  ;;  %3927 = vmatpush1.bf16.msra.mxu0 %v6073_v5 }
 0x703   :  { %3897 = vmatprep.subr.bf16.mxu1 %v6074_v20  ;;  %3929 = vmatprep.subr.bf16.mxu0 %v6075_v32 }
 0x706   :  { %3899 = vmatpush1.bf16.msra.mxu1 %v6076_v11  ;;  %3931 = vmatpush1.bf16.msra.mxu0 %v6077_v47 }
 0x707   :  { %3901 = vmatprep.subr.bf16.mxu1 %v6078_v17  ;;  %3933 = vmatprep.subr.bf16.mxu0 %v6079_v52 }
 0x70a   :  { %3903 = vmatpush1.bf16.msra.mxu1 %v6080_v56  ;;  %3935 = vmatpush1.bf16.msra.mxu0 %v6081_v61 }
 0x70b   :  { %3937 = vmatprep.subr.bf16.mxu1 %v6082_v63  ;;  %3977 = vmatprep.subr.bf16.mxu0 %v6083_v59 }
 0x7bf   :  { %v2045_v13 = vpop.f32.mrb[16].mxu1  ;;  %v2116_v62 = vpop.f32.mrb[28].mxu0 }
 0x7c0   :  { %v2121_v4 = vadd.f32 %v2045_v13, %v6084_v14  ;;  %v2047_v25 = vpop.f32.mrb[17].mxu1  ;;  %v2118_v5 = vpop.f32.mrb[29].mxu0  ;;  %v2123_v52 = vadd.f32 %v2116_v62, %v5422_v35 }
 0x7c1   :  { %v2122_v20 = vadd.f32 %v2047_v25, %v5413_v41  ;;  %v2124_v47 = vadd.f32 %v2118_v5, %v5418_v34 }
 0x7c2   :  { %v2976_v32 = vmul.f32 -1.442695, %v2121_v4 }
 0x7c3   :  { %v2977_v11 = vmul.f32 -1.442695, %v2122_v20  ;;  %v2978_v17 = vmul.f32 -1.442695, %v2124_v47 }
 0x7c4   :  { %4219 = vpow2.f32 %v2976_v32 }
 0x7c5   :  { %4221 = vpow2.f32 %v2977_v11 }
 0x7c6   :  { %4223 = vpow2.f32 %v2978_v17  ;;  %v2150_v17 = vld [vmem:[#allocation4 + $0x8] sm:$0xc0] }
 0x7c7   :  { %4225 = vtanh.f32 %v2123_v52 }
 0x7ce   :  { %v4220_v56 = vpop.eup %4219 }
 0x7cf   :  { %v4222_v61 = vpop.eup %4221  ;;  %v2128_v63 = vadd.f32 1.0, %v4220_v56  ;;  %v2296_v56 = vrot.slane %v2150_v17, 6 }
 0x7d0   :  { %v2134_v59 = vadd.f32 1.0, %v4222_v61  ;;  %v4224_v13 = vpop.eup %4223 }
 0x7d1   :  { %4227 = vrcp.f32 %v2128_v63  ;;  %v4226_v14 = vpop.eup %4225  ;;  %v2141_v32 = vadd.f32 1.0, %v4224_v13 }
 0x7d2   :  { %4229 = vrcp.f32 %v2134_v59 }
 0x7d3   :  { %4231 = vrcp.f32 %v2141_v32 }
 0x7db   :  { %v4228_v25 = vpop.eup %4227 }
 0x7dc   :  { %v4230_v4 = vpop.eup %4229  ;;  %v2145_v20 = vmul.f32 %v4228_v25, %v4226_v14 }
 0x7dd   :  { %v2144_v11 = vmul.f32 %v4230_v4, %v5517_v29  ;;  %v4232_v62 = vpop.eup %4231  ;;  %v6087_v29 = vld [vmem:[#allocation56_spill] sm:$0xff] }
 0x7df   :  { %v5609_v5 = vadd.f32 %v2145_v20, %v2144_v11 }
 0x7e1   :  { %4233 = vtanh.f32 %v5609_v5 }
 0x7eb   :  { %v4234_v47 = vpop.eup %4233 }
 0x7ec   :  { %v5612_v52 = vmul.f32 %v4234_v47, %v4232_v62 }
 0x7ee   :  { %2216 = vmatmul.mubr.f32.vlgmr.msra.gmra.mrb[18].mxu1 %v5612_v52  ;;  %2287 = vmatmul.mubr.f32.vlgmr.msra.gmra.mrb[30].mxu0 %v5612_v52 }
 0x7ef   :  { %3939 = vmatpush1.bf16.msra.mxu1 %v4857_v44  ;;  %3979 = vmatpush1.bf16.msra.mxu0 %v5123_v54  ;;  %v2149_v44 = vld [vmem:[#allocation4] sm:$0xc0] }
 0x7f0   :  { %2979 = vmatprep.mubr.msk.f32.mxu1 %vm1018_vm3, %v2296_v56  ;;  %2980 = vmatprep.mubr.msk.f32.mxu0 %vm1018_vm3, %v2296_v56  ;;  %v2474_v54 = vld [vmem:[%s5864_s12 + $0x20] sm:$0xff] }
 0x7f1   :  { %3941 = vmatprep.subr.bf16.mxu1 %v4860_v48  ;;  %3981 = vmatprep.subr.bf16.mxu0 %v5126_v57  ;;  %v2470_v48 = vld [vmem:[%s5864_s12] sm:$0xff]  ;;  %v2475_v57 = vld [vmem:[%s5864_s12 + $0x28] sm:$0xff] }
 0x7f3   :  { %3943 = vmatpush1.bf16.msra.mxu1 %v4878_v55  ;;  %3983 = vmatpush1.bf16.msra.mxu0 %v5142_v15  ;;  %v2471_v55 = vld [vmem:[%s5864_s12 + $0x8] sm:$0xff]  ;;  %v4023_v15 = vpack.c.bf16 %v2475_v57, %v2474_v54 }
 0x7f4   :  { %3945 = vmatprep.subr.bf16.mxu1 %v4881_v60  ;;  %3985 = vmatprep.subr.bf16.mxu0 %v5145_v22  ;;  %v2295_v60 = vrot.slane %v2149_v44, 6  ;;  %v2476_v22 = vld [vmem:[%s5864_s12 + $0x30] sm:$0xff] }
 0x7f7   :  { %3947 = vmatpush1.bf16.msra.mxu1 %v4896_v2  ;;  %3987 = vmatpush1.bf16.msra.mxu0 %v5160_v42  ;;  %v5664_v2 = vpack.c.bf16 %v2471_v55, %v2470_v48  ;;  %v2477_v42 = vld [vmem:[%s5864_s12 + $0x38] sm:$0xff] }
 0x7f8   :  { %3949 = vmatprep.subr.bf16.mxu1 %v4899_v9  ;;  %3989 = vmatprep.subr.bf16.mxu0 %v5163_v45  ;;  %v2472_v9 = vld [vmem:[%s5864_s12 + $0x10] sm:$0xff]  ;;  %v4026_v45 = vpack.c.bf16 %v2477_v42, %v2476_v22 }
 0x7fb   :  { %3951 = vmatpush1.bf16.msra.mxu1 %v4914_v16  ;;  %3991 = vmatpush1.bf16.msra.mxu0 %v5178_v10  ;;  %v2473_v16 = vld [vmem:[%s5864_s12 + $0x18] sm:$0xff]  ;;  %v2478_v10 = vld [vmem:[%s5864_s12 + $0x40] sm:$0xff] }
 0x7fc   :  { %3953 = vmatprep.subr.bf16.mxu1 %v4917_v21  ;;  %3993 = vmatprep.subr.bf16.mxu0 %v5181_v27  ;;  %v6085_v21 = vmov 0.0|0.0   ;;  %v2479_v27 = vld [vmem:[%s5864_s12 + $0x48] sm:$0xff] }
 0x7ff   :  { %3955 = vmatpush1.bf16.msra.mxu1 %v4932_v28  ;;  %3995 = vmatpush1.bf16.msra.mxu0 %v6017_v19  ;;  %v4020_v28 = vpack.c.bf16 %v2473_v16, %v2472_v9  ;;  %v4029_v19 = vpack.c.bf16 %v2479_v27, %v2478_v10 }
 0x800   :  { %3957 = vmatprep.subr.bf16.mxu1 %v6018_v49  ;;  %3997 = vmatprep.subr.bf16.mxu0 %v6019_v3  ;;  %v2480_v49 = vld [vmem:[%s5864_s12 + $0x50] sm:$0xff]  ;;  %v2481_v3 = vld [vmem:[%s5864_s12 + $0x58] sm:$0xff] }
 0x803   :  { %3959 = vmatpush1.bf16.msra.mxu1 %v6020_v8  ;;  %3999 = vmatpush1.bf16.msra.mxu0 %v6021_v31  ;;  %v4032_v8 = vpack.c.bf16 %v2481_v3, %v2480_v49  ;;  %v2482_v31 = vld [vmem:[%s5864_s12 + $0x60] sm:$0xff] }
 0x804   :  { %3961 = vmatprep.subr.bf16.mxu1 %v6051_v23  ;;  %4001 = vmatprep.subr.bf16.mxu0 %v6052_v26 }
 0x807   :  { %3963 = vmatpush1.bf16.msra.mxu1 %v6053_v37  ;;  %4003 = vmatpush1.bf16.msra.mxu0 %v6054_v51 }
 0x808   :  { %3965 = vmatprep.subr.bf16.mxu1 %v6055_v46  ;;  %4005 = vmatprep.subr.bf16.mxu0 %v6056_v0 }
 0x80b   :  { %3967 = vmatpush1.bf16.msra.mxu1 %v6057_v12  ;;  %4007 = vmatpush1.bf16.msra.mxu0 %v6058_v1 }
 0x80c   :  { %3969 = vmatprep.subr.bf16.mxu1 %v6059_v53  ;;  %4009 = vmatprep.subr.bf16.mxu0 %v6060_v36 }
 0x80f   :  { %3971 = vmatpush1.bf16.msra.mxu1 %v6031_v30  ;;  %4011 = vmatpush1.bf16.msra.mxu0 %v6061_v33 }
 0x810   :  { %3973 = vmatprep.subr.bf16.mxu1 %v6062_v24  ;;  %4013 = vmatprep.subr.bf16.mxu0 %v6034_v43 }
 0x813   :  { %3975 = vmatpush1.bf16.msra.mxu1 %v6035_v39  ;;  %4015 = vmatpush1.bf16.msra.mxu0 %v6036_v40  ;;  %v2484_v39 = vld [vmem:[%s5864_s12 + $0x70] sm:$0xff]  ;;  %v2485_v40 = vld [vmem:[%s5864_s12 + $0x78] sm:$0xff] }
 0x814   :  { %2340 = vmatprep.subr.mxu1 %v6037_v50  ;;  %2411 = vmatprep.subr.mxu0 %v6038_v6  ;;  %v4038_v50 = vpack.c.bf16 %v2485_v40, %v2484_v39  ;;  %v6086_v6 = vld [vmem:[#allocation57_spill] sm:$0xff] }
 0x815   :  { %v2832_v39 = vld [vmem:[%s5867_s15 + $0x18] sm:$0xff] }
 0x817   :  { %2341 = vmatpush1.msra.mxu1 %v6039_v38  ;;  %2412 = vmatpush1.msra.mxu0 %v6040_v7  ;;  %v2483_v38 = vld [vmem:[%s5864_s12 + $0x68] sm:$0xff] }
 0x818   :  { %2365 = vmatmul.mubr.f32.vlgmr.msra.gmra.mrb[18].mxu1 %v2295_v60  ;;  %2436 = vmatmul.mubr.f32.vlgmr.msra.gmra.mrb[30].mxu0 %v2295_v60  ;;  %v4035_v43 = vpack.c.bf16 %v2483_v38, %v2482_v31  ;;  %v2830_v31 = vld [vmem:[%s5867_s15 + $0x8] sm:$0xff] }
 0x819   :  { %4016 = vmatprep.subr.bf16.mxu1 %v6085_v21  ;;  %4040 = vmatprep.subr.bf16.mxu0 %v6085_v21 }
 0x81a   :  { %4018 = vmatpush3.bf16.msra.mxu1 %v5664_v2  ;;  %4042 = vmatpush3.bf16.msra.mxu0 %v5664_v2 }
 0x81b   :  { %4019 = vmatprep.subr.bf16.mxu1 %v6085_v21  ;;  %4043 = vmatprep.subr.bf16.mxu0 %v6085_v21 }
 0x81c   :  { %3241 = vmatprep.mubr.msk.f32.mxu1 %vm4294_vm0, %v6014_v58  ;;  %3276 = vmatprep.mubr.msk.f32.mxu0 %vm4294_vm0, %v6014_v58 }
 0x81e   :  { %4021 = vmatpush3.bf16.msra.mxu1 %v4020_v28  ;;  %4045 = vmatpush3.bf16.msra.mxu0 %v4020_v28 }
 0x81f   :  { %4022 = vmatprep.subr.bf16.mxu1 %v6085_v21  ;;  %4046 = vmatprep.subr.bf16.mxu0 %v6085_v21 }
 0x822   :  { %4024 = vmatpush3.bf16.msra.mxu1 %v4023_v15  ;;  %4048 = vmatpush3.bf16.msra.mxu0 %v4023_v15 }
 0x823   :  { %4025 = vmatprep.subr.bf16.mxu1 %v6085_v21  ;;  %4049 = vmatprep.subr.bf16.mxu0 %v6085_v21 }
 0x826   :  { %4027 = vmatpush3.bf16.msra.mxu1 %v4026_v45  ;;  %4051 = vmatpush3.bf16.msra.mxu0 %v4026_v45 }
 0x827   :  { %4028 = vmatprep.subr.bf16.mxu1 %v6085_v21  ;;  %4052 = vmatprep.subr.bf16.mxu0 %v6085_v21 }
 0x82a   :  { %4030 = vmatpush3.bf16.msra.mxu1 %v4029_v19  ;;  %4054 = vmatpush3.bf16.msra.mxu0 %v4029_v19 }
 0x82b   :  { %4031 = vmatprep.subr.bf16.mxu1 %v6085_v21  ;;  %4055 = vmatprep.subr.bf16.mxu0 %v6085_v21 }
 0x82e   :  { %4033 = vmatpush3.bf16.msra.mxu1 %v4032_v8  ;;  %4057 = vmatpush3.bf16.msra.mxu0 %v4032_v8 }
 0x82f   :  { %4034 = vmatprep.subr.bf16.mxu1 %v6085_v21  ;;  %4058 = vmatprep.subr.bf16.mxu0 %v6085_v21 }
 0x832   :  { %4036 = vmatpush3.bf16.msra.mxu1 %v4035_v43  ;;  %4060 = vmatpush3.bf16.msra.mxu0 %v4035_v43 }
 0x833   :  { %4037 = vmatprep.subr.bf16.mxu1 %v6085_v21  ;;  %4061 = vmatprep.subr.bf16.mxu0 %v6085_v21 }
 0x836   :  { %4039 = vmatpush3.bf16.msra.mxu1 %v4038_v50  ;;  %4063 = vmatpush3.bf16.msra.mxu0 %v4038_v50 }
 0x837   :  { %4064 = vmatprep.subr.bf16.mxu1 %v6085_v21  ;;  %4088 = vmatprep.subr.bf16.mxu0 %v6085_v21 }
 0x839   :  { %3242 = vmatmul.mubr.f32.vlgmr.msra.gmra.mrb[20].mxu1 %v6086_v6  ;;  %3277 = vmatmul.mubr.f32.vlgmr.msra.gmra.mrb[32].mxu0 %v5520_v18 }
 0x83a   :  { %4066 = vmatpush3.bf16.msra.mxu1 %v5664_v2  ;;  %3311 = vmatprep.mubr.msk.f32.mxu1 %vm4294_vm0, %v6014_v58 }
 0x83b   :  { %4067 = vmatprep.subr.bf16.mxu1 %v6085_v21  ;;  %4090 = vmatpush3.bf16.msra.mxu0 %v5664_v2 }
 0x83c   :  { %4091 = vmatprep.subr.bf16.mxu0 %v6085_v21  ;;  %3346 = vmatprep.mubr.msk.f32.mxu0 %vm4294_vm0, %v6014_v58 }
 0x83e   :  { %4069 = vmatpush3.bf16.msra.mxu1 %v4020_v28 }
 0x83f   :  { %4070 = vmatprep.subr.bf16.mxu1 %v6085_v21  ;;  %4093 = vmatpush3.bf16.msra.mxu0 %v4020_v28 }
 0x840   :  { %4094 = vmatprep.subr.bf16.mxu0 %v6085_v21 }
 0x842   :  { %4072 = vmatpush3.bf16.msra.mxu1 %v4023_v15 }
 0x843   :  { %4073 = vmatprep.subr.bf16.mxu1 %v6085_v21  ;;  %4096 = vmatpush3.bf16.msra.mxu0 %v4023_v15 }
 0x844   :  { %4097 = vmatprep.subr.bf16.mxu0 %v6085_v21 }
 0x846   :  { %4075 = vmatpush3.bf16.msra.mxu1 %v4026_v45 }
 0x847   :  { %4076 = vmatprep.subr.bf16.mxu1 %v6085_v21  ;;  %4099 = vmatpush3.bf16.msra.mxu0 %v4026_v45 }
 0x848   :  { %4100 = vmatprep.subr.bf16.mxu0 %v6085_v21 }
 0x84a   :  { %4078 = vmatpush3.bf16.msra.mxu1 %v4029_v19 }
 0x84b   :  { %4079 = vmatprep.subr.bf16.mxu1 %v6085_v21  ;;  %4102 = vmatpush3.bf16.msra.mxu0 %v4029_v19 }
 0x84c   :  { %4103 = vmatprep.subr.bf16.mxu0 %v6085_v21 }
 0x84e   :  { %4081 = vmatpush3.bf16.msra.mxu1 %v4032_v8 }
 0x84f   :  { %4082 = vmatprep.subr.bf16.mxu1 %v6085_v21  ;;  %4105 = vmatpush3.bf16.msra.mxu0 %v4032_v8  ;;  %v2829_v8 = vld [vmem:[%s5867_s15] sm:$0xff] }
 0x850   :  { %4106 = vmatprep.subr.bf16.mxu0 %v6085_v21  ;;  %v4113_v38 = vpack.c.bf16 %v2830_v31, %v2829_v8 }
 0x852   :  { %4084 = vmatpush3.bf16.msra.mxu1 %v4035_v43 }
 0x853   :  { %4085 = vmatprep.subr.bf16.mxu1 %v6085_v21  ;;  %4108 = vmatpush3.bf16.msra.mxu0 %v4035_v43  ;;  %v2831_v43 = vld [vmem:[%s5867_s15 + $0x10] sm:$0xff] }
 0x854   :  { %4109 = vmatprep.subr.bf16.mxu0 %v6085_v21  ;;  %v4116_v40 = vpack.c.bf16 %v2832_v39, %v2831_v43 }
 0x856   :  { %4087 = vmatpush3.bf16.msra.mxu1 %v4038_v50 }
 0x857   :  { %4111 = vmatpush3.bf16.msra.mxu0 %v4038_v50  ;;  %4112 = vmatprep.subr.bf16.mxu1 %v6085_v21  ;;  %v2833_v50 = vld [vmem:[%s5867_s15 + $0x20] sm:$0xff] }
 0x859   :  { %3312 = vmatmul.mubr.f32.vlgmr.msra.gmra.mrb[22].mxu1 %v5612_v52 }
 0x85a   :  { %3381 = vmatprep.mubr.msk.f32.mxu1 %vm4294_vm0, %v6014_v58  ;;  %4114 = vmatpush3.bf16.msra.mxu1 %v4113_v38  ;;  %vm2922_vm0 = vcmask 41984  }
 0x85b   :  { %4115 = vmatprep.subr.bf16.mxu1 %v6085_v21 }
 0x85e   :  { %4117 = vmatpush3.bf16.msra.mxu1 %v4116_v40 }
 0x85f   :  { %4118 = vmatprep.subr.bf16.mxu1 %v6085_v21 }
 0x8eb   :  { %v2366_v7 = vpop.f32.mrb[18].mxu1  ;;  %v2437_v30 = vpop.f32.mrb[30].mxu0 }
 0x8ec   :  { %v2442_v23 = vadd.f32 %v2366_v7, %v6087_v29  ;;  %v2368_v26 = vpop.f32.mrb[19].mxu1  ;;  %v2439_v37 = vpop.f32.mrb[31].mxu0  ;;  %v2444_v53 = vadd.f32 %v2437_v30, %v5422_v35  ;;  %v2984_v35 = vld [vmem:[%s5865_s13] ss:$0 sm:$0xff]  ;;  %v2834_v7 = vld [vmem:[%s5867_s15 + $0x28] sm:$0xff]  ;;  %v2835_v29 = vld [vmem:[%s5867_s15 + $0x30] sm:$0xff] }
 0x8ed   :  { %v2443_v51 = vadd.f32 %v2368_v26, %v5413_v41  ;;  %v2445_v12 = vadd.f32 %v2439_v37, %v5418_v34  ;;  %v4119_v30 = vpack.c.bf16 %v2834_v7, %v2833_v50  ;;  %v2837_v37 = vld [vmem:[%s5867_s15 + $0x40] sm:$0xff] }
 0x8ee   :  { %v2981_v46 = vmul.f32 -1.442695, %v2442_v23  ;;  %v2836_v23 = vld [vmem:[%s5867_s15 + $0x38] sm:$0xff] }
 0x8ef   :  { %v2982_v0 = vmul.f32 -1.442695, %v2443_v51  ;;  %v2983_v1 = vmul.f32 -1.442695, %v2445_v12  ;;  %4120 = vmatpush3.bf16.msra.mxu1 %v4119_v30  ;;  %v4122_v26 = vpack.c.bf16 %v2836_v23, %v2835_v29  ;;  %v2838_v51 = vld [vmem:[%s5867_s15 + $0x48] sm:$0xff]  ;;  %v2840_v12 = vld [vmem:[%s5867_s15 + $0x58] sm:$0xff] }
 0x8f0   :  { %4235 = vpow2.f32 %v2981_v46  ;;  %4121 = vmatprep.subr.bf16.mxu1 %v6085_v21  ;;  %v4125_v46 = vpack.c.bf16 %v2838_v51, %v2837_v37 }
 0x8f1   :  { %4237 = vpow2.f32 %v2982_v0  ;;  %v2839_v0 = vld [vmem:[%s5867_s15 + $0x50] sm:$0xff] }
 0x8f2   :  { %4239 = vpow2.f32 %v2983_v1  ;;  %v4128_v1 = vpack.c.bf16 %v2840_v12, %v2839_v0 }
 0x8f3   :  { %4241 = vtanh.f32 %v2444_v53  ;;  %4123 = vmatpush3.bf16.msra.mxu1 %v4122_v26  ;;  %v2841_v53 = vld [vmem:[%s5867_s15 + $0x60] sm:$0xff] }
 0x8f4   :  { %4124 = vmatprep.subr.bf16.mxu1 %v6085_v21 }
 0x8f7   :  { %4126 = vmatpush3.bf16.msra.mxu1 %v4125_v46 }
 0x8f8   :  { %4127 = vmatprep.subr.bf16.mxu1 %v6085_v21 }
 0x8fa   :  { %v4236_v36 = vpop.eup %4235 }
 0x8fb   :  { %v4238_v33 = vpop.eup %4237  ;;  %v2449_v58 = vadd.f32 1.0, %v4236_v36  ;;  %v2842_v36 = vld [vmem:[%s5867_s15 + $0x68] sm:$0xff]  ;;  %4129 = vmatpush3.bf16.msra.mxu1 %v4128_v1 }
 0x8fc   :  { %v2455_v24 = vadd.f32 1.0, %v4238_v33  ;;  %v4240_v14 = vpop.eup %4239  ;;  %v4131_v33 = vpack.c.bf16 %v2842_v36, %v2841_v53  ;;  %4130 = vmatprep.subr.bf16.mxu1 %v6085_v21 }
 0x8fd   :  { %4243 = vrcp.f32 %v2449_v58  ;;  %v4242_v61 = vpop.eup %4241  ;;  %v2462_v13 = vadd.f32 1.0, %v4240_v14  ;;  %v2843_v58 = vld [vmem:[%s5867_s15 + $0x70] sm:$0xff] }
 0x8fe   :  { %4245 = vrcp.f32 %v2455_v24  ;;  %v2844_v24 = vld [vmem:[%s5867_s15 + $0x78] sm:$0xff] }
 0x8ff   :  { %4247 = vrcp.f32 %v2462_v13  ;;  %4132 = vmatpush3.bf16.msra.mxu1 %v4131_v33  ;;  %v4134_v14 = vpack.c.bf16 %v2844_v24, %v2843_v58 }
 0x900   :  { %4133 = vmatprep.subr.bf16.mxu1 %v6085_v21 }
 0x903   :  { %4135 = vmatpush3.bf16.msra.mxu1 %v4134_v14 }
 0x907   :  { %v4244_v41 = vpop.eup %4243 }
 0x908   :  { %v4246_v63 = vpop.eup %4245  ;;  %v2466_v59 = vmul.f32 %v4244_v41, %v4242_v61 }
 0x909   :  { %v2465_v25 = vmul.f32 %v4246_v63, %v5609_v5  ;;  %v4248_v17 = vpop.eup %4247  ;;  %v2985_v5 = vld [vmem:[%s5866_s14] ss:$0 sm:$0xff] }
 0x90b   :  { %v2467_v34 = vadd.f32 %v2466_v59, %v2465_v25 }
 0x90c   :  { %v2560_v4 = vpop.f32.mrb[20].mxu1  ;;  %v2641_v20 = vpop.f32.mrb[32].mxu0 }
 0x90d   :  { %4249 = vtanh.f32 %v2467_v34  ;;  %v2561_v32 = vadd.f32 %v2984_v35, %v2560_v4  ;;  %v2642_v11 = vadd.f32 %v2984_v35, %v2641_v20  ;;  %v3243_v62 = vpop.f32.mrb[21].mxu1  ;;  %v3278_v47 = vpop.f32.mrb[33].mxu0 }
 0x90f   :  { %4251 = vtanh.f32 %v2561_v32 }
 0x910   :  { %4253 = vtanh.f32 %v2642_v11 }
 0x917   :  { %v4250_v56 = vpop.eup %4249 }
 0x918   :  { %v5771_v44 = vmul.f32 %v4250_v56, %v4248_v17 }
 0x919   :  { %v4252_v48 = vpop.eup %4251 }
 0x91a   :  { %v4254_v55 = vpop.eup %4253  ;;  %3347 = vmatmul.mubr.f32.vlgmr.msra.gmra.mrb[34].mxu0 %v5771_v44  ;;  %v2571_v60 = vmul.f32 %v4252_v48, %v2985_v5 }
 0x91b   :  { %v2646_v2 = vmul.f32 %v4254_v55, %v2985_v5 }
 0x91c   :  { %v2572_v9 = vsel %vm504_vm4, %v2571_v60, 0.0 }
 0x91d   :  { %v2647_v16 = vsel %vm504_vm4, %v2646_v2, 0.0  ;;  %2573 = vadd.xlane.f32.xlu0 %v2572_v9 }
 0x91e   :  { %2648 = vadd.xlane.f32.xlu1 %v2647_v16 }
 0x92c   :  { %v2716_v28 = vpop.f32.mrb[22].mxu1 }
 0x92d   :  { %v2717_v54 = vadd.f32 %v2984_v35, %v2716_v28  ;;  %v3313_v57 = vpop.f32.mrb[23].mxu1 }
 0x92f   :  { %4255 = vtanh.f32 %v2717_v54 }
 0x939   :  { %v4256_v15 = vpop.eup %4255 }
 0x93a   :  { %v2721_v22 = vmul.f32 %v4256_v15, %v2985_v5 }
 0x93c   :  { %v2722_v42 = vsel %vm504_vm4, %v2721_v22, 0.0 }
 0x93d   :  { %2723 = vadd.xlane.f32.xlu0 %v2722_v42 }
 0x9aa   :  { %v2574_v61 = vpop.xlane.xlu0 %2573 }
 0x9ab   :  { %v2649_v41 = vpop.xlane.xlu1 %2648 }
 0x9ac   :  { %v2800_v59 = vmax.f32 %v2574_v61, %v2649_v41 }
 0x9ca   :  { %v2724_v63 = vpop.xlane.xlu0 %2723 }
 0x9cb   :  { %v2801_v13 = vmax.f32 %v2800_v59, %v2724_v63 }
 0x9ed   :  { %v2791_v45 = vpop.f32.mrb[34].mxu0 }
 0x9ee   :  { %v2792_v10 = vadd.f32 %v2984_v35, %v2791_v45  ;;  %v3348_v27 = vpop.f32.mrb[35].mxu0 }
 0x9f0   :  { %4257 = vtanh.f32 %v2792_v10  ;;  %v2986_v10 = vld [vmem:[%s5868_s16] ss:$0 sm:$0xff] }
 0x9fa   :  { %v4258_v19 = vpop.eup %4257 }
 0x9fb   :  { %v2796_v49 = vmul.f32 %v4258_v19, %v2985_v5 }
 0x9fd   :  { %v2797_v3 = vsel %vm504_vm4, %v2796_v49, 0.0 }
 0x9fe   :  { %2798 = vadd.xlane.f32.xlu0 %v2797_v3 }
 0xa8b   :  { %v2799_v25 = vpop.xlane.xlu0 %2798 }
 0xa8c   :  { %v2802_v35 = vmax.f32 %v2801_v13, %v2799_v25 }
 0xa8e   :  { %v2803_v34 = vsub.f32 %v2574_v61, %v2802_v35  ;;  %v2809_v4 = vsub.f32 %v2649_v41, %v2802_v35  ;;  %v2815_v20 = vsub.f32 %v2724_v63, %v2802_v35  ;;  %v2821_v32 = vsub.f32 %v2799_v25, %v2802_v35 }
 0xa90   :  { %v2804_v11 = vmul.f32 1.442695, %v2803_v34  ;;  %v2810_v62 = vmul.f32 1.442695, %v2809_v4  ;;  %v2816_v47 = vmul.f32 1.442695, %v2815_v20 }
 0xa91   :  { %v2822_v17 = vmul.f32 1.442695, %v2821_v32 }
 0xa92   :  { %4259 = vpow2.f32 %v2804_v11 }
 0xa93   :  { %4261 = vpow2.f32 %v2810_v62 }
 0xa94   :  { %4263 = vpow2.f32 %v2816_v47 }
 0xa95   :  { %4265 = vpow2.f32 %v2822_v17 }
 0xa9c   :  { %v4260_v21 = vpop.eup %4259 }
 0xa9d   :  { %v4262_v56 = vpop.eup %4261  ;;  %v2807_v2 = vmul.f32 %v4260_v21, %v6086_v6 }
 0xa9e   :  { %v2812_v5 = vadd.f32 %v4262_v56, %v4260_v21  ;;  %v4264_v48 = vpop.eup %4263  ;;  %v2813_v9 = vmul.f32 %v4262_v56, %v5520_v18 }
 0xa9f   :  { %v4266_v60 = vpop.eup %4265  ;;  %v2819_v54 = vmul.f32 %v4264_v48, %v5612_v52 }
 0xaa0   :  { %v2818_v55 = vadd.f32 %v4264_v48, %v2812_v5  ;;  %v2814_v28 = vadd.f32 %v2813_v9, %v2807_v2  ;;  %v2825_v15 = vmul.f32 %v4266_v60, %v5771_v44 }
 0xaa2   :  { %v2824_v16 = vadd.f32 %v4266_v60, %v2818_v55  ;;  %v2820_v57 = vadd.f32 %v2819_v54, %v2814_v28 }
 0xaa4   :  { %4267 = vrcp.f32 %v2824_v16  ;;  %v2826_v22 = vadd.f32 %v2825_v15, %v2820_v57 }
 0xaae   :  { %v4268_v42 = vpop.eup %4267 }
 0xaaf   :  { %v2828_v45 = vmul.f32 %v4268_v42, %v2826_v22 }
 0xab1   :  { %3382 = vmatmul.mubr.f32.vlgmr.msra.gmra.mrb[24].mxu1 %v2828_v45 }
 0xb84   :  { %v2918_v6 = vpop.f32.mrb[24].mxu1 }
 0xb85   :  { %v2919_v18 = vadd.f32 %v2986_v10, %v2918_v6  ;;  %v3383_v27 = vpop.f32.mrb[25].mxu1 }
 0xb87   :  { %2923 = vst.msk [vmem:[#allocation5] sm:$0x3] %vm2922_vm0, %v2919_v18 }
 0xb88   :  { %4280 = shalt.err (!%p4277_p4)
}
 0xb89   :  { %s4281_s28 = scalar_lea.hbm %s5869_s17, 32 }
 0xb8a   :  { %p4282_p5 = scmp.ne.s32.totalorder %s5869_s17, %s4281_s28  ;;  %p4285_p6 = scmp.lt.u32.totalorder %s4281_s28, %s5869_s17 }
 0xb8c   :  { %p4287_p7 = pnand %p4285_p6, %p4282_p5 }
 0xb8e   :  { %4290 = shalt.err (!%p4287_p7)
}
 0xb8f   :  { %2933 = dma.vmem_to_hbm [thread:$0]  %s2931_s30, 32, %s5869_s17, [#allocation6]  }
 0xb90   :  { %4291 = dma.done.wait [#allocation6], 32  }
 0xb91   :  { %4292 = vsyncadd [#allocation6], 4294967264 }
 0xb92   :  { %2937 = vsyncpa [#allocation6], 1 }

</bundles_post_ra>
